<compile_context>
chip_gen: v7x
topology: tpu7x:2x2x1
jax: 0.10.0
libtpu: 0.0.40
codegen_flags: <defaults>
</compile_context>

<pallas_src>
import functools

import jax
import jax.numpy as jnp
from jax.experimental import pallas as pl
from jax.experimental.pallas import tpu as pltpu

_SUBLANE = 8
_LANE = 128


def _round_up(n, m):
    return ((n + m - 1) // m) * m


def _gru_kernel(*refs, num_layers, hidden_pad, seq_len, batch_pad):
    """Single invocation: full GRU stack + fused fc, recurrence unrolled in-kernel."""
    if num_layers > 1:
        (x_ref, w_ih0_ref, w_ihr_ref, w_hh_ref, b_ih_ref, b_hh_ref,
         w_fc_ref, b_fc_ref, out_ref, seq_ref, gi_ref) = refs
    else:
        (x_ref, w_ih0_ref, w_hh_ref, b_ih_ref, b_hh_ref,
         w_fc_ref, b_fc_ref, out_ref, seq_ref, gi_ref) = refs
        w_ihr_ref = None

    Hp = hidden_pad
    Bp = batch_pad
    T = seq_len

    h_last = None
    for l in range(num_layers):  # static unroll over layers (num_layers is small)
        # ---- Hoisted input projection: ONE matmul over all time steps ----
        if l == 0:
            layer_in = x_ref[...]            # (T*Bp, input_size)
            w_ih = w_ih0_ref[...]            # (input_size, 3*Hp)
        else:
            layer_in = seq_ref[...]          # (T*Bp, Hp) -- previous layer's sequence
            w_ih = w_ihr_ref[l - 1]          # (Hp, 3*Hp)
        gi_ref[...] = (jnp.dot(layer_in, w_ih, preferred_element_type=jnp.float32)
                       + b_ih_ref[l])        # (T*Bp, 3*Hp)

        w_hh = w_hh_ref[l]                   # (Hp, 3*Hp)
        b_hh = b_hh_ref[l]                   # (1, 3*Hp)
        is_last_layer = (l == num_layers - 1)

        def step(t, h, _static=False):
            if _static:
                row = t * Bp                                   # static slice: free
            else:
                row = pl.multiple_of(t * Bp, Bp)               # aligned dynamic slice
            gi = gi_ref[pl.ds(row, Bp), :]                     # (Bp, 3*Hp)
            gh = jnp.dot(h, w_hh, preferred_element_type=jnp.float32) + b_hh
            # Lane-aligned gate blocks (each Hp = multiple of 128 lanes).
            r = jax.nn.sigmoid(gi[:, 0:Hp] + gh[:, 0:Hp])
            z = jax.nn.sigmoid(gi[:, Hp:2 * Hp] + gh[:, Hp:2 * Hp])
            n = jnp.tanh(gi[:, 2 * Hp:3 * Hp] + r * gh[:, 2 * Hp:3 * Hp])
            h_new = (1.0 - z) * n + z * h
            if not is_last_layer:
                # Only intermediate layers feed the next layer's projection.
                seq_ref[pl.ds(row, Bp), :] = h_new
            return h_new

        h = jnp.zeros((Bp, Hp), jnp.float32)
        if T <= 32:
            # Short sequence: fully unroll the time loop statically.
            for t in range(T):
                h = step(t, h, _static=True)
        else:
            h = jax.lax.fori_loop(0, T, lambda t, hh: step(t, hh), h)
        h_last = h

    # Fused fc on the final hidden state of the last layer; single dense (Bp, Op) store.
    out_ref[...] = (jnp.dot(h_last, w_fc_ref[...], preferred_element_type=jnp.float32)
                    + b_fc_ref[...]).astype(out_ref.dtype)


def pack_params(params, *, input_size, hidden_size, num_layers, output_size):
    """Pad/pack logical weights into lane-aligned layout (each gate block -> Hp=128k).

    Zero padding keeps the padded hidden units exactly zero through the recurrence,
    so results match the unpadded GRU bit-for-bit (modulo matmul precision).
    """
    del input_size
    H = hidden_size
    Hp = _round_up(H, _LANE)
    Op = _round_up(output_size, _LANE)

    def pad_gate_cols(w):  # (rows, 3H) -> (rows, 3*Hp), per-gate zero padding
        parts = [w[:, g * H:(g + 1) * H] for g in range(3)]
        parts = [jnp.pad(p, ((0, 0), (0, Hp - H))) for p in parts]
        return jnp.concatenate(parts, axis=1)

    def pad_rows(w, rows_to):
        return jnp.pad(w, ((0, rows_to - w.shape[0]), (0, 0)))

    packed = {
        "w_ih0": pad_gate_cols(params["w_ih0"]),                             # (In, 3Hp)
        "w_hh": jnp.stack([pad_rows(pad_gate_cols(params["w_hh"][l]), Hp)
                           for l in range(num_layers)], axis=0),             # (L, Hp, 3Hp)
        "b_ih": jnp.stack([pad_gate_cols(params["b_ih"][l].reshape(1, 3 * H))
                           for l in range(num_layers)], axis=0),             # (L, 1, 3Hp)
        "b_hh": jnp.stack([pad_gate_cols(params["b_hh"][l].reshape(1, 3 * H))
                           for l in range(num_layers)], axis=0),             # (L, 1, 3Hp)
    }
    if num_layers > 1:
        packed["w_ih_rest"] = jnp.stack(
            [pad_rows(pad_gate_cols(params["w_ih_rest"][l]), Hp)
             for l in range(num_layers - 1)], axis=0)                        # (L-1, Hp, 3Hp)

    w_fc = pad_rows(params["w_fc"], Hp)                                      # (Hp, out)
    packed["w_fc"] = jnp.pad(w_fc, ((0, 0), (0, Op - output_size)))          # (Hp, Op)
    packed["b_fc"] = jnp.pad(params["b_fc"].reshape(1, output_size),
                             ((0, 0), (0, Op - output_size)))                # (1, Op)
    return packed


def gru_net_forward(x, packed, *, num_layers, hidden_size, output_size):
    """JAX/Pallas equivalent of GRUNet.forward. x: (batch, seq, input_size) f32."""
    batch, seq_len, input_size = x.shape
    Hp = _round_up(hidden_size, _LANE)
    Bp = _round_up(batch, _SUBLANE)
    Op = _round_up(output_size, _LANE)

    # Time-major, batch padded to a sublane multiple, flattened so each time step
    # occupies a contiguous (Bp, input) row block -> no reshapes inside the kernel.
    x_tm = jnp.transpose(x, (1, 0, 2))                       # (T, B, In)
    x_tm = jnp.pad(x_tm, ((0, 0), (0, Bp - batch), (0, 0)))  # (T, Bp, In)
    x2d = x_tm.reshape(seq_len * Bp, input_size)             # (T*Bp, In)

    kernel = functools.partial(_gru_kernel, num_layers=num_layers,
                               hidden_pad=Hp, seq_len=seq_len, batch_pad=Bp)

    args = [x2d, packed["w_ih0"]]
    in_specs = [
        pl.BlockSpec(x2d.shape, lambda i: (0, 0)),
        pl.BlockSpec(packed["w_ih0"].shape, lambda i: (0, 0)),
    ]
    if num_layers > 1:
        args.append(packed["w_ih_rest"])
        in_specs.append(pl.BlockSpec(packed["w_ih_rest"].shape, lambda i: (0, 0, 0)))
    args += [packed["w_hh"], packed["b_ih"], packed["b_hh"],
             packed["w_fc"], packed["b_fc"]]
    in_specs += [
        pl.BlockSpec(packed["w_hh"].shape, lambda i: (0, 0, 0)),
        pl.BlockSpec(packed["b_ih"].shape, lambda i: (0, 0, 0)),
        pl.BlockSpec(packed["b_hh"].shape, lambda i: (0, 0, 0)),
        pl.BlockSpec(packed["w_fc"].shape, lambda i: (0, 0)),
        pl.BlockSpec(packed["b_fc"].shape, lambda i: (0, 0)),
    ]

    # All-layer weights stay resident in VMEM (fine at these sizes). For very large
    # hidden/num_layers, stream per-layer weights and set vmem_limit_bytes instead.
    out = pl.pallas_call(
        kernel,
        out_shape=jax.ShapeDtypeStruct((Bp, Op), jnp.float32),
        grid_spec=pltpu.PrefetchScalarGridSpec(
            num_scalar_prefetch=0,
            grid=(1,),
            in_specs=in_specs,
            out_specs=pl.BlockSpec((Bp, Op), lambda i: (0, 0)),
            scratch_shapes=[
                pltpu.VMEM((seq_len * Bp, Hp), jnp.float32),      # layer output sequence
                pltpu.VMEM((seq_len * Bp, 3 * Hp), jnp.float32),  # hoisted gate projections
            ],
        ),
        compiler_params=pltpu.CompilerParams(
            dimension_semantics=("arbitrary",),
        ),
    )(*args)
    return out[:batch, :output_size]


def init_params(key, input_size, hidden_size, num_layers, output_size):
    """PyTorch-style uniform(-1/sqrt(H), 1/sqrt(H)) init; weights stored pre-transposed."""
    H = hidden_size
    bound = 1.0 / (H ** 0.5)
    keys = jax.random.split(key, 4 * num_layers + 2)

    def u(k, shape):
        return jax.random.uniform(k, shape, jnp.float32, -bound, bound)

    w_ih_list, w_hh_list, b_ih_list, b_hh_list = [], [], [], []
    ki = 0
    for l in range(num_layers):
        in_l = input_size if l == 0 else H
        w_ih_list.append(u(keys[ki], (in_l, 3 * H))); ki += 1
        w_hh_list.append(u(keys[ki], (H, 3 * H))); ki += 1
        b_ih_list.append(u(keys[ki], (3 * H,))); ki += 1
        b_hh_list.append(u(keys[ki], (3 * H,))); ki += 1

    params = {
        "w_ih0": w_ih_list[0],
        "w_hh": jnp.stack(w_hh_list, axis=0),
        "b_ih": jnp.stack(b_ih_list, axis=0),
        "b_hh": jnp.stack(b_hh_list, axis=0),
        "w_fc": u(keys[ki], (H, output_size)),
        "b_fc": u(keys[ki + 1], (output_size,)),
    }
    if num_layers > 1:
        params["w_ih_rest"] = jnp.stack(w_ih_list[1:], axis=0)
    return params


def gru_net_reference(x, params, *, num_layers, hidden_size):
    """Pure-JAX reference mirroring PyTorch nn.GRU(batch_first=True) + Linear."""
    H = hidden_size
    batch, seq_len, _ = x.shape
    layer_input = x
    for l in range(num_layers):
        w_ih = params["w_ih0"] if l == 0 else params["w_ih_rest"][l - 1]
        w_hh = params["w_hh"][l]
        b_ih = params["b_ih"][l]
        b_hh = params["b_hh"][l]
        h = jnp.zeros((batch, H), jnp.float32)
        outs = []
        for t in range(seq_len):
            x_t = layer_input[:, t, :]
            gi = x_t @ w_ih + b_ih
            gh = h @ w_hh + b_hh
            r = jax.nn.sigmoid(gi[:, 0:H] + gh[:, 0:H])
            z = jax.nn.sigmoid(gi[:, H:2 * H] + gh[:, H:2 * H])
            n = jnp.tanh(gi[:, 2 * H:3 * H] + r * gh[:, 2 * H:3 * H])
            h = (1.0 - z) * n + z * h
            outs.append(h)
        layer_input = jnp.stack(outs, axis=1)
    return layer_input[:, -1, :] @ params["w_fc"] + params["b_fc"]


if __name__ == "__main__":
    # Small shapes consistent with the module: batch=2, seq=8, input=4, hidden=32,
    # num_layers=2, output=8.
    batch, seq_len = 2, 8
    input_size, hidden_size, num_layers, output_size = 4, 32, 2, 8

    key = jax.random.PRNGKey(0)
    k_x, k_p = jax.random.split(key)
    x = jax.random.normal(k_x, (batch, seq_len, input_size), dtype=jnp.float32)
    params = init_params(k_p, input_size, hidden_size, num_layers, output_size)
    packed = pack_params(params, input_size=input_size, hidden_size=hidden_size,
                         num_layers=num_layers, output_size=output_size)

    out = gru_net_forward(x, packed, num_layers=num_layers,
                          hidden_size=hidden_size, output_size=output_size)
    out = jax.block_until_ready(out)

    ref = gru_net_reference(x, params, num_layers=num_layers, hidden_size=hidden_size)
    assert out.shape == (batch, output_size), out.shape
    # Matmuls now run at default MXU precision (bf16 multiply / f32 accumulate),
    # so use a tolerance consistent with that path.
    assert jnp.allclose(out, ref, atol=2e-3, rtol=2e-3), "mismatch vs reference"

    print("KERNEL_OK")
</pallas_src>

<mosaic_0001>
module attributes {stable_mosaic.version = 11 : i64} {
  func.func @_gru_kernel(%arg0: i32, %arg1: memref<64x4xf32, #tpu.memory_space<vmem>>, %arg2: memref<4x384xf32, #tpu.memory_space<vmem>>, %arg3: memref<1x128x384xf32, #tpu.memory_space<vmem>>, %arg4: memref<2x128x384xf32, #tpu.memory_space<vmem>>, %arg5: memref<2x1x384xf32, #tpu.memory_space<vmem>>, %arg6: memref<2x1x384xf32, #tpu.memory_space<vmem>>, %arg7: memref<128x128xf32, #tpu.memory_space<vmem>>, %arg8: memref<1x128xf32, #tpu.memory_space<vmem>>, %arg9: memref<8x128xf32, #tpu.memory_space<vmem>>, %arg10: memref<64x128xf32, #tpu.memory_space<vmem>>, %arg11: memref<64x384xf32, #tpu.memory_space<vmem>>) attributes {dimension_semantics = [#tpu.dimension_semantics<arbitrary>], iteration_bounds = array<i64: 1>, scalar_prefetch = 0 : i64, scratch_operands = 2 : i64, tpu.core_type = #tpu.core_type<tc>, window_params = [{pipeline_mode = #tpu.pipeline_mode<synchronous>, transform_indices = @transform_0, window_bounds = array<i64: 64, 4>}, {pipeline_mode = #tpu.pipeline_mode<synchronous>, transform_indices = @transform_1, window_bounds = array<i64: 4, 384>}, {pipeline_mode = #tpu.pipeline_mode<synchronous>, transform_indices = @transform_2, window_bounds = array<i64: 1, 128, 384>}, {pipeline_mode = #tpu.pipeline_mode<synchronous>, transform_indices = @transform_3, window_bounds = array<i64: 2, 128, 384>}, {pipeline_mode = #tpu.pipeline_mode<synchronous>, transform_indices = @transform_4, window_bounds = array<i64: 2, 1, 384>}, {pipeline_mode = #tpu.pipeline_mode<synchronous>, transform_indices = @transform_5, window_bounds = array<i64: 2, 1, 384>}, {pipeline_mode = #tpu.pipeline_mode<synchronous>, transform_indices = @transform_6, window_bounds = array<i64: 128, 128>}, {pipeline_mode = #tpu.pipeline_mode<synchronous>, transform_indices = @transform_7, window_bounds = array<i64: 1, 128>}, {pipeline_mode = #tpu.pipeline_mode<synchronous>, transform_indices = @transform_8, window_bounds = array<i64: 8, 128>}]} {
    %c0 = arith.constant 0 : index
    %c0_0 = arith.constant 0 : index
    %0 = vector.load %arg1[%c0, %c0_0] : memref<64x4xf32, #tpu.memory_space<vmem>>, vector<64x4xf32>
    %c0_1 = arith.constant 0 : index
    %c0_2 = arith.constant 0 : index
    %1 = vector.load %arg2[%c0_1, %c0_2] : memref<4x384xf32, #tpu.memory_space<vmem>>, vector<4x384xf32>
    %cst = arith.constant dense<0.000000e+00> : vector<64x384xf32>
    %2 = tpu.matmul %0, %1, %cst {dimension_numbers = #tpu.dot_dimension_numbers<[1], [0], [0], [1], [0, 0, 1, 1], [], []>} : vector<64x4xf32>, vector<4x384xf32>, vector<64x384xf32> -> vector<64x384xf32>
    %c0_3 = arith.constant 0 : index
    %c0_4 = arith.constant 0 : index
    %c0_5 = arith.constant 0 : index
    %3 = vector.load %arg5[%c0_3, %c0_4, %c0_5] : memref<2x1x384xf32, #tpu.memory_space<vmem>>, vector<1x1x384xf32>
    %4 = vector.shape_cast %3 : vector<1x1x384xf32> to vector<1x384xf32>
    %5 = vector.broadcast %4 : vector<1x384xf32> to vector<64x384xf32>
    %6 = arith.addf %2, %5 : vector<64x384xf32>
    %c0_6 = arith.constant 0 : index
    %c0_7 = arith.constant 0 : index
    %7 = vector.load %arg11[%c0_6, %c0_7] : memref<64x384xf32, #tpu.memory_space<vmem>>, vector<64x384xf32>
    tpu.vector_store %arg11[%c0_6, %c0_7], %6 {strides = array<i32>} : memref<64x384xf32, #tpu.memory_space<vmem>>, vector<64x384xf32>,
    %c0_8 = arith.constant 0 : index
    %c0_9 = arith.constant 0 : index
    %c0_10 = arith.constant 0 : index
    %8 = vector.load %arg4[%c0_8, %c0_9, %c0_10] : memref<2x128x384xf32, #tpu.memory_space<vmem>>, vector<1x128x384xf32>
    %9 = vector.shape_cast %8 : vector<1x128x384xf32> to vector<128x384xf32>
    %c0_11 = arith.constant 0 : index
    %c0_12 = arith.constant 0 : index
    %c0_13 = arith.constant 0 : index
    %10 = vector.load %arg6[%c0_11, %c0_12, %c0_13] : memref<2x1x384xf32, #tpu.memory_space<vmem>>, vector<1x1x384xf32>
    %11 = vector.shape_cast %10 : vector<1x1x384xf32> to vector<1x384xf32>
    %cst_14 = arith.constant 0.000000e+00 : f32
    %12 = vector.broadcast %cst_14 : f32 to vector<8x128xf32>
    %c0_15 = arith.constant 0 : index
    %c0_16 = arith.constant 0 : index
    %13 = vector.load %arg11[%c0_15, %c0_16] : memref<64x384xf32, #tpu.memory_space<vmem>>, vector<8x384xf32>
    %cst_17 = arith.constant dense<0.000000e+00> : vector<8x384xf32>
    %14 = tpu.matmul %12, %9, %cst_17 {dimension_numbers = #tpu.dot_dimension_numbers<[1], [0], [0], [1], [0, 0, 1, 1], [], []>} : vector<8x128xf32>, vector<128x384xf32>, vector<8x384xf32> -> vector<8x384xf32>
    %15 = vector.broadcast %11 : vector<1x384xf32> to vector<8x384xf32>
    %16 = arith.addf %14, %15 : vector<8x384xf32>
    %17 = vector.extract_strided_slice %13 {offsets = [0, 0], sizes = [8, 128], strides = [1, 1]} : vector<8x384xf32> to vector<8x128xf32>
    %18 = vector.extract_strided_slice %16 {offsets = [0, 0], sizes = [8, 128], strides = [1, 1]} : vector<8x384xf32> to vector<8x128xf32>
    %19 = arith.addf %17, %18 : vector<8x128xf32>
    %20 = arith.negf %19 : vector<8x128xf32>
    %21 = math.exp %20 : vector<8x128xf32>
    %cst_18 = arith.constant 1.000000e+00 : f32
    %22 = vector.broadcast %cst_18 : f32 to vector<8x128xf32>
    %23 = arith.addf %22, %21 : vector<8x128xf32>
    %24 = arith.divf %22, %23 : vector<8x128xf32>
    %25 = vector.extract_strided_slice %13 {offsets = [0, 128], sizes = [8, 128], strides = [1, 1]} : vector<8x384xf32> to vector<8x128xf32>
    %26 = vector.extract_strided_slice %16 {offsets = [0, 128], sizes = [8, 128], strides = [1, 1]} : vector<8x384xf32> to vector<8x128xf32>
    %27 = arith.addf %25, %26 : vector<8x128xf32>
    %28 = arith.negf %27 : vector<8x128xf32>
    %29 = math.exp %28 : vector<8x128xf32>
    %cst_19 = arith.constant 1.000000e+00 : f32
    %30 = vector.broadcast %cst_19 : f32 to vector<8x128xf32>
    %31 = arith.addf %30, %29 : vector<8x128xf32>
    %32 = arith.divf %30, %31 : vector<8x128xf32>
    %33 = vector.extract_strided_slice %13 {offsets = [0, 256], sizes = [8, 128], strides = [1, 1]} : vector<8x384xf32> to vector<8x128xf32>
    %34 = vector.extract_strided_slice %16 {offsets = [0, 256], sizes = [8, 128], strides = [1, 1]} : vector<8x384xf32> to vector<8x128xf32>
    %35 = arith.mulf %24, %34 : vector<8x128xf32>
    %36 = arith.addf %33, %35 : vector<8x128xf32>
    %37 = math.tanh %36 : vector<8x128xf32>
    %cst_20 = arith.constant 1.000000e+00 : f32
    %38 = vector.broadcast %cst_20 : f32 to vector<8x128xf32>
    %39 = arith.subf %38, %32 : vector<8x128xf32>
    %40 = arith.mulf %39, %37 : vector<8x128xf32>
    %41 = arith.mulf %32, %12 : vector<8x128xf32>
    %42 = arith.addf %40, %41 : vector<8x128xf32>
    %c0_21 = arith.constant 0 : index
    %c0_22 = arith.constant 0 : index
    %43 = vector.load %arg10[%c0_21, %c0_22] : memref<64x128xf32, #tpu.memory_space<vmem>>, vector<8x128xf32>
    tpu.vector_store %arg10[%c0_21, %c0_22], %42 {strides = array<i32>} : memref<64x128xf32, #tpu.memory_space<vmem>>, vector<8x128xf32>,
    %c8 = arith.constant 8 : index
    %c0_23 = arith.constant 0 : index
    %44 = vector.load %arg11[%c8, %c0_23] : memref<64x384xf32, #tpu.memory_space<vmem>>, vector<8x384xf32>
    %cst_24 = arith.constant dense<0.000000e+00> : vector<8x384xf32>
    %45 = tpu.matmul %42, %9, %cst_24 {dimension_numbers = #tpu.dot_dimension_numbers<[1], [0], [0], [1], [0, 0, 1, 1], [], []>} : vector<8x128xf32>, vector<128x384xf32>, vector<8x384xf32> -> vector<8x384xf32>
    %46 = vector.broadcast %11 : vector<1x384xf32> to vector<8x384xf32>
    %47 = arith.addf %45, %46 : vector<8x384xf32>
    %48 = vector.extract_strided_slice %44 {offsets = [0, 0], sizes = [8, 128], strides = [1, 1]} : vector<8x384xf32> to vector<8x128xf32>
    %49 = vector.extract_strided_slice %47 {offsets = [0, 0], sizes = [8, 128], strides = [1, 1]} : vector<8x384xf32> to vector<8x128xf32>
    %50 = arith.addf %48, %49 : vector<8x128xf32>
    %51 = arith.negf %50 : vector<8x128xf32>
    %52 = math.exp %51 : vector<8x128xf32>
    %cst_25 = arith.constant 1.000000e+00 : f32
    %53 = vector.broadcast %cst_25 : f32 to vector<8x128xf32>
    %54 = arith.addf %53, %52 : vector<8x128xf32>
    %55 = arith.divf %53, %54 : vector<8x128xf32>
    %56 = vector.extract_strided_slice %44 {offsets = [0, 128], sizes = [8, 128], strides = [1, 1]} : vector<8x384xf32> to vector<8x128xf32>
    %57 = vector.extract_strided_slice %47 {offsets = [0, 128], sizes = [8, 128], strides = [1, 1]} : vector<8x384xf32> to vector<8x128xf32>
    %58 = arith.addf %56, %57 : vector<8x128xf32>
    %59 = arith.negf %58 : vector<8x128xf32>
    %60 = math.exp %59 : vector<8x128xf32>
    %cst_26 = arith.constant 1.000000e+00 : f32
    %61 = vector.broadcast %cst_26 : f32 to vector<8x128xf32>
    %62 = arith.addf %61, %60 : vector<8x128xf32>
    %63 = arith.divf %61, %62 : vector<8x128xf32>
    %64 = vector.extract_strided_slice %44 {offsets = [0, 256], sizes = [8, 128], strides = [1, 1]} : vector<8x384xf32> to vector<8x128xf32>
    %65 = vector.extract_strided_slice %47 {offsets = [0, 256], sizes = [8, 128], strides = [1, 1]} : vector<8x384xf32> to vector<8x128xf32>
    %66 = arith.mulf %55, %65 : vector<8x128xf32>
    %67 = arith.addf %64, %66 : vector<8x128xf32>
    %68 = math.tanh %67 : vector<8x128xf32>
    %cst_27 = arith.constant 1.000000e+00 : f32
    %69 = vector.broadcast %cst_27 : f32 to vector<8x128xf32>
    %70 = arith.subf %69, %63 : vector<8x128xf32>
    %71 = arith.mulf %70, %68 : vector<8x128xf32>
    %72 = arith.mulf %63, %42 : vector<8x128xf32>
    %73 = arith.addf %71, %72 : vector<8x128xf32>
    %c8_28 = arith.constant 8 : index
    %c0_29 = arith.constant 0 : index
    %74 = vector.load %arg10[%c8_28, %c0_29] : memref<64x128xf32, #tpu.memory_space<vmem>>, vector<8x128xf32>
    tpu.vector_store %arg10[%c8_28, %c0_29], %73 {strides = array<i32>} : memref<64x128xf32, #tpu.memory_space<vmem>>, vector<8x128xf32>,
    %c16 = arith.constant 16 : index
    %c0_30 = arith.constant 0 : index
    %75 = vector.load %arg11[%c16, %c0_30] : memref<64x384xf32, #tpu.memory_space<vmem>>, vector<8x384xf32>
    %cst_31 = arith.constant dense<0.000000e+00> : vector<8x384xf32>
    %76 = tpu.matmul %73, %9, %cst_31 {dimension_numbers = #tpu.dot_dimension_numbers<[1], [0], [0], [1], [0, 0, 1, 1], [], []>} : vector<8x128xf32>, vector<128x384xf32>, vector<8x384xf32> -> vector<8x384xf32>
    %77 = vector.broadcast %11 : vector<1x384xf32> to vector<8x384xf32>
    %78 = arith.addf %76, %77 : vector<8x384xf32>
    %79 = vector.extract_strided_slice %75 {offsets = [0, 0], sizes = [8, 128], strides = [1, 1]} : vector<8x384xf32> to vector<8x128xf32>
    %80 = vector.extract_strided_slice %78 {offsets = [0, 0], sizes = [8, 128], strides = [1, 1]} : vector<8x384xf32> to vector<8x128xf32>
    %81 = arith.addf %79, %80 : vector<8x128xf32>
    %82 = arith.negf %81 : vector<8x128xf32>
    %83 = math.exp %82 : vector<8x128xf32>
    %cst_32 = arith.constant 1.000000e+00 : f32
    %84 = vector.broadcast %cst_32 : f32 to vector<8x128xf32>
    %85 = arith.addf %84, %83 : vector<8x128xf32>
    %86 = arith.divf %84, %85 : vector<8x128xf32>
    %87 = vector.extract_strided_slice %75 {offsets = [0, 128], sizes = [8, 128], strides = [1, 1]} : vector<8x384xf32> to vector<8x128xf32>
    %88 = vector.extract_strided_slice %78 {offsets = [0, 128], sizes = [8, 128], strides = [1, 1]} : vector<8x384xf32> to vector<8x128xf32>
    %89 = arith.addf %87, %88 : vector<8x128xf32>
    %90 = arith.negf %89 : vector<8x128xf32>
    %91 = math.exp %90 : vector<8x128xf32>
    %cst_33 = arith.constant 1.000000e+00 : f32
    %92 = vector.broadcast %cst_33 : f32 to vector<8x128xf32>
    %93 = arith.addf %92, %91 : vector<8x128xf32>
    %94 = arith.divf %92, %93 : vector<8x128xf32>
    %95 = vector.extract_strided_slice %75 {offsets = [0, 256], sizes = [8, 128], strides = [1, 1]} : vector<8x384xf32> to vector<8x128xf32>
    %96 = vector.extract_strided_slice %78 {offsets = [0, 256], sizes = [8, 128], strides = [1, 1]} : vector<8x384xf32> to vector<8x128xf32>
    %97 = arith.mulf %86, %96 : vector<8x128xf32>
    %98 = arith.addf %95, %97 : vector<8x128xf32>
    %99 = math.tanh %98 : vector<8x128xf32>
    %cst_34 = arith.constant 1.000000e+00 : f32
    %100 = vector.broadcast %cst_34 : f32 to vector<8x128xf32>
    %101 = arith.subf %100, %94 : vector<8x128xf32>
    %102 = arith.mulf %101, %99 : vector<8x128xf32>
    %103 = arith.mulf %94, %73 : vector<8x128xf32>
    %104 = arith.addf %102, %103 : vector<8x128xf32>
    %c16_35 = arith.constant 16 : index
    %c0_36 = arith.constant 0 : index
    %105 = vector.load %arg10[%c16_35, %c0_36] : memref<64x128xf32, #tpu.memory_space<vmem>>, vector<8x128xf32>
    tpu.vector_store %arg10[%c16_35, %c0_36], %104 {strides = array<i32>} : memref<64x128xf32, #tpu.memory_space<vmem>>, vector<8x128xf32>,
    %c24 = arith.constant 24 : index
    %c0_37 = arith.constant 0 : index
    %106 = vector.load %arg11[%c24, %c0_37] : memref<64x384xf32, #tpu.memory_space<vmem>>, vector<8x384xf32>
    %cst_38 = arith.constant dense<0.000000e+00> : vector<8x384xf32>
    %107 = tpu.matmul %104, %9, %cst_38 {dimension_numbers = #tpu.dot_dimension_numbers<[1], [0], [0], [1], [0, 0, 1, 1], [], []>} : vector<8x128xf32>, vector<128x384xf32>, vector<8x384xf32> -> vector<8x384xf32>
    %108 = vector.broadcast %11 : vector<1x384xf32> to vector<8x384xf32>
    %109 = arith.addf %107, %108 : vector<8x384xf32>
    %110 = vector.extract_strided_slice %106 {offsets = [0, 0], sizes = [8, 128], strides = [1, 1]} : vector<8x384xf32> to vector<8x128xf32>
    %111 = vector.extract_strided_slice %109 {offsets = [0, 0], sizes = [8, 128], strides = [1, 1]} : vector<8x384xf32> to vector<8x128xf32>
    %112 = arith.addf %110, %111 : vector<8x128xf32>
    %113 = arith.negf %112 : vector<8x128xf32>
    %114 = math.exp %113 : vector<8x128xf32>
    %cst_39 = arith.constant 1.000000e+00 : f32
    %115 = vector.broadcast %cst_39 : f32 to vector<8x128xf32>
    %116 = arith.addf %115, %114 : vector<8x128xf32>
    %117 = arith.divf %115, %116 : vector<8x128xf32>
    %118 = vector.extract_strided_slice %106 {offsets = [0, 128], sizes = [8, 128], strides = [1, 1]} : vector<8x384xf32> to vector<8x128xf32>
    %119 = vector.extract_strided_slice %109 {offsets = [0, 128], sizes = [8, 128], strides = [1, 1]} : vector<8x384xf32> to vector<8x128xf32>
    %120 = arith.addf %118, %119 : vector<8x128xf32>
    %121 = arith.negf %120 : vector<8x128xf32>
    %122 = math.exp %121 : vector<8x128xf32>
    %cst_40 = arith.constant 1.000000e+00 : f32
    %123 = vector.broadcast %cst_40 : f32 to vector<8x128xf32>
    %124 = arith.addf %123, %122 : vector<8x128xf32>
    %125 = arith.divf %123, %124 : vector<8x128xf32>
    %126 = vector.extract_strided_slice %106 {offsets = [0, 256], sizes = [8, 128], strides = [1, 1]} : vector<8x384xf32> to vector<8x128xf32>
    %127 = vector.extract_strided_slice %109 {offsets = [0, 256], sizes = [8, 128], strides = [1, 1]} : vector<8x384xf32> to vector<8x128xf32>
    %128 = arith.mulf %117, %127 : vector<8x128xf32>
    %129 = arith.addf %126, %128 : vector<8x128xf32>
    %130 = math.tanh %129 : vector<8x128xf32>
    %cst_41 = arith.constant 1.000000e+00 : f32
    %131 = vector.broadcast %cst_41 : f32 to vector<8x128xf32>
    %132 = arith.subf %131, %125 : vector<8x128xf32>
    %133 = arith.mulf %132, %130 : vector<8x128xf32>
    %134 = arith.mulf %125, %104 : vector<8x128xf32>
    %135 = arith.addf %133, %134 : vector<8x128xf32>
    %c24_42 = arith.constant 24 : index
    %c0_43 = arith.constant 0 : index
    %136 = vector.load %arg10[%c24_42, %c0_43] : memref<64x128xf32, #tpu.memory_space<vmem>>, vector<8x128xf32>
    tpu.vector_store %arg10[%c24_42, %c0_43], %135 {strides = array<i32>} : memref<64x128xf32, #tpu.memory_space<vmem>>, vector<8x128xf32>,
    %c32 = arith.constant 32 : index
    %c0_44 = arith.constant 0 : index
    %137 = vector.load %arg11[%c32, %c0_44] : memref<64x384xf32, #tpu.memory_space<vmem>>, vector<8x384xf32>
    %cst_45 = arith.constant dense<0.000000e+00> : vector<8x384xf32>
    %138 = tpu.matmul %135, %9, %cst_45 {dimension_numbers = #tpu.dot_dimension_numbers<[1], [0], [0], [1], [0, 0, 1, 1], [], []>} : vector<8x128xf32>, vector<128x384xf32>, vector<8x384xf32> -> vector<8x384xf32>
    %139 = vector.broadcast %11 : vector<1x384xf32> to vector<8x384xf32>
    %140 = arith.addf %138, %139 : vector<8x384xf32>
    %141 = vector.extract_strided_slice %137 {offsets = [0, 0], sizes = [8, 128], strides = [1, 1]} : vector<8x384xf32> to vector<8x128xf32>
    %142 = vector.extract_strided_slice %140 {offsets = [0, 0], sizes = [8, 128], strides = [1, 1]} : vector<8x384xf32> to vector<8x128xf32>
    %143 = arith.addf %141, %142 : vector<8x128xf32>
    %144 = arith.negf %143 : vector<8x128xf32>
    %145 = math.exp %144 : vector<8x128xf32>
    %cst_46 = arith.constant 1.000000e+00 : f32
    %146 = vector.broadcast %cst_46 : f32 to vector<8x128xf32>
    %147 = arith.addf %146, %145 : vector<8x128xf32>
    %148 = arith.divf %146, %147 : vector<8x128xf32>
    %149 = vector.extract_strided_slice %137 {offsets = [0, 128], sizes = [8, 128], strides = [1, 1]} : vector<8x384xf32> to vector<8x128xf32>
    %150 = vector.extract_strided_slice %140 {offsets = [0, 128], sizes = [8, 128], strides = [1, 1]} : vector<8x384xf32> to vector<8x128xf32>
    %151 = arith.addf %149, %150 : vector<8x128xf32>
    %152 = arith.negf %151 : vector<8x128xf32>
    %153 = math.exp %152 : vector<8x128xf32>
    %cst_47 = arith.constant 1.000000e+00 : f32
    %154 = vector.broadcast %cst_47 : f32 to vector<8x128xf32>
    %155 = arith.addf %154, %153 : vector<8x128xf32>
    %156 = arith.divf %154, %155 : vector<8x128xf32>
    %157 = vector.extract_strided_slice %137 {offsets = [0, 256], sizes = [8, 128], strides = [1, 1]} : vector<8x384xf32> to vector<8x128xf32>
    %158 = vector.extract_strided_slice %140 {offsets = [0, 256], sizes = [8, 128], strides = [1, 1]} : vector<8x384xf32> to vector<8x128xf32>
    %159 = arith.mulf %148, %158 : vector<8x128xf32>
    %160 = arith.addf %157, %159 : vector<8x128xf32>
    %161 = math.tanh %160 : vector<8x128xf32>
    %cst_48 = arith.constant 1.000000e+00 : f32
    %162 = vector.broadcast %cst_48 : f32 to vector<8x128xf32>
    %163 = arith.subf %162, %156 : vector<8x128xf32>
    %164 = arith.mulf %163, %161 : vector<8x128xf32>
    %165 = arith.mulf %156, %135 : vector<8x128xf32>
    %166 = arith.addf %164, %165 : vector<8x128xf32>
    %c32_49 = arith.constant 32 : index
    %c0_50 = arith.constant 0 : index
    %167 = vector.load %arg10[%c32_49, %c0_50] : memref<64x128xf32, #tpu.memory_space<vmem>>, vector<8x128xf32>
    tpu.vector_store %arg10[%c32_49, %c0_50], %166 {strides = array<i32>} : memref<64x128xf32, #tpu.memory_space<vmem>>, vector<8x128xf32>,
    %c40 = arith.constant 40 : index
    %c0_51 = arith.constant 0 : index
    %168 = vector.load %arg11[%c40, %c0_51] : memref<64x384xf32, #tpu.memory_space<vmem>>, vector<8x384xf32>
    %cst_52 = arith.constant dense<0.000000e+00> : vector<8x384xf32>
    %169 = tpu.matmul %166, %9, %cst_52 {dimension_numbers = #tpu.dot_dimension_numbers<[1], [0], [0], [1], [0, 0, 1, 1], [], []>} : vector<8x128xf32>, vector<128x384xf32>, vector<8x384xf32> -> vector<8x384xf32>
    %170 = vector.broadcast %11 : vector<1x384xf32> to vector<8x384xf32>
    %171 = arith.addf %169, %170 : vector<8x384xf32>
    %172 = vector.extract_strided_slice %168 {offsets = [0, 0], sizes = [8, 128], strides = [1, 1]} : vector<8x384xf32> to vector<8x128xf32>
    %173 = vector.extract_strided_slice %171 {offsets = [0, 0], sizes = [8, 128], strides = [1, 1]} : vector<8x384xf32> to vector<8x128xf32>
    %174 = arith.addf %172, %173 : vector<8x128xf32>
    %175 = arith.negf %174 : vector<8x128xf32>
    %176 = math.exp %175 : vector<8x128xf32>
    %cst_53 = arith.constant 1.000000e+00 : f32
    %177 = vector.broadcast %cst_53 : f32 to vector<8x128xf32>
    %178 = arith.addf %177, %176 : vector<8x128xf32>
    %179 = arith.divf %177, %178 : vector<8x128xf32>
    %180 = vector.extract_strided_slice %168 {offsets = [0, 128], sizes = [8, 128], strides = [1, 1]} : vector<8x384xf32> to vector<8x128xf32>
    %181 = vector.extract_strided_slice %171 {offsets = [0, 128], sizes = [8, 128], strides = [1, 1]} : vector<8x384xf32> to vector<8x128xf32>
    %182 = arith.addf %180, %181 : vector<8x128xf32>
    %183 = arith.negf %182 : vector<8x128xf32>
    %184 = math.exp %183 : vector<8x128xf32>
    %cst_54 = arith.constant 1.000000e+00 : f32
    %185 = vector.broadcast %cst_54 : f32 to vector<8x128xf32>
    %186 = arith.addf %185, %184 : vector<8x128xf32>
    %187 = arith.divf %185, %186 : vector<8x128xf32>
    %188 = vector.extract_strided_slice %168 {offsets = [0, 256], sizes = [8, 128], strides = [1, 1]} : vector<8x384xf32> to vector<8x128xf32>
    %189 = vector.extract_strided_slice %171 {offsets = [0, 256], sizes = [8, 128], strides = [1, 1]} : vector<8x384xf32> to vector<8x128xf32>
    %190 = arith.mulf %179, %189 : vector<8x128xf32>
    %191 = arith.addf %188, %190 : vector<8x128xf32>
    %192 = math.tanh %191 : vector<8x128xf32>
    %cst_55 = arith.constant 1.000000e+00 : f32
    %193 = vector.broadcast %cst_55 : f32 to vector<8x128xf32>
    %194 = arith.subf %193, %187 : vector<8x128xf32>
    %195 = arith.mulf %194, %192 : vector<8x128xf32>
    %196 = arith.mulf %187, %166 : vector<8x128xf32>
    %197 = arith.addf %195, %196 : vector<8x128xf32>
    %c40_56 = arith.constant 40 : index
    %c0_57 = arith.constant 0 : index
    %198 = vector.load %arg10[%c40_56, %c0_57] : memref<64x128xf32, #tpu.memory_space<vmem>>, vector<8x128xf32>
    tpu.vector_store %arg10[%c40_56, %c0_57], %197 {strides = array<i32>} : memref<64x128xf32, #tpu.memory_space<vmem>>, vector<8x128xf32>,
    %c48 = arith.constant 48 : index
    %c0_58 = arith.constant 0 : index
    %199 = vector.load %arg11[%c48, %c0_58] : memref<64x384xf32, #tpu.memory_space<vmem>>, vector<8x384xf32>
    %cst_59 = arith.constant dense<0.000000e+00> : vector<8x384xf32>
    %200 = tpu.matmul %197, %9, %cst_59 {dimension_numbers = #tpu.dot_dimension_numbers<[1], [0], [0], [1], [0, 0, 1, 1], [], []>} : vector<8x128xf32>, vector<128x384xf32>, vector<8x384xf32> -> vector<8x384xf32>
    %201 = vector.broadcast %11 : vector<1x384xf32> to vector<8x384xf32>
    %202 = arith.addf %200, %201 : vector<8x384xf32>
    %203 = vector.extract_strided_slice %199 {offsets = [0, 0], sizes = [8, 128], strides = [1, 1]} : vector<8x384xf32> to vector<8x128xf32>
    %204 = vector.extract_strided_slice %202 {offsets = [0, 0], sizes = [8, 128], strides = [1, 1]} : vector<8x384xf32> to vector<8x128xf32>
    %205 = arith.addf %203, %204 : vector<8x128xf32>
    %206 = arith.negf %205 : vector<8x128xf32>
    %207 = math.exp %206 : vector<8x128xf32>
    %cst_60 = arith.constant 1.000000e+00 : f32
    %208 = vector.broadcast %cst_60 : f32 to vector<8x128xf32>
    %209 = arith.addf %208, %207 : vector<8x128xf32>
    %210 = arith.divf %208, %209 : vector<8x128xf32>
    %211 = vector.extract_strided_slice %199 {offsets = [0, 128], sizes = [8, 128], strides = [1, 1]} : vector<8x384xf32> to vector<8x128xf32>
    %212 = vector.extract_strided_slice %202 {offsets = [0, 128], sizes = [8, 128], strides = [1, 1]} : vector<8x384xf32> to vector<8x128xf32>
    %213 = arith.addf %211, %212 : vector<8x128xf32>
    %214 = arith.negf %213 : vector<8x128xf32>
    %215 = math.exp %214 : vector<8x128xf32>
    %cst_61 = arith.constant 1.000000e+00 : f32
    %216 = vector.broadcast %cst_61 : f32 to vector<8x128xf32>
    %217 = arith.addf %216, %215 : vector<8x128xf32>
    %218 = arith.divf %216, %217 : vector<8x128xf32>
    %219 = vector.extract_strided_slice %199 {offsets = [0, 256], sizes = [8, 128], strides = [1, 1]} : vector<8x384xf32> to vector<8x128xf32>
    %220 = vector.extract_strided_slice %202 {offsets = [0, 256], sizes = [8, 128], strides = [1, 1]} : vector<8x384xf32> to vector<8x128xf32>
    %221 = arith.mulf %210, %220 : vector<8x128xf32>
    %222 = arith.addf %219, %221 : vector<8x128xf32>
    %223 = math.tanh %222 : vector<8x128xf32>
    %cst_62 = arith.constant 1.000000e+00 : f32
    %224 = vector.broadcast %cst_62 : f32 to vector<8x128xf32>
    %225 = arith.subf %224, %218 : vector<8x128xf32>
    %226 = arith.mulf %225, %223 : vector<8x128xf32>
    %227 = arith.mulf %218, %197 : vector<8x128xf32>
    %228 = arith.addf %226, %227 : vector<8x128xf32>
    %c48_63 = arith.constant 48 : index
    %c0_64 = arith.constant 0 : index
    %229 = vector.load %arg10[%c48_63, %c0_64] : memref<64x128xf32, #tpu.memory_space<vmem>>, vector<8x128xf32>
    tpu.vector_store %arg10[%c48_63, %c0_64], %228 {strides = array<i32>} : memref<64x128xf32, #tpu.memory_space<vmem>>, vector<8x128xf32>,
    %c56 = arith.constant 56 : index
    %c0_65 = arith.constant 0 : index
    %230 = vector.load %arg11[%c56, %c0_65] : memref<64x384xf32, #tpu.memory_space<vmem>>, vector<8x384xf32>
    %cst_66 = arith.constant dense<0.000000e+00> : vector<8x384xf32>
    %231 = tpu.matmul %228, %9, %cst_66 {dimension_numbers = #tpu.dot_dimension_numbers<[1], [0], [0], [1], [0, 0, 1, 1], [], []>} : vector<8x128xf32>, vector<128x384xf32>, vector<8x384xf32> -> vector<8x384xf32>
    %232 = vector.broadcast %11 : vector<1x384xf32> to vector<8x384xf32>
    %233 = arith.addf %231, %232 : vector<8x384xf32>
    %234 = vector.extract_strided_slice %230 {offsets = [0, 0], sizes = [8, 128], strides = [1, 1]} : vector<8x384xf32> to vector<8x128xf32>
    %235 = vector.extract_strided_slice %233 {offsets = [0, 0], sizes = [8, 128], strides = [1, 1]} : vector<8x384xf32> to vector<8x128xf32>
    %236 = arith.addf %234, %235 : vector<8x128xf32>
    %237 = arith.negf %236 : vector<8x128xf32>
    %238 = math.exp %237 : vector<8x128xf32>
    %cst_67 = arith.constant 1.000000e+00 : f32
    %239 = vector.broadcast %cst_67 : f32 to vector<8x128xf32>
    %240 = arith.addf %239, %238 : vector<8x128xf32>
    %241 = arith.divf %239, %240 : vector<8x128xf32>
    %242 = vector.extract_strided_slice %230 {offsets = [0, 128], sizes = [8, 128], strides = [1, 1]} : vector<8x384xf32> to vector<8x128xf32>
    %243 = vector.extract_strided_slice %233 {offsets = [0, 128], sizes = [8, 128], strides = [1, 1]} : vector<8x384xf32> to vector<8x128xf32>
    %244 = arith.addf %242, %243 : vector<8x128xf32>
    %245 = arith.negf %244 : vector<8x128xf32>
    %246 = math.exp %245 : vector<8x128xf32>
    %cst_68 = arith.constant 1.000000e+00 : f32
    %247 = vector.broadcast %cst_68 : f32 to vector<8x128xf32>
    %248 = arith.addf %247, %246 : vector<8x128xf32>
    %249 = arith.divf %247, %248 : vector<8x128xf32>
    %250 = vector.extract_strided_slice %230 {offsets = [0, 256], sizes = [8, 128], strides = [1, 1]} : vector<8x384xf32> to vector<8x128xf32>
    %251 = vector.extract_strided_slice %233 {offsets = [0, 256], sizes = [8, 128], strides = [1, 1]} : vector<8x384xf32> to vector<8x128xf32>
    %252 = arith.mulf %241, %251 : vector<8x128xf32>
    %253 = arith.addf %250, %252 : vector<8x128xf32>
    %254 = math.tanh %253 : vector<8x128xf32>
    %cst_69 = arith.constant 1.000000e+00 : f32
    %255 = vector.broadcast %cst_69 : f32 to vector<8x128xf32>
    %256 = arith.subf %255, %249 : vector<8x128xf32>
    %257 = arith.mulf %256, %254 : vector<8x128xf32>
    %258 = arith.mulf %249, %228 : vector<8x128xf32>
    %259 = arith.addf %257, %258 : vector<8x128xf32>
    %c56_70 = arith.constant 56 : index
    %c0_71 = arith.constant 0 : index
    %260 = vector.load %arg10[%c56_70, %c0_71] : memref<64x128xf32, #tpu.memory_space<vmem>>, vector<8x128xf32>
    tpu.vector_store %arg10[%c56_70, %c0_71], %259 {strides = array<i32>} : memref<64x128xf32, #tpu.memory_space<vmem>>, vector<8x128xf32>,
    %c0_72 = arith.constant 0 : index
    %c0_73 = arith.constant 0 : index
    %261 = vector.load %arg10[%c0_72, %c0_73] : memref<64x128xf32, #tpu.memory_space<vmem>>, vector<64x128xf32>
    %c0_74 = arith.constant 0 : index
    %c0_75 = arith.constant 0 : index
    %c0_76 = arith.constant 0 : index
    %262 = vector.load %arg3[%c0_74, %c0_75, %c0_76] : memref<1x128x384xf32, #tpu.memory_space<vmem>>, vector<1x128x384xf32>
    %263 = vector.shape_cast %262 : vector<1x128x384xf32> to vector<128x384xf32>
    %cst_77 = arith.constant dense<0.000000e+00> : vector<64x384xf32>
    %264 = tpu.matmul %261, %263, %cst_77 {dimension_numbers = #tpu.dot_dimension_numbers<[1], [0], [0], [1], [0, 0, 1, 1], [], []>} : vector<64x128xf32>, vector<128x384xf32>, vector<64x384xf32> -> vector<64x384xf32>
    %c1 = arith.constant 1 : index
    %c0_78 = arith.constant 0 : index
    %c0_79 = arith.constant 0 : index
    %265 = vector.load %arg5[%c1, %c0_78, %c0_79] : memref<2x1x384xf32, #tpu.memory_space<vmem>>, vector<1x1x384xf32>
    %266 = vector.shape_cast %265 : vector<1x1x384xf32> to vector<1x384xf32>
    %267 = vector.broadcast %266 : vector<1x384xf32> to vector<64x384xf32>
    %268 = arith.addf %264, %267 : vector<64x384xf32>
    %c0_80 = arith.constant 0 : index
    %c0_81 = arith.constant 0 : index
    %269 = vector.load %arg11[%c0_80, %c0_81] : memref<64x384xf32, #tpu.memory_space<vmem>>, vector<64x384xf32>
    tpu.vector_store %arg11[%c0_80, %c0_81], %268 {strides = array<i32>} : memref<64x384xf32, #tpu.memory_space<vmem>>, vector<64x384xf32>,
    %c1_82 = arith.constant 1 : index
    %c0_83 = arith.constant 0 : index
    %c0_84 = arith.constant 0 : index
    %270 = vector.load %arg4[%c1_82, %c0_83, %c0_84] : memref<2x128x384xf32, #tpu.memory_space<vmem>>, vector<1x128x384xf32>
    %271 = vector.shape_cast %270 : vector<1x128x384xf32> to vector<128x384xf32>
    %c1_85 = arith.constant 1 : index
    %c0_86 = arith.constant 0 : index
    %c0_87 = arith.constant 0 : index
    %272 = vector.load %arg6[%c1_85, %c0_86, %c0_87] : memref<2x1x384xf32, #tpu.memory_space<vmem>>, vector<1x1x384xf32>
    %273 = vector.shape_cast %272 : vector<1x1x384xf32> to vector<1x384xf32>
    %cst_88 = arith.constant 0.000000e+00 : f32
    %274 = vector.broadcast %cst_88 : f32 to vector<8x128xf32>
    %c0_89 = arith.constant 0 : index
    %c0_90 = arith.constant 0 : index
    %275 = vector.load %arg11[%c0_89, %c0_90] : memref<64x384xf32, #tpu.memory_space<vmem>>, vector<8x384xf32>
    %cst_91 = arith.constant dense<0.000000e+00> : vector<8x384xf32>
    %276 = tpu.matmul %274, %271, %cst_91 {dimension_numbers = #tpu.dot_dimension_numbers<[1], [0], [0], [1], [0, 0, 1, 1], [], []>} : vector<8x128xf32>, vector<128x384xf32>, vector<8x384xf32> -> vector<8x384xf32>
    %277 = vector.broadcast %273 : vector<1x384xf32> to vector<8x384xf32>
    %278 = arith.addf %276, %277 : vector<8x384xf32>
    %279 = vector.extract_strided_slice %275 {offsets = [0, 0], sizes = [8, 128], strides = [1, 1]} : vector<8x384xf32> to vector<8x128xf32>
    %280 = vector.extract_strided_slice %278 {offsets = [0, 0], sizes = [8, 128], strides = [1, 1]} : vector<8x384xf32> to vector<8x128xf32>
    %281 = arith.addf %279, %280 : vector<8x128xf32>
    %282 = arith.negf %281 : vector<8x128xf32>
    %283 = math.exp %282 : vector<8x128xf32>
    %cst_92 = arith.constant 1.000000e+00 : f32
    %284 = vector.broadcast %cst_92 : f32 to vector<8x128xf32>
    %285 = arith.addf %284, %283 : vector<8x128xf32>
    %286 = arith.divf %284, %285 : vector<8x128xf32>
    %287 = vector.extract_strided_slice %275 {offsets = [0, 128], sizes = [8, 128], strides = [1, 1]} : vector<8x384xf32> to vector<8x128xf32>
    %288 = vector.extract_strided_slice %278 {offsets = [0, 128], sizes = [8, 128], strides = [1, 1]} : vector<8x384xf32> to vector<8x128xf32>
    %289 = arith.addf %287, %288 : vector<8x128xf32>
    %290 = arith.negf %289 : vector<8x128xf32>
    %291 = math.exp %290 : vector<8x128xf32>
    %cst_93 = arith.constant 1.000000e+00 : f32
    %292 = vector.broadcast %cst_93 : f32 to vector<8x128xf32>
    %293 = arith.addf %292, %291 : vector<8x128xf32>
    %294 = arith.divf %292, %293 : vector<8x128xf32>
    %295 = vector.extract_strided_slice %275 {offsets = [0, 256], sizes = [8, 128], strides = [1, 1]} : vector<8x384xf32> to vector<8x128xf32>
    %296 = vector.extract_strided_slice %278 {offsets = [0, 256], sizes = [8, 128], strides = [1, 1]} : vector<8x384xf32> to vector<8x128xf32>
    %297 = arith.mulf %286, %296 : vector<8x128xf32>
    %298 = arith.addf %295, %297 : vector<8x128xf32>
    %299 = math.tanh %298 : vector<8x128xf32>
    %cst_94 = arith.constant 1.000000e+00 : f32
    %300 = vector.broadcast %cst_94 : f32 to vector<8x128xf32>
    %301 = arith.subf %300, %294 : vector<8x128xf32>
    %302 = arith.mulf %301, %299 : vector<8x128xf32>
    %303 = arith.mulf %294, %274 : vector<8x128xf32>
    %304 = arith.addf %302, %303 : vector<8x128xf32>
    %c8_95 = arith.constant 8 : index
    %c0_96 = arith.constant 0 : index
    %305 = vector.load %arg11[%c8_95, %c0_96] : memref<64x384xf32, #tpu.memory_space<vmem>>, vector<8x384xf32>
    %cst_97 = arith.constant dense<0.000000e+00> : vector<8x384xf32>
    %306 = tpu.matmul %304, %271, %cst_97 {dimension_numbers = #tpu.dot_dimension_numbers<[1], [0], [0], [1], [0, 0, 1, 1], [], []>} : vector<8x128xf32>, vector<128x384xf32>, vector<8x384xf32> -> vector<8x384xf32>
    %307 = vector.broadcast %273 : vector<1x384xf32> to vector<8x384xf32>
    %308 = arith.addf %306, %307 : vector<8x384xf32>
    %309 = vector.extract_strided_slice %305 {offsets = [0, 0], sizes = [8, 128], strides = [1, 1]} : vector<8x384xf32> to vector<8x128xf32>
    %310 = vector.extract_strided_slice %308 {offsets = [0, 0], sizes = [8, 128], strides = [1, 1]} : vector<8x384xf32> to vector<8x128xf32>
    %311 = arith.addf %309, %310 : vector<8x128xf32>
    %312 = arith.negf %311 : vector<8x128xf32>
    %313 = math.exp %312 : vector<8x128xf32>
    %cst_98 = arith.constant 1.000000e+00 : f32
    %314 = vector.broadcast %cst_98 : f32 to vector<8x128xf32>
    %315 = arith.addf %314, %313 : vector<8x128xf32>
    %316 = arith.divf %314, %315 : vector<8x128xf32>
    %317 = vector.extract_strided_slice %305 {offsets = [0, 128], sizes = [8, 128], strides = [1, 1]} : vector<8x384xf32> to vector<8x128xf32>
    %318 = vector.extract_strided_slice %308 {offsets = [0, 128], sizes = [8, 128], strides = [1, 1]} : vector<8x384xf32> to vector<8x128xf32>
    %319 = arith.addf %317, %318 : vector<8x128xf32>
    %320 = arith.negf %319 : vector<8x128xf32>
    %321 = math.exp %320 : vector<8x128xf32>
    %cst_99 = arith.constant 1.000000e+00 : f32
    %322 = vector.broadcast %cst_99 : f32 to vector<8x128xf32>
    %323 = arith.addf %322, %321 : vector<8x128xf32>
    %324 = arith.divf %322, %323 : vector<8x128xf32>
    %325 = vector.extract_strided_slice %305 {offsets = [0, 256], sizes = [8, 128], strides = [1, 1]} : vector<8x384xf32> to vector<8x128xf32>
    %326 = vector.extract_strided_slice %308 {offsets = [0, 256], sizes = [8, 128], strides = [1, 1]} : vector<8x384xf32> to vector<8x128xf32>
    %327 = arith.mulf %316, %326 : vector<8x128xf32>
    %328 = arith.addf %325, %327 : vector<8x128xf32>
    %329 = math.tanh %328 : vector<8x128xf32>
    %cst_100 = arith.constant 1.000000e+00 : f32
    %330 = vector.broadcast %cst_100 : f32 to vector<8x128xf32>
    %331 = arith.subf %330, %324 : vector<8x128xf32>
    %332 = arith.mulf %331, %329 : vector<8x128xf32>
    %333 = arith.mulf %324, %304 : vector<8x128xf32>
    %334 = arith.addf %332, %333 : vector<8x128xf32>
    %c16_101 = arith.constant 16 : index
    %c0_102 = arith.constant 0 : index
    %335 = vector.load %arg11[%c16_101, %c0_102] : memref<64x384xf32, #tpu.memory_space<vmem>>, vector<8x384xf32>
    %cst_103 = arith.constant dense<0.000000e+00> : vector<8x384xf32>
    %336 = tpu.matmul %334, %271, %cst_103 {dimension_numbers = #tpu.dot_dimension_numbers<[1], [0], [0], [1], [0, 0, 1, 1], [], []>} : vector<8x128xf32>, vector<128x384xf32>, vector<8x384xf32> -> vector<8x384xf32>
    %337 = vector.broadcast %273 : vector<1x384xf32> to vector<8x384xf32>
    %338 = arith.addf %336, %337 : vector<8x384xf32>
    %339 = vector.extract_strided_slice %335 {offsets = [0, 0], sizes = [8, 128], strides = [1, 1]} : vector<8x384xf32> to vector<8x128xf32>
    %340 = vector.extract_strided_slice %338 {offsets = [0, 0], sizes = [8, 128], strides = [1, 1]} : vector<8x384xf32> to vector<8x128xf32>
    %341 = arith.addf %339, %340 : vector<8x128xf32>
    %342 = arith.negf %341 : vector<8x128xf32>
    %343 = math.exp %342 : vector<8x128xf32>
    %cst_104 = arith.constant 1.000000e+00 : f32
    %344 = vector.broadcast %cst_104 : f32 to vector<8x128xf32>
    %345 = arith.addf %344, %343 : vector<8x128xf32>
    %346 = arith.divf %344, %345 : vector<8x128xf32>
    %347 = vector.extract_strided_slice %335 {offsets = [0, 128], sizes = [8, 128], strides = [1, 1]} : vector<8x384xf32> to vector<8x128xf32>
    %348 = vector.extract_strided_slice %338 {offsets = [0, 128], sizes = [8, 128], strides = [1, 1]} : vector<8x384xf32> to vector<8x128xf32>
    %349 = arith.addf %347, %348 : vector<8x128xf32>
    %350 = arith.negf %349 : vector<8x128xf32>
    %351 = math.exp %350 : vector<8x128xf32>
    %cst_105 = arith.constant 1.000000e+00 : f32
    %352 = vector.broadcast %cst_105 : f32 to vector<8x128xf32>
    %353 = arith.addf %352, %351 : vector<8x128xf32>
    %354 = arith.divf %352, %353 : vector<8x128xf32>
    %355 = vector.extract_strided_slice %335 {offsets = [0, 256], sizes = [8, 128], strides = [1, 1]} : vector<8x384xf32> to vector<8x128xf32>
    %356 = vector.extract_strided_slice %338 {offsets = [0, 256], sizes = [8, 128], strides = [1, 1]} : vector<8x384xf32> to vector<8x128xf32>
    %357 = arith.mulf %346, %356 : vector<8x128xf32>
    %358 = arith.addf %355, %357 : vector<8x128xf32>
    %359 = math.tanh %358 : vector<8x128xf32>
    %cst_106 = arith.constant 1.000000e+00 : f32
    %360 = vector.broadcast %cst_106 : f32 to vector<8x128xf32>
    %361 = arith.subf %360, %354 : vector<8x128xf32>
    %362 = arith.mulf %361, %359 : vector<8x128xf32>
    %363 = arith.mulf %354, %334 : vector<8x128xf32>
    %364 = arith.addf %362, %363 : vector<8x128xf32>
    %c24_107 = arith.constant 24 : index
    %c0_108 = arith.constant 0 : index
    %365 = vector.load %arg11[%c24_107, %c0_108] : memref<64x384xf32, #tpu.memory_space<vmem>>, vector<8x384xf32>
    %cst_109 = arith.constant dense<0.000000e+00> : vector<8x384xf32>
    %366 = tpu.matmul %364, %271, %cst_109 {dimension_numbers = #tpu.dot_dimension_numbers<[1], [0], [0], [1], [0, 0, 1, 1], [], []>} : vector<8x128xf32>, vector<128x384xf32>, vector<8x384xf32> -> vector<8x384xf32>
    %367 = vector.broadcast %273 : vector<1x384xf32> to vector<8x384xf32>
    %368 = arith.addf %366, %367 : vector<8x384xf32>
    %369 = vector.extract_strided_slice %365 {offsets = [0, 0], sizes = [8, 128], strides = [1, 1]} : vector<8x384xf32> to vector<8x128xf32>
    %370 = vector.extract_strided_slice %368 {offsets = [0, 0], sizes = [8, 128], strides = [1, 1]} : vector<8x384xf32> to vector<8x128xf32>
    %371 = arith.addf %369, %370 : vector<8x128xf32>
    %372 = arith.negf %371 : vector<8x128xf32>
    %373 = math.exp %372 : vector<8x128xf32>
    %cst_110 = arith.constant 1.000000e+00 : f32
    %374 = vector.broadcast %cst_110 : f32 to vector<8x128xf32>
    %375 = arith.addf %374, %373 : vector<8x128xf32>
    %376 = arith.divf %374, %375 : vector<8x128xf32>
    %377 = vector.extract_strided_slice %365 {offsets = [0, 128], sizes = [8, 128], strides = [1, 1]} : vector<8x384xf32> to vector<8x128xf32>
    %378 = vector.extract_strided_slice %368 {offsets = [0, 128], sizes = [8, 128], strides = [1, 1]} : vector<8x384xf32> to vector<8x128xf32>
    %379 = arith.addf %377, %378 : vector<8x128xf32>
    %380 = arith.negf %379 : vector<8x128xf32>
    %381 = math.exp %380 : vector<8x128xf32>
    %cst_111 = arith.constant 1.000000e+00 : f32
    %382 = vector.broadcast %cst_111 : f32 to vector<8x128xf32>
    %383 = arith.addf %382, %381 : vector<8x128xf32>
    %384 = arith.divf %382, %383 : vector<8x128xf32>
    %385 = vector.extract_strided_slice %365 {offsets = [0, 256], sizes = [8, 128], strides = [1, 1]} : vector<8x384xf32> to vector<8x128xf32>
    %386 = vector.extract_strided_slice %368 {offsets = [0, 256], sizes = [8, 128], strides = [1, 1]} : vector<8x384xf32> to vector<8x128xf32>
    %387 = arith.mulf %376, %386 : vector<8x128xf32>
    %388 = arith.addf %385, %387 : vector<8x128xf32>
    %389 = math.tanh %388 : vector<8x128xf32>
    %cst_112 = arith.constant 1.000000e+00 : f32
    %390 = vector.broadcast %cst_112 : f32 to vector<8x128xf32>
    %391 = arith.subf %390, %384 : vector<8x128xf32>
    %392 = arith.mulf %391, %389 : vector<8x128xf32>
    %393 = arith.mulf %384, %364 : vector<8x128xf32>
    %394 = arith.addf %392, %393 : vector<8x128xf32>
    %c32_113 = arith.constant 32 : index
    %c0_114 = arith.constant 0 : index
    %395 = vector.load %arg11[%c32_113, %c0_114] : memref<64x384xf32, #tpu.memory_space<vmem>>, vector<8x384xf32>
    %cst_115 = arith.constant dense<0.000000e+00> : vector<8x384xf32>
    %396 = tpu.matmul %394, %271, %cst_115 {dimension_numbers = #tpu.dot_dimension_numbers<[1], [0], [0], [1], [0, 0, 1, 1], [], []>} : vector<8x128xf32>, vector<128x384xf32>, vector<8x384xf32> -> vector<8x384xf32>
    %397 = vector.broadcast %273 : vector<1x384xf32> to vector<8x384xf32>
    %398 = arith.addf %396, %397 : vector<8x384xf32>
    %399 = vector.extract_strided_slice %395 {offsets = [0, 0], sizes = [8, 128], strides = [1, 1]} : vector<8x384xf32> to vector<8x128xf32>
    %400 = vector.extract_strided_slice %398 {offsets = [0, 0], sizes = [8, 128], strides = [1, 1]} : vector<8x384xf32> to vector<8x128xf32>
    %401 = arith.addf %399, %400 : vector<8x128xf32>
    %402 = arith.negf %401 : vector<8x128xf32>
    %403 = math.exp %402 : vector<8x128xf32>
    %cst_116 = arith.constant 1.000000e+00 : f32
    %404 = vector.broadcast %cst_116 : f32 to vector<8x128xf32>
    %405 = arith.addf %404, %403 : vector<8x128xf32>
    %406 = arith.divf %404, %405 : vector<8x128xf32>
    %407 = vector.extract_strided_slice %395 {offsets = [0, 128], sizes = [8, 128], strides = [1, 1]} : vector<8x384xf32> to vector<8x128xf32>
    %408 = vector.extract_strided_slice %398 {offsets = [0, 128], sizes = [8, 128], strides = [1, 1]} : vector<8x384xf32> to vector<8x128xf32>
    %409 = arith.addf %407, %408 : vector<8x128xf32>
    %410 = arith.negf %409 : vector<8x128xf32>
    %411 = math.exp %410 : vector<8x128xf32>
    %cst_117 = arith.constant 1.000000e+00 : f32
    %412 = vector.broadcast %cst_117 : f32 to vector<8x128xf32>
    %413 = arith.addf %412, %411 : vector<8x128xf32>
    %414 = arith.divf %412, %413 : vector<8x128xf32>
    %415 = vector.extract_strided_slice %395 {offsets = [0, 256], sizes = [8, 128], strides = [1, 1]} : vector<8x384xf32> to vector<8x128xf32>
    %416 = vector.extract_strided_slice %398 {offsets = [0, 256], sizes = [8, 128], strides = [1, 1]} : vector<8x384xf32> to vector<8x128xf32>
    %417 = arith.mulf %406, %416 : vector<8x128xf32>
    %418 = arith.addf %415, %417 : vector<8x128xf32>
    %419 = math.tanh %418 : vector<8x128xf32>
    %cst_118 = arith.constant 1.000000e+00 : f32
    %420 = vector.broadcast %cst_118 : f32 to vector<8x128xf32>
    %421 = arith.subf %420, %414 : vector<8x128xf32>
    %422 = arith.mulf %421, %419 : vector<8x128xf32>
    %423 = arith.mulf %414, %394 : vector<8x128xf32>
    %424 = arith.addf %422, %423 : vector<8x128xf32>
    %c40_119 = arith.constant 40 : index
    %c0_120 = arith.constant 0 : index
    %425 = vector.load %arg11[%c40_119, %c0_120] : memref<64x384xf32, #tpu.memory_space<vmem>>, vector<8x384xf32>
    %cst_121 = arith.constant dense<0.000000e+00> : vector<8x384xf32>
    %426 = tpu.matmul %424, %271, %cst_121 {dimension_numbers = #tpu.dot_dimension_numbers<[1], [0], [0], [1], [0, 0, 1, 1], [], []>} : vector<8x128xf32>, vector<128x384xf32>, vector<8x384xf32> -> vector<8x384xf32>
    %427 = vector.broadcast %273 : vector<1x384xf32> to vector<8x384xf32>
    %428 = arith.addf %426, %427 : vector<8x384xf32>
    %429 = vector.extract_strided_slice %425 {offsets = [0, 0], sizes = [8, 128], strides = [1, 1]} : vector<8x384xf32> to vector<8x128xf32>
    %430 = vector.extract_strided_slice %428 {offsets = [0, 0], sizes = [8, 128], strides = [1, 1]} : vector<8x384xf32> to vector<8x128xf32>
    %431 = arith.addf %429, %430 : vector<8x128xf32>
    %432 = arith.negf %431 : vector<8x128xf32>
    %433 = math.exp %432 : vector<8x128xf32>
    %cst_122 = arith.constant 1.000000e+00 : f32
    %434 = vector.broadcast %cst_122 : f32 to vector<8x128xf32>
    %435 = arith.addf %434, %433 : vector<8x128xf32>
    %436 = arith.divf %434, %435 : vector<8x128xf32>
    %437 = vector.extract_strided_slice %425 {offsets = [0, 128], sizes = [8, 128], strides = [1, 1]} : vector<8x384xf32> to vector<8x128xf32>
    %438 = vector.extract_strided_slice %428 {offsets = [0, 128], sizes = [8, 128], strides = [1, 1]} : vector<8x384xf32> to vector<8x128xf32>
    %439 = arith.addf %437, %438 : vector<8x128xf32>
    %440 = arith.negf %439 : vector<8x128xf32>
    %441 = math.exp %440 : vector<8x128xf32>
    %cst_123 = arith.constant 1.000000e+00 : f32
    %442 = vector.broadcast %cst_123 : f32 to vector<8x128xf32>
    %443 = arith.addf %442, %441 : vector<8x128xf32>
    %444 = arith.divf %442, %443 : vector<8x128xf32>
    %445 = vector.extract_strided_slice %425 {offsets = [0, 256], sizes = [8, 128], strides = [1, 1]} : vector<8x384xf32> to vector<8x128xf32>
    %446 = vector.extract_strided_slice %428 {offsets = [0, 256], sizes = [8, 128], strides = [1, 1]} : vector<8x384xf32> to vector<8x128xf32>
    %447 = arith.mulf %436, %446 : vector<8x128xf32>
    %448 = arith.addf %445, %447 : vector<8x128xf32>
    %449 = math.tanh %448 : vector<8x128xf32>
    %cst_124 = arith.constant 1.000000e+00 : f32
    %450 = vector.broadcast %cst_124 : f32 to vector<8x128xf32>
    %451 = arith.subf %450, %444 : vector<8x128xf32>
    %452 = arith.mulf %451, %449 : vector<8x128xf32>
    %453 = arith.mulf %444, %424 : vector<8x128xf32>
    %454 = arith.addf %452, %453 : vector<8x128xf32>
    %c48_125 = arith.constant 48 : index
    %c0_126 = arith.constant 0 : index
    %455 = vector.load %arg11[%c48_125, %c0_126] : memref<64x384xf32, #tpu.memory_space<vmem>>, vector<8x384xf32>
    %cst_127 = arith.constant dense<0.000000e+00> : vector<8x384xf32>
    %456 = tpu.matmul %454, %271, %cst_127 {dimension_numbers = #tpu.dot_dimension_numbers<[1], [0], [0], [1], [0, 0, 1, 1], [], []>} : vector<8x128xf32>, vector<128x384xf32>, vector<8x384xf32> -> vector<8x384xf32>
    %457 = vector.broadcast %273 : vector<1x384xf32> to vector<8x384xf32>
    %458 = arith.addf %456, %457 : vector<8x384xf32>
    %459 = vector.extract_strided_slice %455 {offsets = [0, 0], sizes = [8, 128], strides = [1, 1]} : vector<8x384xf32> to vector<8x128xf32>
    %460 = vector.extract_strided_slice %458 {offsets = [0, 0], sizes = [8, 128], strides = [1, 1]} : vector<8x384xf32> to vector<8x128xf32>
    %461 = arith.addf %459, %460 : vector<8x128xf32>
    %462 = arith.negf %461 : vector<8x128xf32>
    %463 = math.exp %462 : vector<8x128xf32>
    %cst_128 = arith.constant 1.000000e+00 : f32
    %464 = vector.broadcast %cst_128 : f32 to vector<8x128xf32>
    %465 = arith.addf %464, %463 : vector<8x128xf32>
    %466 = arith.divf %464, %465 : vector<8x128xf32>
    %467 = vector.extract_strided_slice %455 {offsets = [0, 128], sizes = [8, 128], strides = [1, 1]} : vector<8x384xf32> to vector<8x128xf32>
    %468 = vector.extract_strided_slice %458 {offsets = [0, 128], sizes = [8, 128], strides = [1, 1]} : vector<8x384xf32> to vector<8x128xf32>
    %469 = arith.addf %467, %468 : vector<8x128xf32>
    %470 = arith.negf %469 : vector<8x128xf32>
    %471 = math.exp %470 : vector<8x128xf32>
    %cst_129 = arith.constant 1.000000e+00 : f32
    %472 = vector.broadcast %cst_129 : f32 to vector<8x128xf32>
    %473 = arith.addf %472, %471 : vector<8x128xf32>
    %474 = arith.divf %472, %473 : vector<8x128xf32>
    %475 = vector.extract_strided_slice %455 {offsets = [0, 256], sizes = [8, 128], strides = [1, 1]} : vector<8x384xf32> to vector<8x128xf32>
    %476 = vector.extract_strided_slice %458 {offsets = [0, 256], sizes = [8, 128], strides = [1, 1]} : vector<8x384xf32> to vector<8x128xf32>
    %477 = arith.mulf %466, %476 : vector<8x128xf32>
    %478 = arith.addf %475, %477 : vector<8x128xf32>
    %479 = math.tanh %478 : vector<8x128xf32>
    %cst_130 = arith.constant 1.000000e+00 : f32
    %480 = vector.broadcast %cst_130 : f32 to vector<8x128xf32>
    %481 = arith.subf %480, %474 : vector<8x128xf32>
    %482 = arith.mulf %481, %479 : vector<8x128xf32>
    %483 = arith.mulf %474, %454 : vector<8x128xf32>
    %484 = arith.addf %482, %483 : vector<8x128xf32>
    %c56_131 = arith.constant 56 : index
    %c0_132 = arith.constant 0 : index
    %485 = vector.load %arg11[%c56_131, %c0_132] : memref<64x384xf32, #tpu.memory_space<vmem>>, vector<8x384xf32>
    %cst_133 = arith.constant dense<0.000000e+00> : vector<8x384xf32>
    %486 = tpu.matmul %484, %271, %cst_133 {dimension_numbers = #tpu.dot_dimension_numbers<[1], [0], [0], [1], [0, 0, 1, 1], [], []>} : vector<8x128xf32>, vector<128x384xf32>, vector<8x384xf32> -> vector<8x384xf32>
    %487 = vector.broadcast %273 : vector<1x384xf32> to vector<8x384xf32>
    %488 = arith.addf %486, %487 : vector<8x384xf32>
    %489 = vector.extract_strided_slice %485 {offsets = [0, 0], sizes = [8, 128], strides = [1, 1]} : vector<8x384xf32> to vector<8x128xf32>
    %490 = vector.extract_strided_slice %488 {offsets = [0, 0], sizes = [8, 128], strides = [1, 1]} : vector<8x384xf32> to vector<8x128xf32>
    %491 = arith.addf %489, %490 : vector<8x128xf32>
    %492 = arith.negf %491 : vector<8x128xf32>
    %493 = math.exp %492 : vector<8x128xf32>
    %cst_134 = arith.constant 1.000000e+00 : f32
    %494 = vector.broadcast %cst_134 : f32 to vector<8x128xf32>
    %495 = arith.addf %494, %493 : vector<8x128xf32>
    %496 = arith.divf %494, %495 : vector<8x128xf32>
    %497 = vector.extract_strided_slice %485 {offsets = [0, 128], sizes = [8, 128], strides = [1, 1]} : vector<8x384xf32> to vector<8x128xf32>
    %498 = vector.extract_strided_slice %488 {offsets = [0, 128], sizes = [8, 128], strides = [1, 1]} : vector<8x384xf32> to vector<8x128xf32>
    %499 = arith.addf %497, %498 : vector<8x128xf32>
    %500 = arith.negf %499 : vector<8x128xf32>
    %501 = math.exp %500 : vector<8x128xf32>
    %cst_135 = arith.constant 1.000000e+00 : f32
    %502 = vector.broadcast %cst_135 : f32 to vector<8x128xf32>
    %503 = arith.addf %502, %501 : vector<8x128xf32>
    %504 = arith.divf %502, %503 : vector<8x128xf32>
    %505 = vector.extract_strided_slice %485 {offsets = [0, 256], sizes = [8, 128], strides = [1, 1]} : vector<8x384xf32> to vector<8x128xf32>
    %506 = vector.extract_strided_slice %488 {offsets = [0, 256], sizes = [8, 128], strides = [1, 1]} : vector<8x384xf32> to vector<8x128xf32>
    %507 = arith.mulf %496, %506 : vector<8x128xf32>
    %508 = arith.addf %505, %507 : vector<8x128xf32>
    %509 = math.tanh %508 : vector<8x128xf32>
    %cst_136 = arith.constant 1.000000e+00 : f32
    %510 = vector.broadcast %cst_136 : f32 to vector<8x128xf32>
    %511 = arith.subf %510, %504 : vector<8x128xf32>
    %512 = arith.mulf %511, %509 : vector<8x128xf32>
    %513 = arith.mulf %504, %484 : vector<8x128xf32>
    %514 = arith.addf %512, %513 : vector<8x128xf32>
    %c0_137 = arith.constant 0 : index
    %c0_138 = arith.constant 0 : index
    %515 = vector.load %arg7[%c0_137, %c0_138] : memref<128x128xf32, #tpu.memory_space<vmem>>, vector<128x128xf32>
    %cst_139 = arith.constant dense<0.000000e+00> : vector<8x128xf32>
    %516 = tpu.matmul %514, %515, %cst_139 {dimension_numbers = #tpu.dot_dimension_numbers<[1], [0], [0], [1], [0, 0, 1, 1], [], []>} : vector<8x128xf32>, vector<128x128xf32>, vector<8x128xf32> -> vector<8x128xf32>
    %c0_140 = arith.constant 0 : index
    %c0_141 = arith.constant 0 : index
    %517 = vector.load %arg8[%c0_140, %c0_141] : memref<1x128xf32, #tpu.memory_space<vmem>>, vector<1x128xf32>
    %518 = vector.broadcast %517 : vector<1x128xf32> to vector<8x128xf32>
    %519 = arith.addf %516, %518 : vector<8x128xf32>
    %c0_142 = arith.constant 0 : index
    %c0_143 = arith.constant 0 : index
    %520 = vector.load %arg9[%c0_142, %c0_143] : memref<8x128xf32, #tpu.memory_space<vmem>>, vector<8x128xf32>
    tpu.vector_store %arg9[%c0_142, %c0_143], %519 {strides = array<i32>} : memref<8x128xf32, #tpu.memory_space<vmem>>, vector<8x128xf32>,
    return
  }
  func.func @transform_0(%arg0: i32) -> (i32, i32) {
    %c0_i32 = arith.constant 0 : i32
    %c0_i32_0 = arith.constant 0 : i32
    %c0_i32_1 = arith.constant 0 : i32
    return %c0_i32, %c0_i32_0 : i32, i32
  }
  func.func @transform_1(%arg0: i32) -> (i32, i32) {
    %c0_i32 = arith.constant 0 : i32
    %c0_i32_0 = arith.constant 0 : i32
    %c0_i32_1 = arith.constant 0 : i32
    return %c0_i32, %c0_i32_0 : i32, i32
  }
  func.func @transform_2(%arg0: i32) -> (i32, i32, i32) {
    %c0_i32 = arith.constant 0 : i32
    %c0_i32_0 = arith.constant 0 : i32
    %c0_i32_1 = arith.constant 0 : i32
    %c0_i32_2 = arith.constant 0 : i32
    return %c0_i32, %c0_i32_0, %c0_i32_1 : i32, i32, i32
  }
  func.func @transform_3(%arg0: i32) -> (i32, i32, i32) {
    %c0_i32 = arith.constant 0 : i32
    %c0_i32_0 = arith.constant 0 : i32
    %c0_i32_1 = arith.constant 0 : i32
    %c0_i32_2 = arith.constant 0 : i32
    return %c0_i32, %c0_i32_0, %c0_i32_1 : i32, i32, i32
  }
  func.func @transform_4(%arg0: i32) -> (i32, i32, i32) {
    %c0_i32 = arith.constant 0 : i32
    %c0_i32_0 = arith.constant 0 : i32
    %c0_i32_1 = arith.constant 0 : i32
    %c0_i32_2 = arith.constant 0 : i32
    return %c0_i32, %c0_i32_0, %c0_i32_1 : i32, i32, i32
  }
  func.func @transform_5(%arg0: i32) -> (i32, i32, i32) {
    %c0_i32 = arith.constant 0 : i32
    %c0_i32_0 = arith.constant 0 : i32
    %c0_i32_1 = arith.constant 0 : i32
    %c0_i32_2 = arith.constant 0 : i32
    return %c0_i32, %c0_i32_0, %c0_i32_1 : i32, i32, i32
  }
  func.func @transform_6(%arg0: i32) -> (i32, i32) {
    %c0_i32 = arith.constant 0 : i32
    %c0_i32_0 = arith.constant 0 : i32
    %c0_i32_1 = arith.constant 0 : i32
    return %c0_i32, %c0_i32_0 : i32, i32
  }
  func.func @transform_7(%arg0: i32) -> (i32, i32) {
    %c0_i32 = arith.constant 0 : i32
    %c0_i32_0 = arith.constant 0 : i32
    %c0_i32_1 = arith.constant 0 : i32
    return %c0_i32, %c0_i32_0 : i32, i32
  }
  func.func @transform_8(%arg0: i32) -> (i32, i32) {
    %c0_i32 = arith.constant 0 : i32
    %c0_i32_0 = arith.constant 0 : i32
    %c0_i32_1 = arith.constant 0 : i32
    return %c0_i32, %c0_i32_0 : i32, i32
  }
}

</mosaic_0001>

<bundles_post_ra>
// kernel: tpu_custom_call.1
= control target key start
LH: loop header
LB: loop body
LE: loop exit
PB: predicated region body
PF: predicated region fallthrough
CT: control target
= control target key end

     0   :  { %13 = vsyncpa [#allocation5], 0  ;;  %s7030_s0 = inlined_call_operand.vmem [shape: f32[64,4], index: 0, kind: input, shape index: {}]   ;;  %s7031_s1 = inlined_call_operand.vmem [shape: f32[4,384], index: 1, kind: input, shape index: {}]   ;;  %s7032_s2 = inlined_call_operand.hbm [shape: f32[1,128,384], index: 2, kind: input, shape index: {}]   ;;  %s7033_s3 = inlined_call_operand.hbm [shape: f32[2,128,384], index: 3, kind: input, shape index: {}]   ;;  %s7034_s4 = inlined_call_operand.vmem [shape: f32[2,1,384], index: 4, kind: input, shape index: {}]   ;;  %s7035_s5 = inlined_call_operand.vmem [shape: f32[2,1,384], index: 5, kind: input, shape index: {}]   ;;  %s7036_s6 = inlined_call_operand.hbm [shape: f32[128,128], index: 6, kind: input, shape index: {}]   ;;  %s7037_s7 = inlined_call_operand.vmem [shape: f32[1,128], index: 7, kind: input, shape index: {}]   ;;  %s7038_s8 = inlined_call_operand.hbm [shape: f32[8,128], index: 8, kind: output, shape index: {}]  }
   0x1   :  { %14 = vsyncpa [#allocation8], 0 }
   0x2   :  { %15 = vsyncpa [#allocation6], 0  ;;  %s5956_s27 = smov [#allocation7]   ;;  %s5957_s29 = smov [#allocation4]  }
   0x3   :  { %s37_s28 = sshll.u32 %s5956_s27, 4  ;;  %s25_s30 = sshll.u32 %s5957_s29, 4  ;;  %s38_s28 = int_to_ptr.vmem [resolvable:$true] %s37_s28  ;;  %s6012_s30 = int_to_ptr.vmem [resolvable:$true] %s25_s30 }
   0x4   :  { %s5862_s11 = scalar_lea.hbm %s7033_s3, 12288 }
   0x5   :  { %p5863_p0 = scmp.ne.s32.totalorder %s7033_s3, %s5862_s11  ;;  %p5866_p1 = scmp.lt.u32.totalorder %s5862_s11, %s7033_s3 }
   0x7   :  { %p5868_p2 = pnand %p5866_p1, %p5863_p0 }
   0x9   :  { %5871 = shalt.err (!%p5868_p2)
}
   0xa   :  { %s5872_s16 = scalar_lea.vmem %s38_s28, 12288  ;;  %p5877_p4 = scmp.lt.s32.totalorder %s38_s28, %s38_s28 }
   0xb   :  { %p5873_p3 = scmp.ne.s32.totalorder %s38_s28, %s5872_s16  ;;  %p5878_p5 = scmp.lt.s32.totalorder %s5872_s16, %s5872_s16 }
   0xd   :  { %p5879_p6 = por %p5878_p5, %p5877_p4 }
   0xf   :  { %p5880_p7 = pnand %p5879_p6, %p5873_p3 }
  0x11   :  { %5883 = shalt.err (!%p5880_p7)
}
  0x12   :  { %s5958_s17 = smov 384   ;;  %s5959_s18 = smov 24  }
  0x13   :  { %43 = dma.hbm_to_vmem [thread:$0]  %s7033_s3, 12288, %s38_s28, [#allocation8], %s5958_s17, %s5958_s17, %s5959_s18  }
  0x14   :  { %s5884_s23 = scalar_lea.hbm %s7032_s2, 6144 }
  0x15   :  { %p5885_p8 = scmp.ne.s32.totalorder %s7032_s2, %s5884_s23  ;;  %p5888_p9 = scmp.lt.u32.totalorder %s5884_s23, %s7032_s2 }
  0x17   :  { %p5890_p10 = pnand %p5888_p9, %p5885_p8 }
  0x19   :  { %5893 = shalt.err (!%p5890_p10)
}
  0x1a   :  { %s5894_s29 = scalar_lea.vmem %s6012_s30, 6144  ;;  %p5899_p12 = scmp.lt.s32.totalorder %s6012_s30, %s6012_s30 }
  0x1b   :  { %p5895_p11 = scmp.ne.s32.totalorder %s6012_s30, %s5894_s29  ;;  %p5900_p13 = scmp.lt.s32.totalorder %s5894_s29, %s5894_s29 }
  0x1d   :  { %p5901_p0 = por %p5900_p13, %p5899_p12 }
  0x1f   :  { %p5902_p1 = pnand %p5901_p0, %p5895_p11 }
  0x21   :  { %5905 = shalt.err (!%p5902_p1)
}
  0x22   :  { %31 = dma.hbm_to_vmem [thread:$0]  %s7032_s2, 6144, %s6012_s30, [#allocation5], %s5958_s17, %s5958_s17, %s5959_s18  }
  0x23   :  { %s5960_s9 = smov [#allocation9]   ;;  %s5906_s13 = scalar_lea.hbm %s7036_s6, 2048 }
  0x24   :  { %s53_s10 = sshll.u32 %s5960_s9, 4  ;;  %p5907_p2 = scmp.ne.s32.totalorder %s7036_s6, %s5906_s13  ;;  %s54_s10 = int_to_ptr.vmem [resolvable:$true] %s53_s10 }
  0x25   :  { %p5910_p3 = scmp.lt.u32.totalorder %s5906_s13, %s7036_s6 }
  0x27   :  { %p5912_p4 = pnand %p5910_p3, %p5907_p2 }
  0x29   :  { %5915 = shalt.err (!%p5912_p4)
}
  0x2a   :  { %s5916_s20 = scalar_lea.vmem %s54_s10, 2048  ;;  %p5921_p6 = scmp.lt.s32.totalorder %s54_s10, %s54_s10 }
  0x2b   :  { %p5917_p5 = scmp.ne.s32.totalorder %s54_s10, %s5916_s20  ;;  %p5922_p7 = scmp.lt.s32.totalorder %s5916_s20, %s5916_s20 }
  0x2d   :  { %p5923_p8 = por %p5922_p7, %p5921_p6 }
  0x2f   :  { %p5924_p9 = pnand %p5923_p8, %p5917_p5 }
  0x31   :  { %5927 = shalt.err (!%p5924_p9)
}
  0x32   :  { %s5961_s2 = smov 128   ;;  %s5962_s30 = smov 8  }
  0x33   :  { %59 = dma.hbm_to_vmem [thread:$0]  %s7036_s6, 2048, %s54_s10, [#allocation8], %s5961_s2, %s5961_s2, %s5962_s30  }
  0x34   :  { %5950 = dma.done.wait [#allocation5], 6144  }
  0x35   :  { %5951 = vsyncadd [#allocation5], 4294961152 }
  0x36   :  { %5952 = dma.done.wait [#allocation8], 14336  }
  0x37   :  { %5953 = vsyncadd [#allocation8], 4294952960  ;;  %v5963_v0 = vmov 0.0   ;;  %v79_v1 = vld [vmem:[%s7031_s1] sm:$0xff]  ;;  %vm126_vm0 = vcmask 1043456   ;;  %vm101_vm1 = vcmask 31744  }
  0x38   :  { %197 = vmatprep.mubr.f32.mxu0 %v5963_v0  ;;  %v71_v2 = vld [vmem:[%s7030_s0] sm:$0xff]  ;;  %v376_v3 = vld [vmem:[#allocation7 + $0x8] sm:$0xff]  ;;  %v100_v4 = vcombine.high %v79_v1, %v79_v1  ;;  %v378_v7 = vld [vmem:[#allocation7 + $0x18] sm:$0xff]  ;;  %v5964_v34 = vmov 0.0|0.0   ;;  %vm5965_vm2 = vmmov 0   ;;  %s5966_s22 = smov [#allocation10]  }
  0x39   :  { %v379_v5 = vld [vmem:[#allocation7 + $0x20] sm:$0xff]  ;;  %3959 = vmatprep.mubr.msk.f32.mxu1 %vm101_vm1, %v71_v2  ;;  %v382_v10 = vld [vmem:[#allocation7 + $0x38] sm:$0xff]  ;;  %v385_v11 = vld [vmem:[#allocation7 + $0x50] sm:$0xff]  ;;  %s3571_s23 = sshll.u32 %s5966_s22, 4  ;;  %s3572_s23 = int_to_ptr.vmem [resolvable:$true] %s3571_s23 }
  0x3a   :  { %v375_v6 = vld [vmem:[#allocation7] sm:$0xff]  ;;  %v6063_v8 = vpack.c.bf16 %v379_v5, %v376_v3  ;;  %3581 = vmatprep.subr.msk.mxu0 %vm126_vm0, %v100_v4  ;;  %v6068_v12 = vpack.c.bf16 %v385_v11, %v382_v10  ;;  %v381_v13 = vld [vmem:[#allocation7 + $0x30] sm:$0xff]  ;;  %v384_v14 = vld [vmem:[#allocation7 + $0x48] sm:$0xff]  ;;  %s5928_s24 = scalar_lea.vmem %s3572_s23, 128  ;;  %p5933_p11 = scmp.lt.s32.totalorder %s3572_s23, %s3572_s23 }
  0x3b   :  { %v6065_v9 = vpack.c.bf16 %v378_v7, %v375_v6  ;;  %3582 = vmatpush1.msk.msra.mxu0 %vm126_vm0, %v79_v1  ;;  %v388_v15 = vld [vmem:[#allocation7 + $0x68] sm:$0xff]  ;;  %v391_v16 = vld [vmem:[#allocation7 + $0x80] sm:$0xff]  ;;  %v6078_v18 = vpack.c.bf16 %v384_v14, %v381_v13  ;;  %v390_v21 = vld [vmem:[#allocation7 + $0x78] sm:$0xff]  ;;  %p5929_p10 = scmp.ne.s32.totalorder %s3572_s23, %s5928_s24  ;;  %p5934_p12 = scmp.lt.s32.totalorder %s5928_s24, %s5928_s24 }
  0x3c   :  { %3583 = vmatmul.mubr.msk.f32.vlgmr.msra.gmra.mrb[0].mxu0 %vm101_vm1, %v71_v2  ;;  %4611 = vmatprep.subr.bf16.mxu0 %v6063_v8  ;;  %v72_v17 = vld [vmem:[%s7030_s0 + $0x8] sm:$0xff]  ;;  %v6081_v19 = vpack.c.bf16 %v391_v16, %v388_v15  ;;  %v387_v20 = vld [vmem:[#allocation7 + $0x60] sm:$0xff]  ;;  %v394_v22 = vld [vmem:[#allocation7 + $0x98] sm:$0xff] }
  0x3d   :  { %4613 = vmatpush1.bf16.msra.mxu0 %v6065_v9  ;;  %203 = vmatprep.mubr.f32.mxu0 %v5963_v0  ;;  %v397_v23 = vld [vmem:[#allocation7 + $0xb0] sm:$0xff]  ;;  %v6089_v25 = vpack.c.bf16 %v390_v21, %v387_v20  ;;  %v80_v26 = vld [vmem:[%s7031_s1 + $0x8] sm:$0xf]  ;;  %v403_v31 = vld [vmem:[#allocation7 + $0xe0] sm:$0xff]  ;;  %p5935_p13 = por %p5934_p12, %p5933_p11 }
  0x3e   :  { %4615 = vmatprep.subr.bf16.mxu0 %v6068_v12  ;;  %v73_v24 = vld [vmem:[%s7030_s0 + $0x10] sm:$0xff]  ;;  %v6095_v27 = vpack.c.bf16 %v397_v23, %v394_v22  ;;  %v396_v29 = vld [vmem:[#allocation7 + $0xa8] sm:$0xff]  ;;  %3957 = vmatprep.subr.msk.mxu1 %vm126_vm0, %v80_v26  ;;  %v74_v36 = vld [vmem:[%s7030_s0 + $0x18] sm:$0xff] }
  0x3f   :  { %v393_v28 = vld [vmem:[#allocation7 + $0x90] sm:$0xff]  ;;  %v400_v30 = vld [vmem:[#allocation7 + $0xc8] sm:$0xff]  ;;  %3958 = vmatpush3.msk.msra.mxu1 %vm126_vm0, %v80_v26  ;;  %v383_v38 = vld [vmem:[#allocation7 + $0x40] sm:$0xff]  ;;  %p5936_p0 = pnand %p5935_p13, %p5929_p10 }
  0x40   :  { %3584 = vmatmul.mubr.msk.f32.gmra.mrb[2].mxu0 %vm101_vm1, %v72_v17  ;;  %v377_v32 = vld [vmem:[#allocation7 + $0x10] sm:$0xff]  ;;  %v380_v33 = vld [vmem:[#allocation7 + $0x28] sm:$0xff]  ;;  %4642 = vmatprep.subr.bf16.mxu1 %v5964_v34  ;;  %v6108_v37 = vpack.c.bf16 %v396_v29, %v393_v28  ;;  %v6111_v39 = vpack.c.bf16 %v403_v31, %v400_v30  ;;  %v399_v40 = vld [vmem:[#allocation7 + $0xc0] sm:$0xff]  ;;  %v83_v29 = vlaneseq }
  0x41   :  { %4617 = vmatpush1.bf16.msra.mxu0 %v6078_v18  ;;  %209 = vmatprep.mubr.f32.mxu0 %v5963_v0  ;;  %v6101_v35 = vpack.c.bf16 %v380_v33, %v377_v32  ;;  %v402_v41 = vld [vmem:[#allocation7 + $0xd8] sm:$0xff]  ;;  %v409_v44 = vld [vmem:[#allocation7 + $0x110] sm:$0xff]  ;;  %v392_v47 = vld [vmem:[#allocation7 + $0x88] sm:$0xff] }
  0x42   :  { %4619 = vmatprep.subr.bf16.mxu0 %v6081_v19  ;;  %3960 = vmatmul.mubr.msk.f32.vlgmr.msra.gmra.mrb[0].mxu1 %vm101_vm1, %v72_v17  ;;  %v386_v42 = vld [vmem:[#allocation7 + $0x58] sm:$0xff]  ;;  %v389_v46 = vld [vmem:[#allocation7 + $0x70] sm:$0xff]  ;;  %v75_v48 = vld [vmem:[%s7030_s0 + $0x20] sm:$0xff]  ;;  %v6125_v49 = vpack.c.bf16 %v402_v41, %v399_v40  ;;  %v84_v30 = vshrl.u32 %v83_v29, 7 }
  0x43   :  { %v406_v43 = vld [vmem:[#allocation7 + $0xf8] sm:$0xff]  ;;  %4644 = vmatpush3.bf16.msra.mxu1 %v6101_v35  ;;  %v6115_v45 = vpack.c.bf16 %v386_v42, %v383_v38  ;;  %3962 = vmatprep.mubr.msk.f32.mxu1 %vm101_vm1, %v73_v24  ;;  %v405_v51 = vld [vmem:[#allocation7 + $0xf0] sm:$0xff]  ;;  %v408_v52 = vld [vmem:[#allocation7 + $0x108] sm:$0xff]  ;;  %v6132_v55 = vpack.c.bf16 %v392_v47, %v389_v46 }
  0x44   :  { %3585 = vmatmul.mubr.msk.f32.gmra.mrb[4].mxu0 %vm101_vm1, %v73_v24  ;;  %4645 = vmatprep.subr.bf16.mxu1 %v5964_v34  ;;  %v6128_v50 = vpack.c.bf16 %v409_v44, %v406_v43  ;;  %v412_v53 = vld [vmem:[#allocation7 + $0x128] sm:$0xff]  ;;  %v415_v54 = vld [vmem:[#allocation7 + $0x140] sm:$0xff]  ;;  %v398_v57 = vld [vmem:[#allocation7 + $0xb8] sm:$0xff]  ;;  %v6142_v59 = vpack.c.bf16 %v408_v52, %v405_v51  ;;  %v6235_v31 = vsub.s32 2, %v84_v30  ;;  %v6251_v52 = vsub.s32 0, %v84_v30 }
  0x45   :  { %4621 = vmatpush1.bf16.msra.mxu0 %v6089_v25  ;;  %215 = vmatprep.mubr.f32.mxu0 %v5963_v0  ;;  %v395_v56 = vld [vmem:[#allocation7 + $0xa0] sm:$0xff]  ;;  %v76_v58 = vld [vmem:[%s7030_s0 + $0x28] sm:$0xff]  ;;  %v77_v60 = vld [vmem:[%s7030_s0 + $0x30] sm:$0xff]  ;;  %v6148_v61 = vpack.c.bf16 %v415_v54, %v412_v53 }
  0x46   :  { %4623 = vmatprep.subr.bf16.mxu0 %v6095_v27  ;;  %3963 = vmatmul.mubr.msk.f32.gmra.mrb[2].mxu1 %vm101_vm1, %v74_v36  ;;  %v411_v62 = vld [vmem:[#allocation7 + $0x120] sm:$0xff]  ;;  %v414_v63 = vld [vmem:[#allocation7 + $0x138] sm:$0xff]  ;;  %v421_v2 = vld [vmem:[#allocation7 + $0x170] sm:$0xff]  ;;  %v6152_v3 = vpack.c.bf16 %v398_v57, %v395_v56 }
  0x47   :  { %4647 = vmatpush3.bf16.msra.mxu1 %v6115_v45  ;;  %3965 = vmatprep.mubr.msk.f32.mxu1 %vm101_vm1, %v75_v48  ;;  %v418_v1 = vld [vmem:[#allocation7 + $0x158] sm:$0xff]  ;;  %v401_v4 = vld [vmem:[#allocation7 + $0xd0] sm:$0xff]  ;;  %v404_v5 = vld [vmem:[#allocation7 + $0xe8] sm:$0xff]  ;;  %v6159_v6 = vpack.c.bf16 %v414_v63, %v411_v62 }
  0x48   :  { %3586 = vmatmul.mubr.msk.f32.gmra.mrb[6].mxu0 %vm101_vm1, %v74_v36  ;;  %4648 = vmatprep.subr.bf16.mxu1 %v5964_v34  ;;  %v78_v7 = vld [vmem:[%s7030_s0 + $0x38] sm:$0xff]  ;;  %v6165_v10 = vpack.c.bf16 %v421_v2, %v418_v1  ;;  %v417_v11 = vld [vmem:[#allocation7 + $0x150] sm:$0xff]  ;;  %v420_v13 = vld [vmem:[#allocation7 + $0x168] sm:$0xff]  ;;  %v6169_v14 = vpack.c.bf16 %v404_v5, %v401_v4 }
  0x49   :  { %4625 = vmatpush1.bf16.msra.mxu0 %v6108_v37  ;;  %221 = vmatprep.mubr.f32.mxu0 %v5963_v0  ;;  %v407_v15 = vld [vmem:[#allocation7 + $0x100] sm:$0xff]  ;;  %v410_v16 = vld [vmem:[#allocation7 + $0x118] sm:$0xff]  ;;  %v6177_v17 = vpack.c.bf16 %v420_v13, %v417_v11  ;;  %v413_v21 = vld [vmem:[#allocation7 + $0x130] sm:$0xff] }
  0x4a   :  { %4627 = vmatprep.subr.bf16.mxu0 %v6111_v39  ;;  %3966 = vmatmul.mubr.msk.f32.gmra.mrb[4].mxu1 %vm101_vm1, %v76_v58  ;;  %v6181_v20 = vpack.c.bf16 %v410_v16, %v407_v15  ;;  %v416_v22 = vld [vmem:[#allocation7 + $0x148] sm:$0xff]  ;;  %v419_v24 = vld [vmem:[#allocation7 + $0x160] sm:$0xff]  ;;  %v422_v26 = vld [vmem:[#allocation7 + $0x178] sm:$0xff] }
  0x4b   :  { %4650 = vmatpush3.bf16.msra.mxu1 %v6132_v55  ;;  %3968 = vmatprep.mubr.msk.f32.mxu1 %vm101_vm1, %v77_v60  ;;  %v6189_v23 = vpack.c.bf16 %v416_v22, %v413_v21  ;;  %v6197_v28 = vpack.c.bf16 %v422_v26, %v419_v24  ;;  %v81_v32 = vld [vmem:[%s7034_s4] sm:$0x7] }
  0x4c   :  { %3587 = vmatmul.mubr.msk.f32.gmra.mrb[8].mxu0 %vm101_vm1, %v75_v48  ;;  %4651 = vmatprep.subr.bf16.mxu1 %v5964_v34  ;;  %v94_v33 = vrot.slane %v81_v32, %v6235_v31  ;;  %v423_v53 = vld [vmem:[%s7035_s5] sm:$0x7]  ;;  %v86_v62 = vrot.slane %v81_v32, %v6251_v52 }
  0x4d   :  { %4629 = vmatpush1.bf16.msra.mxu0 %v6125_v49  ;;  %227 = vmatprep.mubr.f32.mxu0 %v5963_v0  ;;  %v431_v63 = vrot.slane %v423_v53, %v6251_v52 }
  0x4e   :  { %4631 = vmatprep.subr.bf16.mxu0 %v6128_v50  ;;  %3969 = vmatmul.mubr.msk.f32.gmra.mrb[6].mxu1 %vm101_vm1, %v78_v7 }
  0x4f   :  { %4653 = vmatpush3.bf16.msra.mxu1 %v6152_v3  ;;  %4003 = vmatprep.mubr.msk.f32.mxu1 %vm5965_vm2, %v5963_v0  ;;  %v6266_v4 = vadd.f32 %v431_v63, %v86_v62 }
  0x50   :  { %3588 = vmatmul.mubr.msk.f32.gmra.mrb[10].mxu0 %vm101_vm1, %v76_v58  ;;  %4654 = vmatprep.subr.bf16.mxu1 %v5964_v34  ;;  %v6258_v58 = vsub.s32 1, %v84_v30  ;;  %v6273_v30 = vrot.slane %v423_v53, %v6235_v31 }
  0x51   :  { %4633 = vmatpush1.bf16.msra.mxu0 %v6142_v59  ;;  %233 = vmatprep.mubr.f32.mxu0 %v5963_v0 }
  0x52   :  { %4635 = vmatprep.subr.bf16.mxu0 %v6148_v61  ;;  %v90_v1 = vrot.slane %v81_v32, %v6258_v58  ;;  %v435_v2 = vrot.slane %v423_v53, %v6258_v58 }
  0x53   :  { %4656 = vmatpush3.bf16.msra.mxu1 %v6169_v14 }
  0x54   :  { %3589 = vmatmul.mubr.msk.f32.gmra.mrb[12].mxu0 %vm101_vm1, %v77_v60  ;;  %4657 = vmatprep.subr.bf16.mxu1 %v5964_v34 }
  0x55   :  { %4637 = vmatpush1.bf16.msra.mxu0 %v6159_v6  ;;  %239 = vmatprep.mubr.f32.mxu0 %v5963_v0 }
  0x56   :  { %4639 = vmatprep.subr.bf16.mxu0 %v6165_v10 }
  0x57   :  { %4659 = vmatpush3.bf16.msra.mxu1 %v6181_v20 }
  0x58   :  { %3590 = vmatmul.mubr.msk.f32.gmra.mrb[14].mxu0 %vm101_vm1, %v78_v7  ;;  %4660 = vmatprep.subr.bf16.mxu1 %v5964_v34  ;;  %v6268_v7 = vadd.f32 %v435_v2, %v90_v1 }
  0x59   :  { %4641 = vmatpush1.bf16.msra.mxu0 %v6177_v17  ;;  %507 = vmatprep.mubr.f32.mxu0 %v5963_v0 }
  0x5a   :  { %4667 = vmatprep.subr.bf16.mxu0 %v6063_v8 }
  0x5b   :  { %4662 = vmatpush3.bf16.msra.mxu1 %v6189_v23 }
  0x5c   :  { %508 = vmatmul.mubr.f32.vlgmr.msra.gmra.mrb[0].mxu0 %v5963_v0  ;;  %4663 = vmatprep.subr.bf16.mxu1 %v5964_v34 }
  0x5d   :  { %4669 = vmatpush1.bf16.msra.mxu0 %v6065_v9  ;;  %673 = vmatprep.mubr.f32.mxu0 %v5963_v0 }
  0x5e   :  { %4671 = vmatprep.subr.bf16.mxu0 %v6068_v12 }
  0x5f   :  { %4665 = vmatpush3.bf16.msra.mxu1 %v6197_v28 }
  0x60   :  { %4698 = vmatprep.subr.bf16.mxu1 %v5964_v34 }
  0x61   :  { %4673 = vmatpush1.bf16.msra.mxu0 %v6078_v18 }
  0x62   :  { %4675 = vmatprep.subr.bf16.mxu0 %v6081_v19  ;;  %4004 = vmatmul.mubr.f32.vlgmr.msra.gmra.mrb[8].mxu1 %v5963_v0 }
  0x63   :  { %4700 = vmatpush3.bf16.msra.mxu1 %v6101_v35  ;;  %4038 = vmatprep.mubr.msk.f32.mxu1 %vm5965_vm2, %v5963_v0 }
  0x64   :  { %4701 = vmatprep.subr.bf16.mxu1 %v5964_v34 }
  0x65   :  { %4677 = vmatpush1.bf16.msra.mxu0 %v6089_v25 }
  0x66   :  { %4679 = vmatprep.subr.bf16.mxu0 %v6095_v27 }
  0x67   :  { %4703 = vmatpush3.bf16.msra.mxu1 %v6115_v45 }
  0x68   :  { %4704 = vmatprep.subr.bf16.mxu1 %v5964_v34 }
  0x69   :  { %4681 = vmatpush1.bf16.msra.mxu0 %v6108_v37 }
  0x6a   :  { %4683 = vmatprep.subr.bf16.mxu0 %v6111_v39 }
  0x6b   :  { %4706 = vmatpush3.bf16.msra.mxu1 %v6132_v55 }
  0x6c   :  { %4707 = vmatprep.subr.bf16.mxu1 %v5964_v34 }
  0x6d   :  { %4685 = vmatpush1.bf16.msra.mxu0 %v6125_v49 }
  0x6e   :  { %4687 = vmatprep.subr.bf16.mxu0 %v6128_v50 }
  0x6f   :  { %4709 = vmatpush3.bf16.msra.mxu1 %v6152_v3 }
  0x70   :  { %4710 = vmatprep.subr.bf16.mxu1 %v5964_v34 }
  0x71   :  { %4689 = vmatpush1.bf16.msra.mxu0 %v6142_v59 }
  0x72   :  { %4691 = vmatprep.subr.bf16.mxu0 %v6148_v61 }
  0x73   :  { %4712 = vmatpush3.bf16.msra.mxu1 %v6169_v14 }
  0x74   :  { %4713 = vmatprep.subr.bf16.mxu1 %v5964_v34 }
  0x75   :  { %4693 = vmatpush1.bf16.msra.mxu0 %v6159_v6 }
  0x76   :  { %4695 = vmatprep.subr.bf16.mxu0 %v6165_v10 }
  0x77   :  { %4715 = vmatpush3.bf16.msra.mxu1 %v6181_v20 }
  0x78   :  { %4716 = vmatprep.subr.bf16.mxu1 %v5964_v34 }
  0x79   :  { %4697 = vmatpush1.bf16.msra.mxu0 %v6177_v17 }
  0x7a   :  { %4723 = vmatprep.subr.bf16.mxu0 %v6063_v8 }
  0x7b   :  { %4718 = vmatpush3.bf16.msra.mxu1 %v6189_v23 }
  0x7c   :  { %4719 = vmatprep.subr.bf16.mxu1 %v5964_v34 }
  0x7f   :  { %4721 = vmatpush3.bf16.msra.mxu1 %v6197_v28 }
  0x80   :  { %4754 = vmatprep.subr.bf16.mxu1 %v5964_v34 }
 0x115   :  { %v3961_v36 = vpop.f32.mrb[0].mxu1 }
 0x116   :  { %v6241_v38 = vadd.f32 %v3961_v36, %v94_v33  ;;  %v312_v40 = vpop.f32.mrb[1].mxu1 }
 0x119   :  { %v3964_v41 = vpop.f32.mrb[2].mxu1 }
 0x11a   :  { %v6243_v42 = vadd.f32 %v3964_v41, %v94_v33  ;;  %v322_v43 = vpop.f32.mrb[3].mxu1 }
 0x11b   :  { %v6245_v44 = vadd.f32 %v322_v43, %v94_v33 }
 0x11d   :  { %v3967_v46 = vpop.f32.mrb[4].mxu1 }
 0x11e   :  { %v6247_v47 = vadd.f32 %v3967_v46, %v94_v33  ;;  %v332_v48 = vpop.f32.mrb[5].mxu1  ;;  %v313_v46 = vadd.f32 %v312_v40, %v94_v33 }
 0x11f   :  { %v6249_v51 = vadd.f32 %v332_v48, %v94_v33 }
 0x121   :  { %v3970_v54 = vpop.f32.mrb[6].mxu1 }
 0x122   :  { %v6256_v56 = vadd.f32 %v3970_v54, %v94_v33  ;;  %v342_v57 = vpop.f32.mrb[7].mxu1 }
 0x123   :  { %v6260_v60 = vadd.f32 %v342_v57, %v94_v33 }
 0x12f   :  { %v509_v5 = vpop.f32.mrb[0].mxu0 }
 0x130   :  { %v5595_v11 = vadd.f32 %v6266_v4, %v509_v5  ;;  %v511_v13 = vpop.f32.mrb[1].mxu0 }
 0x131   :  { %v5597_v16 = vadd.f32 %v6268_v7, %v511_v13 }
 0x132   :  { %v3600_v15 = vmul.f32 -1.442695, %v5595_v11 }
 0x133   :  { %v3601_v21 = vmul.f32 -1.442695, %v5597_v16 }
 0x134   :  { %5702 = vpow2.f32 %v3600_v15 }
 0x135   :  { %v580_v22 = vpop.f32.mrb[8].mxu1  ;;  %5704 = vpow2.f32 %v3601_v21 }
 0x136   :  { %v4005_v24 = vpop.f32.mrb[9].mxu1  ;;  %v581_v41 = vadd.f32 %v580_v22, %v6273_v30 }
 0x13e   :  { %v5703_v26 = vpop.eup %5702 }
 0x13f   :  { %v588_v29 = vadd.f32 1.0, %v5703_v26  ;;  %v5705_v32 = vpop.eup %5704 }
 0x140   :  { %v595_v36 = vadd.f32 1.0, %v5705_v32 }
 0x141   :  { %5706 = vrcp.f32 %v588_v29 }
 0x142   :  { %5708 = vrcp.f32 %v595_v36 }
 0x14b   :  { %v5707_v43 = vpop.eup %5706 }
 0x14c   :  { %v598_v48 = vmul.f32 %v5707_v43, %v581_v41  ;;  %v5709_v57 = vpop.eup %5708 }
 0x14d   :  { %v601_v62 = vsub.f32 1.0, %v5709_v57  ;;  %v603_v2 = vmul.f32 0.0, %v5709_v57 }
 0x14e   :  { %v599_v54 = vadd.f32 %v598_v48, %v313_v46 }
 0x150   :  { %5710 = vtanh.f32 %v599_v54 }
 0x15a   :  { %v5711_v63 = vpop.eup %5710 }
 0x15b   :  { %v602_v1 = vmul.f32 %v5711_v63, %v601_v62 }
 0x15d   :  { %v6276_v5 = vadd.f32 %v603_v2, %v602_v1 }
 0x15f   :  { %674 = vmatmul.mubr.f32.vlgmr.msra.gmra.mrb[2].mxu0 %v6276_v5  ;;  %4039 = vmatmul.mubr.f32.vlgmr.msra.gmra.mrb[10].mxu1 %v6276_v5 }
 0x160   :  { %4725 = vmatpush1.bf16.msra.mxu0 %v6065_v9  ;;  %4756 = vmatpush3.bf16.msra.mxu1 %v6101_v35 }
 0x161   :  { %4727 = vmatprep.subr.bf16.mxu0 %v6068_v12  ;;  %4757 = vmatprep.subr.bf16.mxu1 %v5964_v34 }
 0x162   :  { %839 = vmatprep.mubr.f32.mxu0 %v5963_v0  ;;  %4073 = vmatprep.mubr.msk.f32.mxu1 %vm5965_vm2, %v5963_v0 }
 0x164   :  { %4729 = vmatpush1.bf16.msra.mxu0 %v6078_v18  ;;  %4759 = vmatpush3.bf16.msra.mxu1 %v6115_v45 }
 0x165   :  { %4731 = vmatprep.subr.bf16.mxu0 %v6081_v19  ;;  %4760 = vmatprep.subr.bf16.mxu1 %v5964_v34 }
 0x168   :  { %4733 = vmatpush1.bf16.msra.mxu0 %v6089_v25  ;;  %4762 = vmatpush3.bf16.msra.mxu1 %v6132_v55 }
 0x169   :  { %4735 = vmatprep.subr.bf16.mxu0 %v6095_v27  ;;  %4763 = vmatprep.subr.bf16.mxu1 %v5964_v34 }
 0x16c   :  { %4737 = vmatpush1.bf16.msra.mxu0 %v6108_v37  ;;  %4765 = vmatpush3.bf16.msra.mxu1 %v6152_v3 }
 0x16d   :  { %4739 = vmatprep.subr.bf16.mxu0 %v6111_v39  ;;  %4766 = vmatprep.subr.bf16.mxu1 %v5964_v34 }
 0x170   :  { %4741 = vmatpush1.bf16.msra.mxu0 %v6125_v49  ;;  %4768 = vmatpush3.bf16.msra.mxu1 %v6169_v14 }
 0x171   :  { %4743 = vmatprep.subr.bf16.mxu0 %v6128_v50  ;;  %4769 = vmatprep.subr.bf16.mxu1 %v5964_v34 }
 0x174   :  { %4745 = vmatpush1.bf16.msra.mxu0 %v6142_v59  ;;  %4771 = vmatpush3.bf16.msra.mxu1 %v6181_v20 }
 0x175   :  { %4747 = vmatprep.subr.bf16.mxu0 %v6148_v61  ;;  %4772 = vmatprep.subr.bf16.mxu1 %v5964_v34 }
 0x178   :  { %4749 = vmatpush1.bf16.msra.mxu0 %v6159_v6  ;;  %4774 = vmatpush3.bf16.msra.mxu1 %v6189_v23 }
 0x179   :  { %4751 = vmatprep.subr.bf16.mxu0 %v6165_v10  ;;  %4775 = vmatprep.subr.bf16.mxu1 %v5964_v34 }
 0x17c   :  { %4753 = vmatpush1.bf16.msra.mxu0 %v6177_v17  ;;  %4777 = vmatpush3.bf16.msra.mxu1 %v6197_v28 }
 0x17d   :  { %4779 = vmatprep.subr.bf16.mxu0 %v6063_v8  ;;  %4810 = vmatprep.subr.bf16.mxu1 %v5964_v34 }
 0x232   :  { %v675_v33 = vpop.f32.mrb[2].mxu0  ;;  %v746_v40 = vpop.f32.mrb[10].mxu1 }
 0x233   :  { %v5599_v53 = vadd.f32 %v6266_v4, %v675_v33  ;;  %v677_v11 = vpop.f32.mrb[3].mxu0  ;;  %v4040_v13 = vpop.f32.mrb[11].mxu1  ;;  %v747_v32 = vadd.f32 %v746_v40, %v6273_v30 }
 0x234   :  { %v5601_v16 = vadd.f32 %v6268_v7, %v677_v11 }
 0x235   :  { %v3602_v15 = vmul.f32 -1.442695, %v5599_v53 }
 0x236   :  { %v3603_v21 = vmul.f32 -1.442695, %v5601_v16 }
 0x237   :  { %5712 = vpow2.f32 %v3602_v15 }
 0x238   :  { %5714 = vpow2.f32 %v3603_v21 }
 0x241   :  { %v5713_v22 = vpop.eup %5712 }
 0x242   :  { %v754_v24 = vadd.f32 1.0, %v5713_v22  ;;  %v5715_v26 = vpop.eup %5714 }
 0x243   :  { %v761_v29 = vadd.f32 1.0, %v5715_v26 }
 0x244   :  { %5716 = vrcp.f32 %v754_v24 }
 0x245   :  { %5718 = vrcp.f32 %v761_v29 }
 0x24e   :  { %v5717_v36 = vpop.eup %5716 }
 0x24f   :  { %v764_v41 = vmul.f32 %v5717_v36, %v747_v32  ;;  %v5719_v46 = vpop.eup %5718 }
 0x250   :  { %v767_v48 = vsub.f32 1.0, %v5719_v46  ;;  %v769_v62 = vmul.f32 %v5719_v46, %v6276_v5 }
 0x251   :  { %v765_v43 = vadd.f32 %v764_v41, %v6241_v38 }
 0x253   :  { %5720 = vtanh.f32 %v765_v43 }
 0x25d   :  { %v5721_v54 = vpop.eup %5720 }
 0x25e   :  { %v768_v57 = vmul.f32 %v5721_v54, %v767_v48 }
 0x260   :  { %v6320_v63 = vadd.f32 %v769_v62, %v768_v57 }
 0x262   :  { %840 = vmatmul.mubr.f32.vlgmr.msra.gmra.mrb[4].mxu0 %v6320_v63  ;;  %4074 = vmatmul.mubr.f32.vlgmr.msra.gmra.mrb[12].mxu1 %v6320_v63 }
 0x263   :  { %4781 = vmatpush1.bf16.msra.mxu0 %v6065_v9  ;;  %4812 = vmatpush3.bf16.msra.mxu1 %v6101_v35 }
 0x264   :  { %4783 = vmatprep.subr.bf16.mxu0 %v6068_v12  ;;  %4813 = vmatprep.subr.bf16.mxu1 %v5964_v34 }
 0x265   :  { %1005 = vmatprep.mubr.f32.mxu0 %v5963_v0  ;;  %4108 = vmatprep.mubr.msk.f32.mxu1 %vm5965_vm2, %v5963_v0 }
 0x267   :  { %4785 = vmatpush1.bf16.msra.mxu0 %v6078_v18  ;;  %4815 = vmatpush3.bf16.msra.mxu1 %v6115_v45 }
 0x268   :  { %4787 = vmatprep.subr.bf16.mxu0 %v6081_v19  ;;  %4816 = vmatprep.subr.bf16.mxu1 %v5964_v34 }
 0x26b   :  { %4789 = vmatpush1.bf16.msra.mxu0 %v6089_v25  ;;  %4818 = vmatpush3.bf16.msra.mxu1 %v6132_v55 }
 0x26c   :  { %4791 = vmatprep.subr.bf16.mxu0 %v6095_v27  ;;  %4819 = vmatprep.subr.bf16.mxu1 %v5964_v34 }
 0x26f   :  { %4793 = vmatpush1.bf16.msra.mxu0 %v6108_v37  ;;  %4821 = vmatpush3.bf16.msra.mxu1 %v6152_v3 }
 0x270   :  { %4795 = vmatprep.subr.bf16.mxu0 %v6111_v39  ;;  %4822 = vmatprep.subr.bf16.mxu1 %v5964_v34 }
 0x273   :  { %4797 = vmatpush1.bf16.msra.mxu0 %v6125_v49  ;;  %4824 = vmatpush3.bf16.msra.mxu1 %v6169_v14 }
 0x274   :  { %4799 = vmatprep.subr.bf16.mxu0 %v6128_v50  ;;  %4825 = vmatprep.subr.bf16.mxu1 %v5964_v34 }
 0x277   :  { %4801 = vmatpush1.bf16.msra.mxu0 %v6142_v59  ;;  %4827 = vmatpush3.bf16.msra.mxu1 %v6181_v20 }
 0x278   :  { %4803 = vmatprep.subr.bf16.mxu0 %v6148_v61  ;;  %4828 = vmatprep.subr.bf16.mxu1 %v5964_v34 }
 0x27b   :  { %4805 = vmatpush1.bf16.msra.mxu0 %v6159_v6  ;;  %4830 = vmatpush3.bf16.msra.mxu1 %v6189_v23 }
 0x27c   :  { %4807 = vmatprep.subr.bf16.mxu0 %v6165_v10  ;;  %4831 = vmatprep.subr.bf16.mxu1 %v5964_v34 }
 0x27f   :  { %4809 = vmatpush1.bf16.msra.mxu0 %v6177_v17  ;;  %4833 = vmatpush3.bf16.msra.mxu1 %v6197_v28 }
 0x280   :  { %4835 = vmatprep.subr.bf16.mxu0 %v6063_v8  ;;  %4866 = vmatprep.subr.bf16.mxu1 %v5964_v34 }
 0x335   :  { %v841_v38 = vpop.f32.mrb[4].mxu0  ;;  %v912_v1 = vpop.f32.mrb[12].mxu1 }
 0x336   :  { %v5603_v2 = vadd.f32 %v6266_v4, %v841_v38  ;;  %v843_v33 = vpop.f32.mrb[5].mxu0  ;;  %v4075_v40 = vpop.f32.mrb[13].mxu1  ;;  %v913_v24 = vadd.f32 %v912_v1, %v6273_v30 }
 0x337   :  { %v5605_v11 = vadd.f32 %v6268_v7, %v843_v33 }
 0x338   :  { %v3604_v53 = vmul.f32 -1.442695, %v5603_v2 }
 0x339   :  { %v3605_v13 = vmul.f32 -1.442695, %v5605_v11 }
 0x33a   :  { %5722 = vpow2.f32 %v3604_v53 }
 0x33b   :  { %5724 = vpow2.f32 %v3605_v13 }
 0x344   :  { %v5723_v15 = vpop.eup %5722 }
 0x345   :  { %v920_v16 = vadd.f32 1.0, %v5723_v15  ;;  %v5725_v21 = vpop.eup %5724 }
 0x346   :  { %v927_v22 = vadd.f32 1.0, %v5725_v21 }
 0x347   :  { %5726 = vrcp.f32 %v920_v16 }
 0x348   :  { %5728 = vrcp.f32 %v927_v22 }
 0x351   :  { %v5727_v26 = vpop.eup %5726 }
 0x352   :  { %v930_v29 = vmul.f32 %v5727_v26, %v913_v24  ;;  %v5729_v36 = vpop.eup %5728 }
 0x353   :  { %v933_v41 = vsub.f32 1.0, %v5729_v36  ;;  %v935_v48 = vmul.f32 %v5729_v36, %v6320_v63 }
 0x354   :  { %v931_v32 = vadd.f32 %v930_v29, %v6245_v44 }
 0x356   :  { %5730 = vtanh.f32 %v931_v32 }
 0x360   :  { %v5731_v43 = vpop.eup %5730 }
 0x361   :  { %v934_v46 = vmul.f32 %v5731_v43, %v933_v41 }
 0x363   :  { %v6364_v54 = vadd.f32 %v935_v48, %v934_v46 }
 0x365   :  { %1006 = vmatmul.mubr.f32.vlgmr.msra.gmra.mrb[6].mxu0 %v6364_v54  ;;  %4109 = vmatmul.mubr.f32.vlgmr.msra.gmra.mrb[14].mxu1 %v6364_v54 }
 0x366   :  { %4837 = vmatpush1.bf16.msra.mxu0 %v6065_v9  ;;  %4868 = vmatpush3.bf16.msra.mxu1 %v6101_v35 }
 0x367   :  { %4839 = vmatprep.subr.bf16.mxu0 %v6068_v12  ;;  %4869 = vmatprep.subr.bf16.mxu1 %v5964_v34 }
 0x368   :  { %1171 = vmatprep.mubr.f32.mxu0 %v5963_v0  ;;  %4143 = vmatprep.mubr.msk.f32.mxu1 %vm5965_vm2, %v5963_v0 }
 0x36a   :  { %4841 = vmatpush1.bf16.msra.mxu0 %v6078_v18  ;;  %4871 = vmatpush3.bf16.msra.mxu1 %v6115_v45 }
 0x36b   :  { %4843 = vmatprep.subr.bf16.mxu0 %v6081_v19  ;;  %4872 = vmatprep.subr.bf16.mxu1 %v5964_v34 }
 0x36e   :  { %4845 = vmatpush1.bf16.msra.mxu0 %v6089_v25  ;;  %4874 = vmatpush3.bf16.msra.mxu1 %v6132_v55 }
 0x36f   :  { %4847 = vmatprep.subr.bf16.mxu0 %v6095_v27  ;;  %4875 = vmatprep.subr.bf16.mxu1 %v5964_v34 }
 0x372   :  { %4849 = vmatpush1.bf16.msra.mxu0 %v6108_v37  ;;  %4877 = vmatpush3.bf16.msra.mxu1 %v6152_v3 }
 0x373   :  { %4851 = vmatprep.subr.bf16.mxu0 %v6111_v39  ;;  %4878 = vmatprep.subr.bf16.mxu1 %v5964_v34 }
 0x376   :  { %4853 = vmatpush1.bf16.msra.mxu0 %v6125_v49  ;;  %4880 = vmatpush3.bf16.msra.mxu1 %v6169_v14 }
 0x377   :  { %4855 = vmatprep.subr.bf16.mxu0 %v6128_v50  ;;  %4881 = vmatprep.subr.bf16.mxu1 %v5964_v34 }
 0x37a   :  { %4857 = vmatpush1.bf16.msra.mxu0 %v6142_v59  ;;  %4883 = vmatpush3.bf16.msra.mxu1 %v6181_v20 }
 0x37b   :  { %4859 = vmatprep.subr.bf16.mxu0 %v6148_v61  ;;  %4884 = vmatprep.subr.bf16.mxu1 %v5964_v34 }
 0x37e   :  { %4861 = vmatpush1.bf16.msra.mxu0 %v6159_v6  ;;  %4886 = vmatpush3.bf16.msra.mxu1 %v6189_v23 }
 0x37f   :  { %4863 = vmatprep.subr.bf16.mxu0 %v6165_v10  ;;  %4887 = vmatprep.subr.bf16.mxu1 %v5964_v34 }
 0x382   :  { %4865 = vmatpush1.bf16.msra.mxu0 %v6177_v17  ;;  %4889 = vmatpush3.bf16.msra.mxu1 %v6197_v28 }
 0x383   :  { %4891 = vmatprep.subr.bf16.mxu0 %v6063_v8  ;;  %4922 = vmatprep.subr.bf16.mxu1 %v5964_v34 }
 0x438   :  { %v1007_v44 = vpop.f32.mrb[6].mxu0  ;;  %v1078_v57 = vpop.f32.mrb[14].mxu1 }
 0x439   :  { %v5607_v62 = vadd.f32 %v6266_v4, %v1007_v44  ;;  %v1009_v38 = vpop.f32.mrb[7].mxu0  ;;  %v4110_v1 = vpop.f32.mrb[15].mxu1  ;;  %v1079_v16 = vadd.f32 %v1078_v57, %v6273_v30 }
 0x43a   :  { %v5609_v33 = vadd.f32 %v6268_v7, %v1009_v38 }
 0x43b   :  { %v3606_v2 = vmul.f32 -1.442695, %v5607_v62 }
 0x43c   :  { %v3607_v40 = vmul.f32 -1.442695, %v5609_v33 }
 0x43d   :  { %5732 = vpow2.f32 %v3606_v2 }
 0x43e   :  { %5734 = vpow2.f32 %v3607_v40 }
 0x447   :  { %v5733_v53 = vpop.eup %5732 }
 0x448   :  { %v1086_v11 = vadd.f32 1.0, %v5733_v53  ;;  %v5735_v13 = vpop.eup %5734 }
 0x449   :  { %v1093_v15 = vadd.f32 1.0, %v5735_v13 }
 0x44a   :  { %5736 = vrcp.f32 %v1086_v11 }
 0x44b   :  { %5738 = vrcp.f32 %v1093_v15 }
 0x454   :  { %v5737_v21 = vpop.eup %5736 }
 0x455   :  { %v1096_v22 = vmul.f32 %v5737_v21, %v1079_v16  ;;  %v5739_v26 = vpop.eup %5738 }
 0x456   :  { %v1099_v29 = vsub.f32 1.0, %v5739_v26  ;;  %v1101_v41 = vmul.f32 %v5739_v26, %v6364_v54 }
 0x457   :  { %v1097_v24 = vadd.f32 %v1096_v22, %v6243_v42 }
 0x459   :  { %5740 = vtanh.f32 %v1097_v24 }
 0x463   :  { %v5741_v32 = vpop.eup %5740 }
 0x464   :  { %v1100_v36 = vmul.f32 %v5741_v32, %v1099_v29 }
 0x466   :  { %v6408_v43 = vadd.f32 %v1101_v41, %v1100_v36 }
 0x468   :  { %1172 = vmatmul.mubr.f32.vlgmr.msra.gmra.mrb[8].mxu0 %v6408_v43  ;;  %4144 = vmatmul.mubr.f32.vlgmr.msra.gmra.mrb[16].mxu1 %v6408_v43 }
 0x469   :  { %4893 = vmatpush1.bf16.msra.mxu0 %v6065_v9  ;;  %4924 = vmatpush3.bf16.msra.mxu1 %v6101_v35 }
 0x46a   :  { %4895 = vmatprep.subr.bf16.mxu0 %v6068_v12  ;;  %4925 = vmatprep.subr.bf16.mxu1 %v5964_v34 }
 0x46b   :  { %1337 = vmatprep.mubr.f32.mxu0 %v5963_v0  ;;  %4178 = vmatprep.mubr.msk.f32.mxu1 %vm5965_vm2, %v5963_v0 }
 0x46d   :  { %4897 = vmatpush1.bf16.msra.mxu0 %v6078_v18  ;;  %4927 = vmatpush3.bf16.msra.mxu1 %v6115_v45 }
 0x46e   :  { %4899 = vmatprep.subr.bf16.mxu0 %v6081_v19  ;;  %4928 = vmatprep.subr.bf16.mxu1 %v5964_v34 }
 0x471   :  { %4901 = vmatpush1.bf16.msra.mxu0 %v6089_v25  ;;  %4930 = vmatpush3.bf16.msra.mxu1 %v6132_v55 }
 0x472   :  { %4903 = vmatprep.subr.bf16.mxu0 %v6095_v27  ;;  %4931 = vmatprep.subr.bf16.mxu1 %v5964_v34 }
 0x475   :  { %4905 = vmatpush1.bf16.msra.mxu0 %v6108_v37  ;;  %4933 = vmatpush3.bf16.msra.mxu1 %v6152_v3 }
 0x476   :  { %4907 = vmatprep.subr.bf16.mxu0 %v6111_v39  ;;  %4934 = vmatprep.subr.bf16.mxu1 %v5964_v34 }
 0x479   :  { %4909 = vmatpush1.bf16.msra.mxu0 %v6125_v49  ;;  %4936 = vmatpush3.bf16.msra.mxu1 %v6169_v14 }
 0x47a   :  { %4911 = vmatprep.subr.bf16.mxu0 %v6128_v50  ;;  %4937 = vmatprep.subr.bf16.mxu1 %v5964_v34 }
 0x47d   :  { %4913 = vmatpush1.bf16.msra.mxu0 %v6142_v59  ;;  %4939 = vmatpush3.bf16.msra.mxu1 %v6181_v20 }
 0x47e   :  { %4915 = vmatprep.subr.bf16.mxu0 %v6148_v61  ;;  %4940 = vmatprep.subr.bf16.mxu1 %v5964_v34 }
 0x481   :  { %4917 = vmatpush1.bf16.msra.mxu0 %v6159_v6  ;;  %4942 = vmatpush3.bf16.msra.mxu1 %v6189_v23 }
 0x482   :  { %4919 = vmatprep.subr.bf16.mxu0 %v6165_v10  ;;  %4943 = vmatprep.subr.bf16.mxu1 %v5964_v34 }
 0x485   :  { %4921 = vmatpush1.bf16.msra.mxu0 %v6177_v17  ;;  %4945 = vmatpush3.bf16.msra.mxu1 %v6197_v28 }
 0x486   :  { %4947 = vmatprep.subr.bf16.mxu0 %v6063_v8  ;;  %4978 = vmatprep.subr.bf16.mxu1 %v5964_v34 }
 0x53b   :  { %v1173_v42 = vpop.f32.mrb[8].mxu0  ;;  %v1244_v46 = vpop.f32.mrb[16].mxu1 }
 0x53c   :  { %v5611_v48 = vadd.f32 %v6266_v4, %v1173_v42  ;;  %v1175_v44 = vpop.f32.mrb[9].mxu0  ;;  %v4145_v57 = vpop.f32.mrb[17].mxu1  ;;  %v1245_v11 = vadd.f32 %v1244_v46, %v6273_v30 }
 0x53d   :  { %v5613_v38 = vadd.f32 %v6268_v7, %v1175_v44 }
 0x53e   :  { %v3608_v62 = vmul.f32 -1.442695, %v5611_v48 }
 0x53f   :  { %v3609_v1 = vmul.f32 -1.442695, %v5613_v38 }
 0x540   :  { %5742 = vpow2.f32 %v3608_v62 }
 0x541   :  { %5744 = vpow2.f32 %v3609_v1 }
 0x54a   :  { %v5743_v2 = vpop.eup %5742 }
 0x54b   :  { %v1252_v33 = vadd.f32 1.0, %v5743_v2  ;;  %v5745_v40 = vpop.eup %5744 }
 0x54c   :  { %v1259_v53 = vadd.f32 1.0, %v5745_v40 }
 0x54d   :  { %5746 = vrcp.f32 %v1252_v33 }
 0x54e   :  { %5748 = vrcp.f32 %v1259_v53 }
 0x557   :  { %v5747_v13 = vpop.eup %5746 }
 0x558   :  { %v1262_v15 = vmul.f32 %v5747_v13, %v1245_v11  ;;  %v5749_v21 = vpop.eup %5748 }
 0x559   :  { %v1265_v22 = vsub.f32 1.0, %v5749_v21  ;;  %v1267_v29 = vmul.f32 %v5749_v21, %v6408_v43 }
 0x55a   :  { %v1263_v16 = vadd.f32 %v1262_v15, %v6249_v51 }
 0x55c   :  { %5750 = vtanh.f32 %v1263_v16 }
 0x566   :  { %v5751_v24 = vpop.eup %5750 }
 0x567   :  { %v1266_v26 = vmul.f32 %v5751_v24, %v1265_v22  ;;  %v1776_v24 = vld [vmem:[#allocation4] sm:$0xff] }
 0x569   :  { %v6452_v32 = vadd.f32 %v1267_v29, %v1266_v26  ;;  %v1779_v26 = vld [vmem:[#allocation4 + $0x18] sm:$0xff] }
 0x56b   :  { %1338 = vmatmul.mubr.f32.vlgmr.msra.gmra.mrb[10].mxu0 %v6452_v32  ;;  %4179 = vmatmul.mubr.f32.vlgmr.msra.gmra.mrb[18].mxu1 %v6452_v32 }
 0x56c   :  { %4949 = vmatpush1.bf16.msra.mxu0 %v6065_v9  ;;  %4980 = vmatpush3.bf16.msra.mxu1 %v6101_v35 }
 0x56d   :  { %4951 = vmatprep.subr.bf16.mxu0 %v6068_v12  ;;  %4981 = vmatprep.subr.bf16.mxu1 %v5964_v34 }
 0x56e   :  { %1503 = vmatprep.mubr.f32.mxu0 %v5963_v0  ;;  %4213 = vmatprep.mubr.msk.f32.mxu1 %vm5965_vm2, %v5963_v0 }
 0x570   :  { %4953 = vmatpush1.bf16.msra.mxu0 %v6078_v18  ;;  %4983 = vmatpush3.bf16.msra.mxu1 %v6115_v45 }
 0x571   :  { %4955 = vmatprep.subr.bf16.mxu0 %v6081_v19  ;;  %4984 = vmatprep.subr.bf16.mxu1 %v5964_v34 }
 0x574   :  { %4957 = vmatpush1.bf16.msra.mxu0 %v6089_v25  ;;  %4986 = vmatpush3.bf16.msra.mxu1 %v6132_v55 }
 0x575   :  { %4959 = vmatprep.subr.bf16.mxu0 %v6095_v27  ;;  %4987 = vmatprep.subr.bf16.mxu1 %v5964_v34 }
 0x578   :  { %4961 = vmatpush1.bf16.msra.mxu0 %v6108_v37  ;;  %4989 = vmatpush3.bf16.msra.mxu1 %v6152_v3 }
 0x579   :  { %4963 = vmatprep.subr.bf16.mxu0 %v6111_v39  ;;  %4990 = vmatprep.subr.bf16.mxu1 %v5964_v34 }
 0x57c   :  { %4965 = vmatpush1.bf16.msra.mxu0 %v6125_v49  ;;  %4992 = vmatpush3.bf16.msra.mxu1 %v6169_v14 }
 0x57d   :  { %4967 = vmatprep.subr.bf16.mxu0 %v6128_v50  ;;  %4993 = vmatprep.subr.bf16.mxu1 %v5964_v34 }
 0x580   :  { %4969 = vmatpush1.bf16.msra.mxu0 %v6142_v59  ;;  %4995 = vmatpush3.bf16.msra.mxu1 %v6181_v20 }
 0x581   :  { %4971 = vmatprep.subr.bf16.mxu0 %v6148_v61  ;;  %4996 = vmatprep.subr.bf16.mxu1 %v5964_v34 }
 0x584   :  { %4973 = vmatpush1.bf16.msra.mxu0 %v6159_v6  ;;  %4998 = vmatpush3.bf16.msra.mxu1 %v6189_v23 }
 0x585   :  { %4975 = vmatprep.subr.bf16.mxu0 %v6165_v10  ;;  %4999 = vmatprep.subr.bf16.mxu1 %v5964_v34 }
 0x588   :  { %4977 = vmatpush1.bf16.msra.mxu0 %v6177_v17  ;;  %5001 = vmatpush3.bf16.msra.mxu1 %v6197_v28 }
 0x589   :  { %5003 = vmatprep.subr.bf16.mxu0 %v6063_v8  ;;  %5034 = vmatprep.subr.bf16.mxu1 %v5964_v34 }
 0x63e   :  { %v1339_v51 = vpop.f32.mrb[10].mxu0  ;;  %v1410_v36 = vpop.f32.mrb[18].mxu1 }
 0x63f   :  { %v5615_v41 = vadd.f32 %v6266_v4, %v1339_v51  ;;  %v1341_v42 = vpop.f32.mrb[11].mxu0  ;;  %v4180_v46 = vpop.f32.mrb[19].mxu1  ;;  %v1411_v8 = vadd.f32 %v1410_v36, %v6273_v30  ;;  %v1783_v51 = vld [vmem:[#allocation4 + $0x38] sm:$0xff]  ;;  %v1786_v36 = vld [vmem:[#allocation4 + $0x50] sm:$0xff] }
 0x640   :  { %v5617_v44 = vadd.f32 %v6268_v7, %v1341_v42  ;;  %v1784_v46 = vld [vmem:[#allocation4 + $0x40] sm:$0xff] }
 0x641   :  { %v3610_v48 = vmul.f32 -1.442695, %v5615_v41 }
 0x642   :  { %v3611_v57 = vmul.f32 -1.442695, %v5617_v44  ;;  %v5060_v44 = vpack.c.bf16 %v1779_v26, %v1776_v24  ;;  %v1806_v24 = vld [vmem:[#allocation4 + $0xf0] sm:$0xff]  ;;  %v1809_v26 = vld [vmem:[#allocation4 + $0x108] sm:$0xff] }
 0x643   :  { %5752 = vpow2.f32 %v3610_v48  ;;  %v1787_v48 = vld [vmem:[#allocation4 + $0x58] sm:$0xff] }
 0x644   :  { %5754 = vpow2.f32 %v3611_v57 }
 0x64d   :  { %v5753_v62 = vpop.eup %5752 }
 0x64e   :  { %v1418_v38 = vadd.f32 1.0, %v5753_v62  ;;  %v5755_v1 = vpop.eup %5754  ;;  %v5062_v62 = vpack.c.bf16 %v1786_v36, %v1783_v51  ;;  %v1816_v51 = vld [vmem:[#allocation4 + $0x140] sm:$0xff]  ;;  %v1814_v36 = vld [vmem:[#allocation4 + $0x130] sm:$0xff] }
 0x64f   :  { %v1425_v2 = vadd.f32 1.0, %v5755_v1  ;;  %v1785_v1 = vld [vmem:[#allocation4 + $0x48] sm:$0xff] }
 0x650   :  { %5756 = vrcp.f32 %v1418_v38  ;;  %v1782_v38 = vld [vmem:[#allocation4 + $0x30] sm:$0xff] }
 0x651   :  { %5758 = vrcp.f32 %v1425_v2  ;;  %v5094_v2 = vpack.c.bf16 %v1787_v48, %v1784_v46 }
 0x65a   :  { %v5757_v33 = vpop.eup %5756 }
 0x65b   :  { %v1428_v40 = vmul.f32 %v5757_v33, %v1411_v8  ;;  %v5759_v11 = vpop.eup %5758  ;;  %v1792_v8 = vld [vmem:[#allocation4 + $0x80] sm:$0xff]  ;;  %v1790_v33 = vld [vmem:[#allocation4 + $0x70] sm:$0xff] }
 0x65c   :  { %v1431_v13 = vsub.f32 1.0, %v5759_v11  ;;  %v1433_v21 = vmul.f32 %v5759_v11, %v6452_v32 }
 0x65d   :  { %v1429_v53 = vadd.f32 %v1428_v40, %v6247_v47  ;;  %v1793_v40 = vld [vmem:[#allocation4 + $0x88] sm:$0xff] }
 0x65f   :  { %5760 = vtanh.f32 %v1429_v53  ;;  %v5064_v53 = vpack.c.bf16 %v1785_v1, %v1782_v38  ;;  %v1819_v38 = vld [vmem:[#allocation4 + $0x158] sm:$0xff]  ;;  %v1822_v1 = vld [vmem:[#allocation4 + $0x170] sm:$0xff] }
 0x669   :  { %v5761_v15 = vpop.eup %5760 }
 0x66a   :  { %v1432_v16 = vmul.f32 %v5761_v15, %v1431_v13  ;;  %v5098_v13 = vpack.c.bf16 %v1793_v40, %v1790_v33  ;;  %v1788_v15 = vld [vmem:[#allocation4 + $0x60] sm:$0xff]  ;;  %v5086_v33 = vpack.c.bf16 %v1822_v1, %v1819_v38  ;;  %v2128_v1 = vld [vmem:[#allocation7 + $0x2d8] sm:$0xff] }
 0x66c   :  { %v6496_v22 = vadd.f32 %v1433_v21, %v1432_v16  ;;  %v1791_v16 = vld [vmem:[#allocation4 + $0x78] sm:$0xff] }
 0x66d   :  { %v1795_v21 = vld [vmem:[#allocation4 + $0x98] sm:$0xff] }
 0x66e   :  { %1504 = vmatmul.mubr.f32.vlgmr.msra.gmra.mrb[12].mxu0 %v6496_v22  ;;  %4214 = vmatmul.mubr.f32.vlgmr.msra.gmra.mrb[20].mxu1 %v6496_v22 }
 0x66f   :  { %5005 = vmatpush1.bf16.msra.mxu0 %v6065_v9  ;;  %5036 = vmatpush3.bf16.msra.mxu1 %v6101_v35  ;;  %v1777_v9 = vld [vmem:[#allocation4 + $0x8] sm:$0xff] }
 0x670   :  { %5007 = vmatprep.subr.bf16.mxu0 %v6068_v12  ;;  %5037 = vmatprep.subr.bf16.mxu1 %v5964_v34  ;;  %v1780_v12 = vld [vmem:[#allocation4 + $0x20] sm:$0xff] }
 0x671   :  { %1669 = vmatprep.mubr.f32.mxu0 %v5963_v0  ;;  %4248 = vmatprep.mubr.msk.f32.mxu1 %vm5965_vm2, %v5963_v0 }
 0x673   :  { %5009 = vmatpush1.bf16.msra.mxu0 %v6078_v18  ;;  %5039 = vmatpush3.bf16.msra.mxu1 %v6115_v45  ;;  %v1778_v18 = vld [vmem:[#allocation4 + $0x10] sm:$0xff] }
 0x674   :  { %5011 = vmatprep.subr.bf16.mxu0 %v6081_v19  ;;  %5040 = vmatprep.subr.bf16.mxu1 %v5964_v34  ;;  %v5058_v19 = vpack.c.bf16 %v1780_v12, %v1777_v9  ;;  %v1798_v9 = vld [vmem:[#allocation4 + $0xb0] sm:$0xff]  ;;  %v1796_v12 = vld [vmem:[#allocation4 + $0xa0] sm:$0xff] }
 0x677   :  { %5013 = vmatpush1.bf16.msra.mxu0 %v6089_v25  ;;  %5042 = vmatpush3.bf16.msra.mxu1 %v6132_v55  ;;  %v1781_v25 = vld [vmem:[#allocation4 + $0x28] sm:$0xff] }
 0x678   :  { %5015 = vmatprep.subr.bf16.mxu0 %v6095_v27  ;;  %5043 = vmatprep.subr.bf16.mxu1 %v5964_v34  ;;  %v5090_v27 = vpack.c.bf16 %v1781_v25, %v1778_v18  ;;  %v1799_v18 = vld [vmem:[#allocation4 + $0xb8] sm:$0xff]  ;;  %v5070_v25 = vpack.c.bf16 %v1798_v9, %v1795_v21  ;;  %v2091_v9 = vld [vmem:[#allocation7 + $0x1b0] sm:$0xff] }
 0x67b   :  { %5017 = vmatpush1.bf16.msra.mxu0 %v6108_v37  ;;  %5045 = vmatpush3.bf16.msra.mxu1 %v6152_v3 }
 0x67c   :  { %5019 = vmatprep.subr.bf16.mxu0 %v6111_v39  ;;  %5046 = vmatprep.subr.bf16.mxu1 %v5964_v34 }
 0x67f   :  { %5021 = vmatpush1.bf16.msra.mxu0 %v6125_v49  ;;  %5048 = vmatpush3.bf16.msra.mxu1 %v6169_v14 }
 0x680   :  { %5023 = vmatprep.subr.bf16.mxu0 %v6128_v50  ;;  %5049 = vmatprep.subr.bf16.mxu1 %v5964_v34 }
 0x683   :  { %5025 = vmatpush1.bf16.msra.mxu0 %v6142_v59  ;;  %5051 = vmatpush3.bf16.msra.mxu1 %v6181_v20 }
 0x684   :  { %5027 = vmatprep.subr.bf16.mxu0 %v6148_v61  ;;  %5052 = vmatprep.subr.bf16.mxu1 %v5964_v34 }
 0x687   :  { %5029 = vmatpush1.bf16.msra.mxu0 %v6159_v6  ;;  %5054 = vmatpush3.bf16.msra.mxu1 %v6189_v23 }
 0x688   :  { %5031 = vmatprep.subr.bf16.mxu0 %v6165_v10  ;;  %5055 = vmatprep.subr.bf16.mxu1 %v5964_v34 }
 0x68b   :  { %5033 = vmatpush1.bf16.msra.mxu0 %v6177_v17  ;;  %5057 = vmatpush3.bf16.msra.mxu1 %v6197_v28 }
 0x68c   :  { %5059 = vmatprep.subr.bf16.mxu0 %v5058_v19  ;;  %5091 = vmatprep.subr.bf16.mxu1 %v5090_v27  ;;  %v5068_v19 = vpack.c.bf16 %v1791_v16, %v1788_v15  ;;  %v2085_v15 = vld [vmem:[#allocation7 + $0x180] sm:$0xff] }
 0x741   :  { %v1505_v35 = vpop.f32.mrb[12].mxu0  ;;  %v1576_v37 = vpop.f32.mrb[20].mxu1 }
 0x742   :  { %v5619_v39 = vadd.f32 %v6266_v4, %v1505_v35  ;;  %v1507_v45 = vpop.f32.mrb[13].mxu0  ;;  %v4215_v49 = vpop.f32.mrb[21].mxu1  ;;  %v1577_v14 = vadd.f32 %v1576_v37, %v6273_v30  ;;  %v1794_v35 = vld [vmem:[#allocation4 + $0x90] sm:$0xff]  ;;  %v1797_v37 = vld [vmem:[#allocation4 + $0xa8] sm:$0xff] }
 0x743   :  { %v5621_v55 = vadd.f32 %v6268_v7, %v1507_v45  ;;  %v1804_v45 = vld [vmem:[#allocation4 + $0xe0] sm:$0xff]  ;;  %v1802_v49 = vld [vmem:[#allocation4 + $0xd0] sm:$0xff] }
 0x744   :  { %v3612_v50 = vmul.f32 -1.442695, %v5619_v39  ;;  %v1801_v39 = vld [vmem:[#allocation4 + $0xc8] sm:$0xff] }
 0x745   :  { %v3613_v59 = vmul.f32 -1.442695, %v5621_v55  ;;  %v5072_v55 = vpack.c.bf16 %v1797_v37, %v1794_v35  ;;  %v2097_v35 = vld [vmem:[#allocation7 + $0x1e0] sm:$0xff]  ;;  %v2100_v37 = vld [vmem:[#allocation7 + $0x1f8] sm:$0xff] }
 0x746   :  { %5762 = vpow2.f32 %v3612_v50  ;;  %v1805_v50 = vld [vmem:[#allocation4 + $0xe8] sm:$0xff] }
 0x747   :  { %5764 = vpow2.f32 %v3613_v59  ;;  %v5074_v59 = vpack.c.bf16 %v1804_v45, %v1801_v39  ;;  %v6579_v39 = vpack.c.bf16 %v2100_v37, %v2097_v35  ;;  %v2104_v45 = vld [vmem:[#allocation7 + $0x218] sm:$0xff] }
 0x748   :  { %v2120_v35 = vld [vmem:[#allocation7 + $0x298] sm:$0xff] }
 0x750   :  { %v5763_v61 = vpop.eup %5762 }
 0x751   :  { %v1584_v3 = vadd.f32 1.0, %v5763_v61  ;;  %v5765_v6 = vpop.eup %5764  ;;  %v5106_v61 = vpack.c.bf16 %v1805_v50, %v1802_v49  ;;  %v2107_v49 = vld [vmem:[#allocation7 + $0x230] sm:$0xff] }
 0x752   :  { %v1591_v10 = vadd.f32 1.0, %v5765_v6  ;;  %v1803_v6 = vld [vmem:[#allocation4 + $0xd8] sm:$0xff]  ;;  %v6583_v50 = vpack.c.bf16 %v2107_v49, %v2104_v45  ;;  %v2123_v45 = vld [vmem:[#allocation7 + $0x2b0] sm:$0xff]  ;;  %v2126_v49 = vld [vmem:[#allocation7 + $0x2c8] sm:$0xff] }
 0x753   :  { %5766 = vrcp.f32 %v1584_v3  ;;  %v1800_v3 = vld [vmem:[#allocation4 + $0xc0] sm:$0xff] }
 0x754   :  { %5768 = vrcp.f32 %v1591_v10  ;;  %v1807_v10 = vld [vmem:[#allocation4 + $0xf8] sm:$0xff] }
 0x75d   :  { %v5767_v17 = vpop.eup %5766 }
 0x75e   :  { %v1594_v20 = vmul.f32 %v5767_v17, %v1577_v14  ;;  %v5769_v28 = vpop.eup %5768  ;;  %v1810_v14 = vld [vmem:[#allocation4 + $0x110] sm:$0xff]  ;;  %v1808_v17 = vld [vmem:[#allocation4 + $0x100] sm:$0xff] }
 0x75f   :  { %v1597_v47 = vsub.f32 1.0, %v5769_v28  ;;  %v1599_v42 = vmul.f32 %v5769_v28, %v6496_v22  ;;  %v5078_v28 = vpack.c.bf16 %v1810_v14, %v1807_v10  ;;  %v2109_v14 = vld [vmem:[#allocation7 + $0x240] sm:$0xff] }
 0x760   :  { %v1595_v23 = vadd.f32 %v1594_v20, %v6260_v60  ;;  %v1789_v60 = vld [vmem:[#allocation4 + $0x68] sm:$0xff]  ;;  %v1811_v20 = vld [vmem:[#allocation4 + $0x118] sm:$0xff] }
 0x761   :  { %v5066_v11 = vpack.c.bf16 %v1792_v8, %v1789_v60  ;;  %v1820_v60 = vld [vmem:[#allocation4 + $0x160] sm:$0xff] }
 0x762   :  { %5770 = vtanh.f32 %v1595_v23  ;;  %v5076_v23 = vpack.c.bf16 %v1803_v6, %v1800_v3  ;;  %v2110_v3 = vld [vmem:[#allocation7 + $0x248] sm:$0xff]  ;;  %v2113_v6 = vld [vmem:[#allocation7 + $0x260] sm:$0xff] }
 0x763   :  { %v6589_v10 = vpack.c.bf16 %v2113_v6, %v2110_v3  ;;  %v2132_v3 = vld [vmem:[#allocation7 + $0x2f8] sm:$0xff] }
 0x76c   :  { %v5771_v29 = vpop.eup %5770 }
 0x76d   :  { %v1598_v41 = vmul.f32 %v5771_v29, %v1597_v47  ;;  %v5110_v47 = vpack.c.bf16 %v1811_v20, %v1808_v17  ;;  %v1813_v29 = vld [vmem:[#allocation4 + $0x128] sm:$0xff]  ;;  %v2112_v17 = vld [vmem:[#allocation7 + $0x258] sm:$0xff] }
 0x76e   :  { %v5082_v46 = vpack.c.bf16 %v1816_v51, %v1813_v29  ;;  %v6591_v20 = vpack.c.bf16 %v2112_v17, %v2109_v14  ;;  %v2122_v51 = vld [vmem:[#allocation7 + $0x2a8] sm:$0xff] }
 0x76f   :  { %v6538_v57 = vadd.f32 %v1599_v42, %v1598_v41  ;;  %v1817_v41 = vld [vmem:[#allocation4 + $0x148] sm:$0xff]  ;;  %v5080_v42 = vpack.c.bf16 %v1809_v26, %v1806_v24  ;;  %v2115_v24 = vld [vmem:[#allocation7 + $0x270] sm:$0xff] }
 0x770   :  { %v5114_v48 = vpack.c.bf16 %v1817_v41, %v1814_v36  ;;  %v2118_v26 = vld [vmem:[#allocation7 + $0x288] sm:$0xff]  ;;  %v2125_v36 = vld [vmem:[#allocation7 + $0x2c0] sm:$0xff] }
 0x771   :  { %1670 = vmatmul.mubr.f32.vlgmr.msra.gmra.mrb[14].mxu0 %v6538_v57  ;;  %4249 = vmatmul.mubr.f32.vlgmr.msra.gmra.mrb[22].mxu1 %v6538_v57  ;;  %v6597_v29 = vpack.c.bf16 %v2118_v26, %v2115_v24  ;;  %v2121_v41 = vld [vmem:[#allocation7 + $0x2a0] sm:$0xff] }
 0x772   :  { %5061 = vmatpush1.bf16.msra.mxu0 %v5060_v44  ;;  %5093 = vmatpush3.bf16.msra.mxu1 %v5090_v27  ;;  %v5102_v27 = vpack.c.bf16 %v1799_v18, %v1796_v12  ;;  %v1812_v44 = vld [vmem:[#allocation4 + $0x120] sm:$0xff]  ;;  %v2094_v12 = vld [vmem:[#allocation7 + $0x1c8] sm:$0xff] }
 0x773   :  { %4283 = vmatprep.mubr.f32.mxu1 %v6276_v5  ;;  %5063 = vmatprep.subr.bf16.mxu0 %v5062_v62  ;;  %v1815_v62 = vld [vmem:[#allocation4 + $0x138] sm:$0xff]  ;;  %v6573_v18 = vpack.c.bf16 %v2094_v12, %v2091_v9  ;;  %v2111_v9 = vld [vmem:[#allocation7 + $0x250] sm:$0xff]  ;;  %v2114_v12 = vld [vmem:[#allocation7 + $0x268] sm:$0xff] }
 0x774   :  { %5095 = vmatprep.subr.bf16.mxu1 %v5094_v2  ;;  %1906 = vmatprep.mubr.f32.mxu0 %v5963_v0  ;;  %v5084_v8 = vpack.c.bf16 %v1815_v62, %v1812_v44  ;;  %v2090_v44 = vld [vmem:[#allocation7 + $0x1a8] sm:$0xff] }
 0x776   :  { %5065 = vmatpush1.bf16.msra.mxu0 %v5064_v53  ;;  %5097 = vmatpush3.bf16.msra.mxu1 %v5094_v2  ;;  %v1823_v2 = vld [vmem:[#allocation4 + $0x178] sm:$0xff]  ;;  %v1818_v53 = vld [vmem:[#allocation4 + $0x150] sm:$0xff] }
 0x777   :  { %5067 = vmatprep.subr.bf16.mxu0 %v5066_v11  ;;  %5099 = vmatprep.subr.bf16.mxu1 %v5098_v13  ;;  %v5118_v40 = vpack.c.bf16 %v1823_v2, %v1820_v60  ;;  %v1821_v11 = vld [vmem:[#allocation4 + $0x168] sm:$0xff]  ;;  %v2131_v60 = vld [vmem:[#allocation7 + $0x2f0] sm:$0xff] }
 0x778   :  { %v6610_v2 = vpack.c.bf16 %v2131_v60, %v2128_v1 }
 0x77a   :  { %5069 = vmatpush1.bf16.msra.mxu0 %v5068_v19  ;;  %5101 = vmatpush3.bf16.msra.mxu1 %v5098_v13  ;;  %v5088_v13 = vpack.c.bf16 %v1821_v11, %v1818_v53  ;;  %v2098_v19 = vld [vmem:[#allocation7 + $0x1e8] sm:$0xff]  ;;  %v2093_v53 = vld [vmem:[#allocation7 + $0x1c0] sm:$0xff]  ;;  %v2096_v11 = vld [vmem:[#allocation7 + $0x1d8] sm:$0xff] }
 0x77b   :  { %5071 = vmatprep.subr.bf16.mxu0 %v5070_v25  ;;  %5103 = vmatprep.subr.bf16.mxu1 %v5102_v27  ;;  %v2101_v25 = vld [vmem:[#allocation7 + $0x200] sm:$0xff] }
 0x77e   :  { %5073 = vmatpush1.bf16.msra.mxu0 %v5072_v55  ;;  %5105 = vmatpush3.bf16.msra.mxu1 %v5102_v27  ;;  %v6577_v27 = vpack.c.bf16 %v2101_v25, %v2098_v19  ;;  %v2103_v55 = vld [vmem:[#allocation7 + $0x210] sm:$0xff]  ;;  %v6629_v19 = vpack.c.bf16 %v2114_v12, %v2111_v9  ;;  %v2117_v25 = vld [vmem:[#allocation7 + $0x280] sm:$0xff] }
 0x77f   :  { %5075 = vmatprep.subr.bf16.mxu0 %v5074_v59  ;;  %5107 = vmatprep.subr.bf16.mxu1 %v5106_v61  ;;  %v2106_v59 = vld [vmem:[#allocation7 + $0x228] sm:$0xff]  ;;  %v6633_v37 = vpack.c.bf16 %v2120_v35, %v2117_v25  ;;  %v3616_v25 = vld [vmem:[%s7034_s4 + $0x3] sm:$0x7] }
 0x780   :  { %v1830_v35 = vrot.slane %v3616_v25, %v6251_v52 }
 0x782   :  { %5077 = vmatpush1.bf16.msra.mxu0 %v5076_v23  ;;  %5109 = vmatpush3.bf16.msra.mxu1 %v5106_v61  ;;  %v6585_v61 = vpack.c.bf16 %v2106_v59, %v2103_v55  ;;  %v2116_v23 = vld [vmem:[#allocation7 + $0x278] sm:$0xff]  ;;  %v6637_v55 = vpack.c.bf16 %v2126_v49, %v2123_v45  ;;  %v2129_v59 = vld [vmem:[#allocation7 + $0x2e0] sm:$0xff] }
 0x783   :  { %5079 = vmatprep.subr.bf16.mxu0 %v5078_v28  ;;  %5111 = vmatprep.subr.bf16.mxu1 %v5110_v47  ;;  %v2119_v28 = vld [vmem:[#allocation7 + $0x290] sm:$0xff]  ;;  %v6641_v6 = vpack.c.bf16 %v2132_v3, %v2129_v59  ;;  %v1834_v59 = vrot.slane %v3616_v25, %v6258_v58 }
 0x786   :  { %5081 = vmatpush1.bf16.msra.mxu0 %v5080_v42  ;;  %5113 = vmatpush3.bf16.msra.mxu1 %v5110_v47  ;;  %v6595_v47 = vpack.c.bf16 %v2119_v28, %v2116_v23  ;;  %v6601_v42 = vpack.c.bf16 %v2125_v36, %v2122_v51 }
 0x787   :  { %5083 = vmatprep.subr.bf16.mxu0 %v5082_v46  ;;  %5115 = vmatprep.subr.bf16.mxu1 %v5114_v48  ;;  %v2124_v46 = vld [vmem:[#allocation7 + $0x2b8] sm:$0xff] }
 0x788   :  { %v6603_v62 = vpack.c.bf16 %v2124_v46, %v2121_v41 }
 0x78a   :  { %5085 = vmatpush1.bf16.msra.mxu0 %v5084_v8  ;;  %5117 = vmatpush3.bf16.msra.mxu1 %v5114_v48  ;;  %v2087_v48 = vld [vmem:[#allocation7 + $0x190] sm:$0xff] }
 0x78b   :  { %5087 = vmatprep.subr.bf16.mxu0 %v5086_v33  ;;  %5119 = vmatprep.subr.bf16.mxu1 %v5118_v40  ;;  %v6605_v38 = vpack.c.bf16 %v2090_v44, %v2087_v48  ;;  %v2127_v8 = vld [vmem:[#allocation7 + $0x2d0] sm:$0xff]  ;;  %v2130_v33 = vld [vmem:[#allocation7 + $0x2e8] sm:$0xff] }
 0x78e   :  { %5089 = vmatpush1.bf16.msra.mxu0 %v5088_v13  ;;  %5121 = vmatpush3.bf16.msra.mxu1 %v5118_v40  ;;  %v6613_v40 = vpack.c.bf16 %v2130_v33, %v2127_v8  ;;  %v6616_v13 = vpack.c.bf16 %v2096_v11, %v2093_v53 }
 0x78f   :  { %5154 = vmatprep.subr.bf16.mxu1 %v5964_v34 }
 0x791   :  { %1907 = vmatmul.mubr.f32.vlgmr.msra.gmra.mrb[16].mxu0 %v6276_v5  ;;  %4284 = vmatmul.mubr.f32.vlgmr.msra.gmra.mrb[24].mxu1 %v6320_v63  ;;  %v2086_v5 = vld [vmem:[#allocation7 + $0x188] sm:$0xff] }
 0x792   :  { %4286 = vmatprep.mubr.f32.mxu1 %v6364_v54  ;;  %1912 = vmatprep.mubr.f32.mxu0 %v5963_v0 }
 0x793   :  { %5156 = vmatpush3.bf16.msra.mxu1 %v6605_v38 }
 0x794   :  { %5157 = vmatprep.subr.bf16.mxu1 %v5964_v34 }
 0x795   :  { %1913 = vmatmul.mubr.f32.gmra.mrb[18].mxu0 %v6320_v63  ;;  %4287 = vmatmul.mubr.f32.gmra.mrb[26].mxu1 %v6408_v43  ;;  %v2089_v63 = vld [vmem:[#allocation7 + $0x1a0] sm:$0xff] }
 0x796   :  { %4289 = vmatprep.mubr.f32.mxu1 %v6452_v32  ;;  %1918 = vmatprep.mubr.f32.mxu0 %v5963_v0 }
 0x797   :  { %5159 = vmatpush3.bf16.msra.mxu1 %v6616_v13 }
 0x798   :  { %5160 = vmatprep.subr.bf16.mxu1 %v5964_v34 }
 0x799   :  { %1919 = vmatmul.mubr.f32.gmra.mrb[20].mxu0 %v6364_v54  ;;  %4290 = vmatmul.mubr.f32.gmra.mrb[28].mxu1 %v6496_v22  ;;  %v6565_v54 = vpack.c.bf16 %v2089_v63, %v2086_v5  ;;  %v2099_v5 = vld [vmem:[#allocation7 + $0x1f0] sm:$0xff]  ;;  %v2102_v63 = vld [vmem:[#allocation7 + $0x208] sm:$0xff] }
 0x79a   :  { %4292 = vmatprep.mubr.f32.mxu1 %v6538_v57  ;;  %1924 = vmatprep.mubr.f32.mxu0 %v5963_v0 }
 0x79b   :  { %5123 = vmatprep.subr.bf16.mxu0 %v6565_v54 }
 0x79d   :  { %1925 = vmatmul.mubr.f32.gmra.mrb[22].mxu0 %v6408_v43  ;;  %v2088_v43 = vld [vmem:[#allocation7 + $0x198] sm:$0xff] }
 0x79e   :  { %1930 = vmatprep.mubr.f32.mxu0 %v5963_v0  ;;  %v6567_v16 = vpack.c.bf16 %v2088_v43, %v2085_v15  ;;  %v2105_v15 = vld [vmem:[#allocation7 + $0x220] sm:$0xff]  ;;  %v6622_v43 = vpack.c.bf16 %v2102_v63, %v2099_v5 }
 0x7a0   :  { %5125 = vmatpush1.bf16.msra.mxu0 %v6567_v16  ;;  %5162 = vmatpush3.bf16.msra.mxu1 %v6622_v43 }
 0x7a1   :  { %1931 = vmatmul.mubr.f32.gmra.mrb[24].mxu0 %v6452_v32  ;;  %v2092_v32 = vld [vmem:[#allocation7 + $0x1b8] sm:$0xff]  ;;  %5163 = vmatprep.subr.bf16.mxu1 %v5964_v34 }
 0x7a2   :  { %1936 = vmatprep.mubr.f32.mxu0 %v5963_v0 }
 0x7a5   :  { %1937 = vmatmul.mubr.f32.gmra.mrb[26].mxu0 %v6496_v22  ;;  %v2095_v22 = vld [vmem:[#allocation7 + $0x1d0] sm:$0xff] }
 0x7a6   :  { %1942 = vmatprep.mubr.f32.mxu0 %v5963_v0  ;;  %v6571_v21 = vpack.c.bf16 %v2095_v22, %v2092_v32  ;;  %v2108_v32 = vld [vmem:[#allocation7 + $0x238] sm:$0xff] }
 0x7a7   :  { %v6625_v22 = vpack.c.bf16 %v2108_v32, %v2105_v15 }
 0x7a8   :  { %5127 = vmatprep.subr.bf16.mxu0 %v6571_v21 }
 0x7a9   :  { %1943 = vmatmul.mubr.f32.gmra.mrb[28].mxu0 %v6538_v57  ;;  %5165 = vmatpush3.bf16.msra.mxu1 %v6625_v22 }
 0x7aa   :  { %1948 = vmatprep.mubr.f32.mxu0 %v5963_v0  ;;  %5129 = vmatpush1.bf16.msra.mxu0 %v6573_v18 }
 0x7ab   :  { %5131 = vmatprep.subr.bf16.mxu0 %v6577_v27  ;;  %5166 = vmatprep.subr.bf16.mxu1 %v5964_v34 }
 0x7ad   :  { %5168 = vmatpush3.bf16.msra.mxu1 %v6629_v19 }
 0x7ae   :  { %5133 = vmatpush1.bf16.msra.mxu0 %v6579_v39  ;;  %5169 = vmatprep.subr.bf16.mxu1 %v5964_v34 }
 0x7af   :  { %5135 = vmatprep.subr.bf16.mxu0 %v6583_v50 }
 0x7b1   :  { %5171 = vmatpush3.bf16.msra.mxu1 %v6633_v37 }
 0x7b2   :  { %5137 = vmatpush1.bf16.msra.mxu0 %v6585_v61  ;;  %5172 = vmatprep.subr.bf16.mxu1 %v5964_v34 }
 0x7b3   :  { %5139 = vmatprep.subr.bf16.mxu0 %v6589_v10 }
 0x7b5   :  { %5174 = vmatpush3.bf16.msra.mxu1 %v6637_v55 }
 0x7b6   :  { %5141 = vmatpush1.bf16.msra.mxu0 %v6591_v20  ;;  %5175 = vmatprep.subr.bf16.mxu1 %v5964_v34 }
 0x7b7   :  { %5143 = vmatprep.subr.bf16.mxu0 %v6595_v47 }
 0x7b9   :  { %5177 = vmatpush3.bf16.msra.mxu1 %v6641_v6 }
 0x7ba   :  { %5145 = vmatpush1.bf16.msra.mxu0 %v6597_v29  ;;  %5210 = vmatprep.subr.bf16.mxu1 %v5964_v34 }
 0x7bb   :  { %5147 = vmatprep.subr.bf16.mxu0 %v6601_v42 }
 0x7be   :  { %5149 = vmatpush1.bf16.msra.mxu0 %v6603_v62 }
 0x7bf   :  { %5151 = vmatprep.subr.bf16.mxu0 %v6610_v2 }
 0x7c2   :  { %5153 = vmatpush1.bf16.msra.mxu0 %v6613_v40 }
 0x7c3   :  { %5179 = vmatprep.subr.bf16.mxu0 %v6565_v54 }
 0x844   :  { %v1671_v14 = vpop.f32.mrb[14].mxu0  ;;  %v1742_v17 = vpop.f32.mrb[22].mxu1 }
 0x845   :  { %v5623_v23 = vadd.f32 %v6266_v4, %v1671_v14  ;;  %v1673_v28 = vpop.f32.mrb[15].mxu0  ;;  %v4250_v24 = vpop.f32.mrb[23].mxu1  ;;  %v1743_v1 = vadd.f32 %v1742_v17, %v6273_v30 }
 0x846   :  { %v5625_v51 = vadd.f32 %v6268_v7, %v1673_v28 }
 0x847   :  { %v3614_v26 = vmul.f32 -1.442695, %v5623_v23 }
 0x848   :  { %v3615_v36 = vmul.f32 -1.442695, %v5625_v51 }
 0x849   :  { %5772 = vpow2.f32 %v3614_v26 }
 0x84a   :  { %5774 = vpow2.f32 %v3615_v36 }
 0x853   :  { %v5773_v41 = vpop.eup %5772 }
 0x854   :  { %v1750_v46 = vadd.f32 1.0, %v5773_v41  ;;  %v5775_v48 = vpop.eup %5774 }
 0x855   :  { %v1757_v44 = vadd.f32 1.0, %v5775_v48 }
 0x856   :  { %5776 = vrcp.f32 %v1750_v46 }
 0x857   :  { %5778 = vrcp.f32 %v1757_v44 }
 0x860   :  { %v5777_v60 = vpop.eup %5776 }
 0x861   :  { %v1760_v8 = vmul.f32 %v5777_v60, %v1743_v1  ;;  %v5779_v5 = vpop.eup %5778  ;;  %v6727_v60 = vrot.slane %v3616_v25, %v6235_v31 }
 0x862   :  { %v1763_v30 = vsub.f32 1.0, %v5779_v5  ;;  %v1765_v12 = vmul.f32 %v5779_v5, %v6538_v57  ;;  %v3617_v57 = vld [vmem:[%s7035_s5 + $0x3] sm:$0x7] }
 0x863   :  { %v1761_v4 = vadd.f32 %v1760_v8, %v6256_v56  ;;  %v2142_v45 = vrot.slane %v3617_v57, %v6251_v52  ;;  %v2146_v3 = vrot.slane %v3617_v57, %v6258_v58  ;;  %v6724_v44 = vrot.slane %v3617_v57, %v6235_v31 }
 0x864   :  { %v6650_v33 = vpop.f32.mrb[24].mxu1 }
 0x865   :  { %5780 = vtanh.f32 %v1761_v4  ;;  %v6652_v53 = vpop.f32.mrb[25].mxu1  ;;  %v6717_v17 = vadd.f32 %v2142_v45, %v1830_v35  ;;  %v6719_v28 = vadd.f32 %v2146_v3, %v1834_v59 }
 0x868   :  { %v6654_v7 = vpop.f32.mrb[26].mxu1 }
 0x869   :  { %v6656_v11 = vpop.f32.mrb[27].mxu1 }
 0x86c   :  { %v6658_v63 = vpop.f32.mrb[28].mxu1 }
 0x86d   :  { %v6660_v15 = vpop.f32.mrb[29].mxu1 }
 0x86f   :  { %v5781_v32 = vpop.eup %5780 }
 0x870   :  { %v1764_v9 = vmul.f32 %v5781_v32, %v1763_v30  ;;  %v2022_v30 = vadd.f32 %v6652_v53, %v6727_v60 }
 0x872   :  { %v1766_v56 = vadd.f32 %v1765_v12, %v1764_v9 }
 0x874   :  { %1949 = vmatmul.mubr.f32.gmra.mrb[30].mxu0 %v1766_v56  ;;  %4293 = vmatmul.mubr.f32.gmra.mrb[30].mxu1 %v1766_v56 }
 0x875   :  { %2218 = vmatprep.mubr.f32.mxu0 %v5963_v0  ;;  %4327 = vmatprep.mubr.msk.f32.mxu1 %vm5965_vm2, %v5963_v0 }
 0x878   :  { %2219 = vmatmul.mubr.f32.vlgmr.msra.gmra.mrb[16].mxu0 %v5963_v0  ;;  %4328 = vmatmul.mubr.f32.vlgmr.msra.gmra.mrb[32].mxu1 %v5963_v0 }
 0x879   :  { %5181 = vmatpush1.bf16.msra.mxu0 %v6567_v16  ;;  %5212 = vmatpush3.bf16.msra.mxu1 %v6605_v38 }
 0x87a   :  { %5183 = vmatprep.subr.bf16.mxu0 %v6571_v21  ;;  %5213 = vmatprep.subr.bf16.mxu1 %v5964_v34 }
 0x87b   :  { %2383 = vmatprep.mubr.f32.mxu0 %v5963_v0  ;;  %4362 = vmatprep.mubr.msk.f32.mxu1 %vm5965_vm2, %v5963_v0 }
 0x87d   :  { %5185 = vmatpush1.bf16.msra.mxu0 %v6573_v18  ;;  %5215 = vmatpush3.bf16.msra.mxu1 %v6616_v13 }
 0x87e   :  { %5187 = vmatprep.subr.bf16.mxu0 %v6577_v27  ;;  %5216 = vmatprep.subr.bf16.mxu1 %v5964_v34 }
 0x881   :  { %5189 = vmatpush1.bf16.msra.mxu0 %v6579_v39  ;;  %5218 = vmatpush3.bf16.msra.mxu1 %v6622_v43 }
 0x882   :  { %5191 = vmatprep.subr.bf16.mxu0 %v6583_v50  ;;  %5219 = vmatprep.subr.bf16.mxu1 %v5964_v34 }
 0x885   :  { %5193 = vmatpush1.bf16.msra.mxu0 %v6585_v61  ;;  %5221 = vmatpush3.bf16.msra.mxu1 %v6625_v22 }
 0x886   :  { %5195 = vmatprep.subr.bf16.mxu0 %v6589_v10  ;;  %5222 = vmatprep.subr.bf16.mxu1 %v5964_v34 }
 0x889   :  { %5197 = vmatpush1.bf16.msra.mxu0 %v6591_v20  ;;  %5224 = vmatpush3.bf16.msra.mxu1 %v6629_v19 }
 0x88a   :  { %5199 = vmatprep.subr.bf16.mxu0 %v6595_v47  ;;  %5225 = vmatprep.subr.bf16.mxu1 %v5964_v34 }
 0x88d   :  { %5201 = vmatpush1.bf16.msra.mxu0 %v6597_v29  ;;  %5227 = vmatpush3.bf16.msra.mxu1 %v6633_v37 }
 0x88e   :  { %5203 = vmatprep.subr.bf16.mxu0 %v6601_v42  ;;  %5228 = vmatprep.subr.bf16.mxu1 %v5964_v34 }
 0x891   :  { %5205 = vmatpush1.bf16.msra.mxu0 %v6603_v62  ;;  %5230 = vmatpush3.bf16.msra.mxu1 %v6637_v55 }
 0x892   :  { %5207 = vmatprep.subr.bf16.mxu0 %v6610_v2  ;;  %5231 = vmatprep.subr.bf16.mxu1 %v5964_v34 }
 0x895   :  { %5209 = vmatpush1.bf16.msra.mxu0 %v6613_v40  ;;  %5233 = vmatpush3.bf16.msra.mxu1 %v6641_v6 }
 0x896   :  { %5235 = vmatprep.subr.bf16.mxu0 %v6565_v54  ;;  %5266 = vmatprep.subr.bf16.mxu1 %v5964_v34 }
 0x947   :  { %v6711_v49 = vpop.f32.mrb[30].mxu1 }
 0x948   :  { %v6715_v14 = vpop.f32.mrb[31].mxu1 }
 0x94b   :  { %v2220_v23 = vpop.f32.mrb[16].mxu0  ;;  %v2291_v24 = vpop.f32.mrb[32].mxu1 }
 0x94c   :  { %v5627_v26 = vadd.f32 %v6717_v17, %v2220_v23  ;;  %v2222_v51 = vpop.f32.mrb[17].mxu0  ;;  %v4329_v36 = vpop.f32.mrb[33].mxu1  ;;  %v2292_v4 = vadd.f32 %v2291_v24, %v6724_v44 }
 0x94d   :  { %v5629_v52 = vadd.f32 %v6719_v28, %v2222_v51 }
 0x94e   :  { %v3618_v41 = vmul.f32 -1.442695, %v5627_v26 }
 0x94f   :  { %v3619_v46 = vmul.f32 -1.442695, %v5629_v52 }
 0x950   :  { %5782 = vpow2.f32 %v3618_v41 }
 0x951   :  { %5784 = vpow2.f32 %v3619_v46 }
 0x95a   :  { %v5783_v48 = vpop.eup %5782 }
 0x95b   :  { %v2299_v58 = vadd.f32 1.0, %v5783_v48  ;;  %v5785_v1 = vpop.eup %5784 }
 0x95c   :  { %v2306_v8 = vadd.f32 1.0, %v5785_v1  ;;  %v2027_v1 = vadd.f32 %v6650_v33, %v6727_v60 }
 0x95d   :  { %5786 = vrcp.f32 %v2299_v58 }
 0x95e   :  { %5788 = vrcp.f32 %v2306_v8 }
 0x967   :  { %v5787_v5 = vpop.eup %5786 }
 0x968   :  { %v2309_v32 = vmul.f32 %v5787_v5, %v2292_v4  ;;  %v5789_v12 = vpop.eup %5788 }
 0x969   :  { %v2312_v56 = vsub.f32 1.0, %v5789_v12  ;;  %v2314_v45 = vmul.f32 0.0, %v5789_v12 }
 0x96a   :  { %v2310_v9 = vadd.f32 %v2309_v32, %v2022_v30 }
 0x96c   :  { %5790 = vtanh.f32 %v2310_v9 }
 0x976   :  { %v5791_v35 = vpop.eup %5790 }
 0x977   :  { %v2313_v57 = vmul.f32 %v5791_v35, %v2312_v56 }
 0x979   :  { %v6732_v59 = vadd.f32 %v2314_v45, %v2313_v57 }
 0x97b   :  { %2384 = vmatmul.mubr.f32.vlgmr.msra.gmra.mrb[18].mxu0 %v6732_v59  ;;  %4363 = vmatmul.mubr.f32.vlgmr.msra.gmra.mrb[34].mxu1 %v6732_v59 }
 0x97c   :  { %5237 = vmatpush1.bf16.msra.mxu0 %v6567_v16  ;;  %5268 = vmatpush3.bf16.msra.mxu1 %v6605_v38 }
 0x97d   :  { %5239 = vmatprep.subr.bf16.mxu0 %v6571_v21  ;;  %5269 = vmatprep.subr.bf16.mxu1 %v5964_v34 }
 0x97e   :  { %2548 = vmatprep.mubr.f32.mxu0 %v5963_v0  ;;  %4397 = vmatprep.mubr.msk.f32.mxu1 %vm5965_vm2, %v5963_v0 }
 0x980   :  { %5241 = vmatpush1.bf16.msra.mxu0 %v6573_v18  ;;  %5271 = vmatpush3.bf16.msra.mxu1 %v6616_v13 }
 0x981   :  { %5243 = vmatprep.subr.bf16.mxu0 %v6577_v27  ;;  %5272 = vmatprep.subr.bf16.mxu1 %v5964_v34 }
 0x984   :  { %5245 = vmatpush1.bf16.msra.mxu0 %v6579_v39  ;;  %5274 = vmatpush3.bf16.msra.mxu1 %v6622_v43 }
 0x985   :  { %5247 = vmatprep.subr.bf16.mxu0 %v6583_v50  ;;  %5275 = vmatprep.subr.bf16.mxu1 %v5964_v34 }
 0x988   :  { %5249 = vmatpush1.bf16.msra.mxu0 %v6585_v61  ;;  %5277 = vmatpush3.bf16.msra.mxu1 %v6625_v22 }
 0x989   :  { %5251 = vmatprep.subr.bf16.mxu0 %v6589_v10  ;;  %5278 = vmatprep.subr.bf16.mxu1 %v5964_v34 }
 0x98c   :  { %5253 = vmatpush1.bf16.msra.mxu0 %v6591_v20  ;;  %5280 = vmatpush3.bf16.msra.mxu1 %v6629_v19 }
 0x98d   :  { %5255 = vmatprep.subr.bf16.mxu0 %v6595_v47  ;;  %5281 = vmatprep.subr.bf16.mxu1 %v5964_v34 }
 0x990   :  { %5257 = vmatpush1.bf16.msra.mxu0 %v6597_v29  ;;  %5283 = vmatpush3.bf16.msra.mxu1 %v6633_v37 }
 0x991   :  { %5259 = vmatprep.subr.bf16.mxu0 %v6601_v42  ;;  %5284 = vmatprep.subr.bf16.mxu1 %v5964_v34 }
 0x994   :  { %5261 = vmatpush1.bf16.msra.mxu0 %v6603_v62  ;;  %5286 = vmatpush3.bf16.msra.mxu1 %v6637_v55 }
 0x995   :  { %5263 = vmatprep.subr.bf16.mxu0 %v6610_v2  ;;  %5287 = vmatprep.subr.bf16.mxu1 %v5964_v34 }
 0x998   :  { %5265 = vmatpush1.bf16.msra.mxu0 %v6613_v40  ;;  %5289 = vmatpush3.bf16.msra.mxu1 %v6641_v6 }
 0x999   :  { %5291 = vmatprep.subr.bf16.mxu0 %v6565_v54  ;;  %5322 = vmatprep.subr.bf16.mxu1 %v5964_v34 }
 0xa4e   :  { %v2385_v31 = vpop.f32.mrb[18].mxu0  ;;  %v2456_v53 = vpop.f32.mrb[34].mxu1 }
 0xa4f   :  { %v5631_v25 = vadd.f32 %v6717_v17, %v2385_v31  ;;  %v2387_v3 = vpop.f32.mrb[19].mxu0  ;;  %v4364_v23 = vpop.f32.mrb[35].mxu1  ;;  %v2457_v48 = vadd.f32 %v2456_v53, %v6724_v44 }
 0xa50   :  { %v5633_v26 = vadd.f32 %v6719_v28, %v2387_v3 }
 0xa51   :  { %v3620_v24 = vmul.f32 -1.442695, %v5631_v25 }
 0xa52   :  { %v3621_v51 = vmul.f32 -1.442695, %v5633_v26 }
 0xa53   :  { %5792 = vpow2.f32 %v3620_v24 }
 0xa54   :  { %5794 = vpow2.f32 %v3621_v51 }
 0xa5d   :  { %v5793_v36 = vpop.eup %5792 }
 0xa5e   :  { %v2464_v41 = vadd.f32 1.0, %v5793_v36  ;;  %v5795_v52 = vpop.eup %5794 }
 0xa5f   :  { %v2471_v46 = vadd.f32 1.0, %v5795_v52 }
 0xa60   :  { %5796 = vrcp.f32 %v2464_v41  ;;  %v2032_v41 = vadd.f32 %v6656_v11, %v6727_v60 }
 0xa61   :  { %5798 = vrcp.f32 %v2471_v46 }
 0xa6a   :  { %v5797_v58 = vpop.eup %5796 }
 0xa6b   :  { %v2474_v8 = vmul.f32 %v5797_v58, %v2457_v48  ;;  %v5799_v5 = vpop.eup %5798 }
 0xa6c   :  { %v2477_v30 = vsub.f32 1.0, %v5799_v5  ;;  %v2479_v12 = vmul.f32 %v5799_v5, %v6732_v59 }
 0xa6d   :  { %v2475_v4 = vadd.f32 %v2474_v8, %v2027_v1 }
 0xa6f   :  { %5800 = vtanh.f32 %v2475_v4 }
 0xa79   :  { %v5801_v32 = vpop.eup %5800 }
 0xa7a   :  { %v2478_v9 = vmul.f32 %v5801_v32, %v2477_v30 }
 0xa7c   :  { %v6777_v56 = vadd.f32 %v2479_v12, %v2478_v9 }
 0xa7e   :  { %2549 = vmatmul.mubr.f32.vlgmr.msra.gmra.mrb[20].mxu0 %v6777_v56  ;;  %4398 = vmatmul.mubr.f32.vlgmr.msra.gmra.mrb[36].mxu1 %v6777_v56 }
 0xa7f   :  { %5293 = vmatpush1.bf16.msra.mxu0 %v6567_v16  ;;  %5324 = vmatpush3.bf16.msra.mxu1 %v6605_v38 }
 0xa80   :  { %5295 = vmatprep.subr.bf16.mxu0 %v6571_v21  ;;  %5325 = vmatprep.subr.bf16.mxu1 %v5964_v34 }
 0xa81   :  { %2713 = vmatprep.mubr.f32.mxu0 %v5963_v0  ;;  %4432 = vmatprep.mubr.msk.f32.mxu1 %vm5965_vm2, %v5963_v0 }
 0xa83   :  { %5297 = vmatpush1.bf16.msra.mxu0 %v6573_v18  ;;  %5327 = vmatpush3.bf16.msra.mxu1 %v6616_v13 }
 0xa84   :  { %5299 = vmatprep.subr.bf16.mxu0 %v6577_v27  ;;  %5328 = vmatprep.subr.bf16.mxu1 %v5964_v34 }
 0xa87   :  { %5301 = vmatpush1.bf16.msra.mxu0 %v6579_v39  ;;  %5330 = vmatpush3.bf16.msra.mxu1 %v6622_v43 }
 0xa88   :  { %5303 = vmatprep.subr.bf16.mxu0 %v6583_v50  ;;  %5331 = vmatprep.subr.bf16.mxu1 %v5964_v34 }
 0xa8b   :  { %5305 = vmatpush1.bf16.msra.mxu0 %v6585_v61  ;;  %5333 = vmatpush3.bf16.msra.mxu1 %v6625_v22 }
 0xa8c   :  { %5307 = vmatprep.subr.bf16.mxu0 %v6589_v10  ;;  %5334 = vmatprep.subr.bf16.mxu1 %v5964_v34 }
 0xa8f   :  { %5309 = vmatpush1.bf16.msra.mxu0 %v6591_v20  ;;  %5336 = vmatpush3.bf16.msra.mxu1 %v6629_v19 }
 0xa90   :  { %5311 = vmatprep.subr.bf16.mxu0 %v6595_v47  ;;  %5337 = vmatprep.subr.bf16.mxu1 %v5964_v34 }
 0xa93   :  { %5313 = vmatpush1.bf16.msra.mxu0 %v6597_v29  ;;  %5339 = vmatpush3.bf16.msra.mxu1 %v6633_v37 }
 0xa94   :  { %5315 = vmatprep.subr.bf16.mxu0 %v6601_v42  ;;  %5340 = vmatprep.subr.bf16.mxu1 %v5964_v34 }
 0xa97   :  { %5317 = vmatpush1.bf16.msra.mxu0 %v6603_v62  ;;  %5342 = vmatpush3.bf16.msra.mxu1 %v6637_v55 }
 0xa98   :  { %5319 = vmatprep.subr.bf16.mxu0 %v6610_v2  ;;  %5343 = vmatprep.subr.bf16.mxu1 %v5964_v34 }
 0xa9b   :  { %5321 = vmatpush1.bf16.msra.mxu0 %v6613_v40  ;;  %5345 = vmatpush3.bf16.msra.mxu1 %v6641_v6 }
 0xa9c   :  { %5347 = vmatprep.subr.bf16.mxu0 %v6565_v54  ;;  %5378 = vmatprep.subr.bf16.mxu1 %v5964_v34 }
 0xb51   :  { %v2550_v33 = vpop.f32.mrb[20].mxu0  ;;  %v2621_v35 = vpop.f32.mrb[36].mxu1 }
 0xb52   :  { %v5635_v57 = vadd.f32 %v6717_v17, %v2550_v33  ;;  %v2552_v45 = vpop.f32.mrb[21].mxu0  ;;  %v4399_v59 = vpop.f32.mrb[37].mxu1  ;;  %v2622_v51 = vadd.f32 %v2621_v35, %v6724_v44 }
 0xb53   :  { %v5637_v53 = vadd.f32 %v6719_v28, %v2552_v45 }
 0xb54   :  { %v3622_v31 = vmul.f32 -1.442695, %v5635_v57 }
 0xb55   :  { %v3623_v25 = vmul.f32 -1.442695, %v5637_v53 }
 0xb56   :  { %5802 = vpow2.f32 %v3622_v31 }
 0xb57   :  { %5804 = vpow2.f32 %v3623_v25 }
 0xb60   :  { %v5803_v3 = vpop.eup %5802 }
 0xb61   :  { %v2629_v23 = vadd.f32 1.0, %v5803_v3  ;;  %v5805_v24 = vpop.eup %5804  ;;  %v2037_v3 = vadd.f32 %v6654_v7, %v6727_v60 }
 0xb62   :  { %v2636_v26 = vadd.f32 1.0, %v5805_v24 }
 0xb63   :  { %5806 = vrcp.f32 %v2629_v23 }
 0xb64   :  { %5808 = vrcp.f32 %v2636_v26 }
 0xb6d   :  { %v5807_v36 = vpop.eup %5806 }
 0xb6e   :  { %v2639_v52 = vmul.f32 %v5807_v36, %v2622_v51  ;;  %v5809_v48 = vpop.eup %5808 }
 0xb6f   :  { %v2642_v58 = vsub.f32 1.0, %v5809_v48  ;;  %v2644_v4 = vmul.f32 %v5809_v48, %v6777_v56 }
 0xb70   :  { %v2640_v46 = vadd.f32 %v2639_v52, %v2032_v41 }
 0xb72   :  { %5810 = vtanh.f32 %v2640_v46 }
 0xb7c   :  { %v5811_v1 = vpop.eup %5810 }
 0xb7d   :  { %v2643_v8 = vmul.f32 %v5811_v1, %v2642_v58 }
 0xb7f   :  { %v6822_v5 = vadd.f32 %v2644_v4, %v2643_v8 }
 0xb81   :  { %2714 = vmatmul.mubr.f32.vlgmr.msra.gmra.mrb[22].mxu0 %v6822_v5  ;;  %4433 = vmatmul.mubr.f32.vlgmr.msra.gmra.mrb[38].mxu1 %v6822_v5 }
 0xb82   :  { %5349 = vmatpush1.bf16.msra.mxu0 %v6567_v16  ;;  %5380 = vmatpush3.bf16.msra.mxu1 %v6605_v38 }
 0xb83   :  { %5351 = vmatprep.subr.bf16.mxu0 %v6571_v21  ;;  %5381 = vmatprep.subr.bf16.mxu1 %v5964_v34 }
 0xb84   :  { %2878 = vmatprep.mubr.f32.mxu0 %v5963_v0  ;;  %4467 = vmatprep.mubr.msk.f32.mxu1 %vm5965_vm2, %v5963_v0 }
 0xb86   :  { %5353 = vmatpush1.bf16.msra.mxu0 %v6573_v18  ;;  %5383 = vmatpush3.bf16.msra.mxu1 %v6616_v13 }
 0xb87   :  { %5355 = vmatprep.subr.bf16.mxu0 %v6577_v27  ;;  %5384 = vmatprep.subr.bf16.mxu1 %v5964_v34 }
 0xb8a   :  { %5357 = vmatpush1.bf16.msra.mxu0 %v6579_v39  ;;  %5386 = vmatpush3.bf16.msra.mxu1 %v6622_v43 }
 0xb8b   :  { %5359 = vmatprep.subr.bf16.mxu0 %v6583_v50  ;;  %5387 = vmatprep.subr.bf16.mxu1 %v5964_v34 }
 0xb8e   :  { %5361 = vmatpush1.bf16.msra.mxu0 %v6585_v61  ;;  %5389 = vmatpush3.bf16.msra.mxu1 %v6625_v22 }
 0xb8f   :  { %5363 = vmatprep.subr.bf16.mxu0 %v6589_v10  ;;  %5390 = vmatprep.subr.bf16.mxu1 %v5964_v34 }
 0xb92   :  { %5365 = vmatpush1.bf16.msra.mxu0 %v6591_v20  ;;  %5392 = vmatpush3.bf16.msra.mxu1 %v6629_v19 }
 0xb93   :  { %5367 = vmatprep.subr.bf16.mxu0 %v6595_v47  ;;  %5393 = vmatprep.subr.bf16.mxu1 %v5964_v34 }
 0xb96   :  { %5369 = vmatpush1.bf16.msra.mxu0 %v6597_v29  ;;  %5395 = vmatpush3.bf16.msra.mxu1 %v6633_v37 }
 0xb97   :  { %5371 = vmatprep.subr.bf16.mxu0 %v6601_v42  ;;  %5396 = vmatprep.subr.bf16.mxu1 %v5964_v34 }
 0xb9a   :  { %5373 = vmatpush1.bf16.msra.mxu0 %v6603_v62  ;;  %5398 = vmatpush3.bf16.msra.mxu1 %v6637_v55 }
 0xb9b   :  { %5375 = vmatprep.subr.bf16.mxu0 %v6610_v2  ;;  %5399 = vmatprep.subr.bf16.mxu1 %v5964_v34 }
 0xb9e   :  { %5377 = vmatpush1.bf16.msra.mxu0 %v6613_v40  ;;  %5401 = vmatpush3.bf16.msra.mxu1 %v6641_v6 }
 0xb9f   :  { %5403 = vmatprep.subr.bf16.mxu0 %v6565_v54  ;;  %5434 = vmatprep.subr.bf16.mxu1 %v5964_v34 }
 0xc54   :  { %v2715_v11 = vpop.f32.mrb[22].mxu0  ;;  %v2786_v30 = vpop.f32.mrb[38].mxu1 }
 0xc55   :  { %v5639_v32 = vadd.f32 %v6717_v17, %v2715_v11  ;;  %v2717_v9 = vpop.f32.mrb[23].mxu0  ;;  %v4434_v12 = vpop.f32.mrb[39].mxu1  ;;  %v2787_v53 = vadd.f32 %v2786_v30, %v6724_v44 }
 0xc56   :  { %v5641_v33 = vadd.f32 %v6719_v28, %v2717_v9 }
 0xc57   :  { %v3624_v56 = vmul.f32 -1.442695, %v5639_v32 }
 0xc58   :  { %v3625_v35 = vmul.f32 -1.442695, %v5641_v33 }
 0xc59   :  { %5812 = vpow2.f32 %v3624_v56 }
 0xc5a   :  { %5814 = vpow2.f32 %v3625_v35  ;;  %v2042_v35 = vadd.f32 %v6660_v15, %v6727_v60 }
 0xc63   :  { %v5813_v57 = vpop.eup %5812 }
 0xc64   :  { %v2794_v45 = vadd.f32 1.0, %v5813_v57  ;;  %v5815_v59 = vpop.eup %5814 }
 0xc65   :  { %v2801_v31 = vadd.f32 1.0, %v5815_v59 }
 0xc66   :  { %5816 = vrcp.f32 %v2794_v45 }
 0xc67   :  { %5818 = vrcp.f32 %v2801_v31 }
 0xc70   :  { %v5817_v25 = vpop.eup %5816 }
 0xc71   :  { %v2804_v23 = vmul.f32 %v5817_v25, %v2787_v53  ;;  %v5819_v26 = vpop.eup %5818 }
 0xc72   :  { %v2807_v51 = vsub.f32 1.0, %v5819_v26  ;;  %v2809_v52 = vmul.f32 %v5819_v26, %v6822_v5 }
 0xc73   :  { %v2805_v24 = vadd.f32 %v2804_v23, %v2037_v3 }
 0xc75   :  { %5820 = vtanh.f32 %v2805_v24 }
 0xc7f   :  { %v5821_v36 = vpop.eup %5820 }
 0xc80   :  { %v2808_v41 = vmul.f32 %v5821_v36, %v2807_v51 }
 0xc82   :  { %v6867_v46 = vadd.f32 %v2809_v52, %v2808_v41 }
 0xc84   :  { %2879 = vmatmul.mubr.f32.vlgmr.msra.gmra.mrb[24].mxu0 %v6867_v46  ;;  %4468 = vmatmul.mubr.f32.vlgmr.msra.gmra.mrb[40].mxu1 %v6867_v46 }
 0xc85   :  { %5405 = vmatpush1.bf16.msra.mxu0 %v6567_v16  ;;  %5436 = vmatpush3.bf16.msra.mxu1 %v6605_v38 }
 0xc86   :  { %5407 = vmatprep.subr.bf16.mxu0 %v6571_v21  ;;  %5437 = vmatprep.subr.bf16.mxu1 %v5964_v34 }
 0xc87   :  { %3043 = vmatprep.mubr.f32.mxu0 %v5963_v0  ;;  %4502 = vmatprep.mubr.msk.f32.mxu1 %vm5965_vm2, %v5963_v0 }
 0xc89   :  { %5409 = vmatpush1.bf16.msra.mxu0 %v6573_v18  ;;  %5439 = vmatpush3.bf16.msra.mxu1 %v6616_v13 }
 0xc8a   :  { %5411 = vmatprep.subr.bf16.mxu0 %v6577_v27  ;;  %5440 = vmatprep.subr.bf16.mxu1 %v5964_v34 }
 0xc8d   :  { %5413 = vmatpush1.bf16.msra.mxu0 %v6579_v39  ;;  %5442 = vmatpush3.bf16.msra.mxu1 %v6622_v43 }
 0xc8e   :  { %5415 = vmatprep.subr.bf16.mxu0 %v6583_v50  ;;  %5443 = vmatprep.subr.bf16.mxu1 %v5964_v34 }
 0xc91   :  { %5417 = vmatpush1.bf16.msra.mxu0 %v6585_v61  ;;  %5445 = vmatpush3.bf16.msra.mxu1 %v6625_v22 }
 0xc92   :  { %5419 = vmatprep.subr.bf16.mxu0 %v6589_v10  ;;  %5446 = vmatprep.subr.bf16.mxu1 %v5964_v34 }
 0xc95   :  { %5421 = vmatpush1.bf16.msra.mxu0 %v6591_v20  ;;  %5448 = vmatpush3.bf16.msra.mxu1 %v6629_v19 }
 0xc96   :  { %5423 = vmatprep.subr.bf16.mxu0 %v6595_v47  ;;  %5449 = vmatprep.subr.bf16.mxu1 %v5964_v34 }
 0xc99   :  { %5425 = vmatpush1.bf16.msra.mxu0 %v6597_v29  ;;  %5451 = vmatpush3.bf16.msra.mxu1 %v6633_v37 }
 0xc9a   :  { %5427 = vmatprep.subr.bf16.mxu0 %v6601_v42  ;;  %5452 = vmatprep.subr.bf16.mxu1 %v5964_v34 }
 0xc9d   :  { %5429 = vmatpush1.bf16.msra.mxu0 %v6603_v62  ;;  %5454 = vmatpush3.bf16.msra.mxu1 %v6637_v55 }
 0xc9e   :  { %5431 = vmatprep.subr.bf16.mxu0 %v6610_v2  ;;  %5455 = vmatprep.subr.bf16.mxu1 %v5964_v34 }
 0xca1   :  { %5433 = vmatpush1.bf16.msra.mxu0 %v6613_v40  ;;  %5457 = vmatpush3.bf16.msra.mxu1 %v6641_v6 }
 0xca2   :  { %5459 = vmatprep.subr.bf16.mxu0 %v6565_v54  ;;  %5490 = vmatprep.subr.bf16.mxu1 %v5964_v34 }
 0xd57   :  { %v2880_v7 = vpop.f32.mrb[24].mxu0  ;;  %v2951_v48 = vpop.f32.mrb[40].mxu1 }
 0xd58   :  { %v5643_v58 = vadd.f32 %v6717_v17, %v2880_v7  ;;  %v2882_v1 = vpop.f32.mrb[25].mxu0  ;;  %v4469_v8 = vpop.f32.mrb[41].mxu1  ;;  %v2952_v56 = vadd.f32 %v2951_v48, %v6724_v44 }
 0xd59   :  { %v5645_v5 = vadd.f32 %v6719_v28, %v2882_v1 }
 0xd5a   :  { %v3626_v4 = vmul.f32 -1.442695, %v5643_v58 }
 0xd5b   :  { %v3627_v11 = vmul.f32 -1.442695, %v5645_v5 }
 0xd5c   :  { %5822 = vpow2.f32 %v3626_v4  ;;  %v2047_v4 = vadd.f32 %v6658_v63, %v6727_v60  ;;  %v3471_v63 = vld [vmem:[#allocation9] sm:$0xff] }
 0xd5d   :  { %5824 = vpow2.f32 %v3627_v11 }
 0xd66   :  { %v5823_v30 = vpop.eup %5822 }
 0xd67   :  { %v2959_v32 = vadd.f32 1.0, %v5823_v30  ;;  %v5825_v9 = vpop.eup %5824 }
 0xd68   :  { %v2966_v12 = vadd.f32 1.0, %v5825_v9 }
 0xd69   :  { %5826 = vrcp.f32 %v2959_v32 }
 0xd6a   :  { %5828 = vrcp.f32 %v2966_v12 }
 0xd73   :  { %v5827_v33 = vpop.eup %5826 }
 0xd74   :  { %v2969_v57 = vmul.f32 %v5827_v33, %v2952_v56  ;;  %v5829_v59 = vpop.eup %5828 }
 0xd75   :  { %v2972_v31 = vsub.f32 1.0, %v5829_v59  ;;  %v2974_v3 = vmul.f32 %v5829_v59, %v6867_v46 }
 0xd76   :  { %v2970_v45 = vadd.f32 %v2969_v57, %v2042_v35  ;;  %v3473_v57 = vld [vmem:[#allocation9 + $0x10] sm:$0xff] }
 0xd78   :  { %5830 = vtanh.f32 %v2970_v45  ;;  %v3474_v45 = vld [vmem:[#allocation9 + $0x18] sm:$0xff] }
 0xd79   :  { %v5574_v59 = vpack.c.bf16 %v3474_v45, %v3473_v57 }
 0xd82   :  { %v5831_v53 = vpop.eup %5830 }
 0xd83   :  { %v2973_v25 = vmul.f32 %v5831_v53, %v2972_v31  ;;  %v3475_v31 = vld [vmem:[#allocation9 + $0x20] sm:$0xff]  ;;  %v3476_v53 = vld [vmem:[#allocation9 + $0x28] sm:$0xff] }
 0xd85   :  { %v6912_v23 = vadd.f32 %v2974_v3, %v2973_v25  ;;  %v5577_v25 = vpack.c.bf16 %v3476_v53, %v3475_v31  ;;  %v3477_v3 = vld [vmem:[#allocation9 + $0x30] sm:$0xff] }
 0xd87   :  { %3044 = vmatmul.mubr.f32.vlgmr.msra.gmra.mrb[26].mxu0 %v6912_v23  ;;  %4503 = vmatmul.mubr.f32.vlgmr.msra.gmra.mrb[42].mxu1 %v6912_v23 }
 0xd88   :  { %5461 = vmatpush1.bf16.msra.mxu0 %v6567_v16  ;;  %5492 = vmatpush3.bf16.msra.mxu1 %v6605_v38 }
 0xd89   :  { %5463 = vmatprep.subr.bf16.mxu0 %v6571_v21  ;;  %5493 = vmatprep.subr.bf16.mxu1 %v5964_v34 }
 0xd8a   :  { %3208 = vmatprep.mubr.f32.mxu0 %v5963_v0  ;;  %4537 = vmatprep.mubr.msk.f32.mxu1 %vm5965_vm2, %v5963_v0 }
 0xd8c   :  { %5465 = vmatpush1.bf16.msra.mxu0 %v6573_v18  ;;  %5495 = vmatpush3.bf16.msra.mxu1 %v6616_v13 }
 0xd8d   :  { %5467 = vmatprep.subr.bf16.mxu0 %v6577_v27  ;;  %5496 = vmatprep.subr.bf16.mxu1 %v5964_v34 }
 0xd90   :  { %5469 = vmatpush1.bf16.msra.mxu0 %v6579_v39  ;;  %5498 = vmatpush3.bf16.msra.mxu1 %v6622_v43 }
 0xd91   :  { %5471 = vmatprep.subr.bf16.mxu0 %v6583_v50  ;;  %5499 = vmatprep.subr.bf16.mxu1 %v5964_v34 }
 0xd94   :  { %5473 = vmatpush1.bf16.msra.mxu0 %v6585_v61  ;;  %5501 = vmatpush3.bf16.msra.mxu1 %v6625_v22 }
 0xd95   :  { %5475 = vmatprep.subr.bf16.mxu0 %v6589_v10  ;;  %5502 = vmatprep.subr.bf16.mxu1 %v5964_v34 }
 0xd98   :  { %5477 = vmatpush1.bf16.msra.mxu0 %v6591_v20  ;;  %5504 = vmatpush3.bf16.msra.mxu1 %v6629_v19 }
 0xd99   :  { %5479 = vmatprep.subr.bf16.mxu0 %v6595_v47  ;;  %5505 = vmatprep.subr.bf16.mxu1 %v5964_v34 }
 0xd9c   :  { %5481 = vmatpush1.bf16.msra.mxu0 %v6597_v29  ;;  %5507 = vmatpush3.bf16.msra.mxu1 %v6633_v37 }
 0xd9d   :  { %5483 = vmatprep.subr.bf16.mxu0 %v6601_v42  ;;  %5508 = vmatprep.subr.bf16.mxu1 %v5964_v34 }
 0xda0   :  { %5485 = vmatpush1.bf16.msra.mxu0 %v6603_v62  ;;  %5510 = vmatpush3.bf16.msra.mxu1 %v6637_v55 }
 0xda1   :  { %5487 = vmatprep.subr.bf16.mxu0 %v6610_v2  ;;  %5511 = vmatprep.subr.bf16.mxu1 %v5964_v34 }
 0xda4   :  { %5489 = vmatpush1.bf16.msra.mxu0 %v6613_v40  ;;  %5513 = vmatpush3.bf16.msra.mxu1 %v6641_v6 }
 0xda5   :  { %5515 = vmatprep.subr.bf16.mxu0 %v6565_v54  ;;  %5546 = vmatprep.subr.bf16.mxu1 %v5964_v34 }
 0xe5a   :  { %v3045_v15 = vpop.f32.mrb[26].mxu0  ;;  %v3116_v24 = vpop.f32.mrb[42].mxu1 }
 0xe5b   :  { %v5647_v26 = vadd.f32 %v6717_v17, %v3045_v15  ;;  %v3047_v51 = vpop.f32.mrb[27].mxu0  ;;  %v4504_v36 = vpop.f32.mrb[43].mxu1  ;;  %v3117_v54 = vadd.f32 %v3116_v24, %v6724_v44  ;;  %v3479_v15 = vld [vmem:[#allocation9 + $0x40] sm:$0xff]  ;;  %v3480_v24 = vld [vmem:[#allocation9 + $0x48] sm:$0xff] }
 0xe5c   :  { %v5649_v52 = vadd.f32 %v6719_v28, %v3047_v51  ;;  %v3481_v51 = vld [vmem:[#allocation9 + $0x50] sm:$0xff]  ;;  %v3482_v36 = vld [vmem:[#allocation9 + $0x58] sm:$0xff] }
 0xe5d   :  { %v3628_v41 = vmul.f32 -1.442695, %v5647_v26  ;;  %v5583_v26 = vpack.c.bf16 %v3480_v24, %v3479_v15 }
 0xe5e   :  { %v3629_v46 = vmul.f32 -1.442695, %v5649_v52  ;;  %v3483_v52 = vld [vmem:[#allocation9 + $0x60] sm:$0xff] }
 0xe5f   :  { %5832 = vpow2.f32 %v3628_v41  ;;  %v5586_v41 = vpack.c.bf16 %v3482_v36, %v3481_v51 }
 0xe60   :  { %5834 = vpow2.f32 %v3629_v46  ;;  %v3484_v46 = vld [vmem:[#allocation9 + $0x68] sm:$0xff] }
 0xe69   :  { %v5833_v7 = vpop.eup %5832 }
 0xe6a   :  { %v3124_v48 = vadd.f32 1.0, %v5833_v7  ;;  %v5835_v58 = vpop.eup %5834  ;;  %v5589_v7 = vpack.c.bf16 %v3484_v46, %v3483_v52 }
 0xe6b   :  { %v3131_v1 = vadd.f32 1.0, %v5835_v58  ;;  %v3486_v58 = vld [vmem:[#allocation9 + $0x78] sm:$0xff] }
 0xe6c   :  { %5836 = vrcp.f32 %v3124_v48  ;;  %v3485_v48 = vld [vmem:[#allocation9 + $0x70] sm:$0xff] }
 0xe6d   :  { %5838 = vrcp.f32 %v3131_v1  ;;  %v5592_v1 = vpack.c.bf16 %v3486_v58, %v3485_v48 }
 0xe76   :  { %v5837_v8 = vpop.eup %5836 }
 0xe77   :  { %v3134_v5 = vmul.f32 %v5837_v8, %v3117_v54  ;;  %v5839_v30 = vpop.eup %5838 }
 0xe78   :  { %v3137_v32 = vsub.f32 1.0, %v5839_v30  ;;  %v3139_v56 = vmul.f32 %v5839_v30, %v6912_v23 }
 0xe79   :  { %v3135_v11 = vadd.f32 %v3134_v5, %v2047_v4 }
 0xe7b   :  { %5840 = vtanh.f32 %v3135_v11 }
 0xe85   :  { %v5841_v9 = vpop.eup %5840 }
 0xe86   :  { %v3138_v12 = vmul.f32 %v5841_v9, %v3137_v32 }
 0xe88   :  { %v3140_v33 = vadd.f32 %v3139_v56, %v3138_v12 }
 0xe8a   :  { %3209 = vmatmul.mubr.f32.vlgmr.msra.gmra.mrb[28].mxu0 %v3140_v33  ;;  %4538 = vmatmul.mubr.f32.vlgmr.msra.gmra.mrb[44].mxu1 %v3140_v33 }
 0xe8b   :  { %5517 = vmatpush1.bf16.msra.mxu0 %v6567_v16  ;;  %5548 = vmatpush3.bf16.msra.mxu1 %v6605_v38 }
 0xe8c   :  { %5519 = vmatprep.subr.bf16.mxu0 %v6571_v21  ;;  %5549 = vmatprep.subr.bf16.mxu1 %v5964_v34 }
 0xe8d   :  { %3373 = vmatprep.mubr.f32.mxu0 %v5963_v0  ;;  %4572 = vmatprep.mubr.msk.f32.mxu1 %vm5965_vm2, %v5963_v0 }
 0xe8f   :  { %5521 = vmatpush1.bf16.msra.mxu0 %v6573_v18  ;;  %5551 = vmatpush3.bf16.msra.mxu1 %v6616_v13 }
 0xe90   :  { %5523 = vmatprep.subr.bf16.mxu0 %v6577_v27  ;;  %5552 = vmatprep.subr.bf16.mxu1 %v5964_v34 }
 0xe93   :  { %5525 = vmatpush1.bf16.msra.mxu0 %v6579_v39  ;;  %5554 = vmatpush3.bf16.msra.mxu1 %v6622_v43 }
 0xe94   :  { %5527 = vmatprep.subr.bf16.mxu0 %v6583_v50  ;;  %5555 = vmatprep.subr.bf16.mxu1 %v5964_v34 }
 0xe97   :  { %5529 = vmatpush1.bf16.msra.mxu0 %v6585_v61  ;;  %5557 = vmatpush3.bf16.msra.mxu1 %v6625_v22 }
 0xe98   :  { %5531 = vmatprep.subr.bf16.mxu0 %v6589_v10  ;;  %5558 = vmatprep.subr.bf16.mxu1 %v5964_v34 }
 0xe9b   :  { %5533 = vmatpush1.bf16.msra.mxu0 %v6591_v20  ;;  %5560 = vmatpush3.bf16.msra.mxu1 %v6629_v19 }
 0xe9c   :  { %5535 = vmatprep.subr.bf16.mxu0 %v6595_v47  ;;  %5561 = vmatprep.subr.bf16.mxu1 %v5964_v34 }
 0xe9f   :  { %5537 = vmatpush1.bf16.msra.mxu0 %v6597_v29  ;;  %5563 = vmatpush3.bf16.msra.mxu1 %v6633_v37 }
 0xea0   :  { %5539 = vmatprep.subr.bf16.mxu0 %v6601_v42  ;;  %5564 = vmatprep.subr.bf16.mxu1 %v5964_v34 }
 0xea3   :  { %5541 = vmatpush1.bf16.msra.mxu0 %v6603_v62  ;;  %5566 = vmatpush3.bf16.msra.mxu1 %v6637_v55 }
 0xea4   :  { %5543 = vmatprep.subr.bf16.mxu0 %v6610_v2  ;;  %5567 = vmatprep.subr.bf16.mxu1 %v5964_v34  ;;  %v2052_v2 = vadd.f32 %v6715_v14, %v6727_v60  ;;  %v3472_v14 = vld [vmem:[#allocation9 + $0x8] sm:$0xff] }
 0xea5   :  { %v5571_v35 = vpack.c.bf16 %v3472_v14, %v3471_v63 }
 0xea7   :  { %5545 = vmatpush1.bf16.msra.mxu0 %v6613_v40  ;;  %5569 = vmatpush3.bf16.msra.mxu1 %v6641_v6 }
 0xea8   :  { %5570 = vmatprep.subr.bf16.mxu0 %v5964_v34 }
 0xf5d   :  { %v3210_v16 = vpop.f32.mrb[28].mxu0  ;;  %v3281_v21 = vpop.f32.mrb[44].mxu1 }
 0xf5e   :  { %v5651_v18 = vadd.f32 %v6717_v17, %v3210_v16  ;;  %v3212_v27 = vpop.f32.mrb[29].mxu0  ;;  %v4539_v39 = vpop.f32.mrb[45].mxu1  ;;  %v3282_v62 = vadd.f32 %v3281_v21, %v6724_v44 }
 0xf5f   :  { %v5653_v61 = vadd.f32 %v6719_v28, %v3212_v27 }
 0xf60   :  { %v3630_v50 = vmul.f32 -1.442695, %v5651_v18  ;;  %v2057_v18 = vadd.f32 %v6711_v49, %v6727_v60 }
 0xf61   :  { %v3631_v10 = vmul.f32 -1.442695, %v5653_v61 }
 0xf62   :  { %5842 = vpow2.f32 %v3630_v50 }
 0xf63   :  { %5844 = vpow2.f32 %v3631_v10 }
 0xf6c   :  { %v5843_v20 = vpop.eup %5842 }
 0xf6d   :  { %v3289_v47 = vadd.f32 1.0, %v5843_v20  ;;  %v5845_v29 = vpop.eup %5844 }
 0xf6e   :  { %v3296_v42 = vadd.f32 1.0, %v5845_v29 }
 0xf6f   :  { %5846 = vrcp.f32 %v3289_v47 }
 0xf70   :  { %5848 = vrcp.f32 %v3296_v42 }
 0xf79   :  { %v5847_v38 = vpop.eup %5846 }
 0xf7a   :  { %v3299_v40 = vmul.f32 %v5847_v38, %v3282_v62  ;;  %v5849_v43 = vpop.eup %5848 }
 0xf7b   :  { %v3302_v22 = vsub.f32 1.0, %v5849_v43  ;;  %v3304_v55 = vmul.f32 %v5849_v43, %v3140_v33 }
 0xf7c   :  { %v3300_v13 = vadd.f32 %v3299_v40, %v2052_v2 }
 0xf7e   :  { %5850 = vtanh.f32 %v3300_v13 }
 0xf88   :  { %v5851_v19 = vpop.eup %5850 }
 0xf89   :  { %v3303_v37 = vmul.f32 %v5851_v19, %v3302_v22 }
 0xf8b   :  { %v6996_v6 = vadd.f32 %v3304_v55, %v3303_v37 }
 0xf8d   :  { %3374 = vmatmul.mubr.f32.vlgmr.msra.gmra.mrb[30].mxu0 %v6996_v6  ;;  %4573 = vmatmul.mubr.f32.vlgmr.msra.gmra.mrb[46].mxu1 %v6996_v6 }
 0xf8e   :  { %4607 = vmatprep.mubr.msk.f32.mxu0 %vm5965_vm2, %v5963_v0  ;;  %5572 = vmatpush3.bf16.msra.mxu0 %v5571_v35  ;;  %v3478_v0 = vld [vmem:[#allocation9 + $0x38] sm:$0xff] }
 0xf8f   :  { %5573 = vmatprep.subr.bf16.mxu0 %v5964_v34  ;;  %v5580_v23 = vpack.c.bf16 %v3478_v0, %v3477_v3 }
 0xf92   :  { %5575 = vmatpush3.bf16.msra.mxu0 %v5574_v59 }
 0xf93   :  { %5576 = vmatprep.subr.bf16.mxu0 %v5964_v34 }
 0xf96   :  { %5578 = vmatpush3.bf16.msra.mxu0 %v5577_v25 }
 0xf97   :  { %5579 = vmatprep.subr.bf16.mxu0 %v5964_v34 }
 0xf9a   :  { %5581 = vmatpush3.bf16.msra.mxu0 %v5580_v23 }
 0xf9b   :  { %5582 = vmatprep.subr.bf16.mxu0 %v5964_v34 }
 0xf9e   :  { %5584 = vmatpush3.bf16.msra.mxu0 %v5583_v26 }
 0xf9f   :  { %5585 = vmatprep.subr.bf16.mxu0 %v5964_v34 }
 0xfa2   :  { %5587 = vmatpush3.bf16.msra.mxu0 %v5586_v41 }
 0xfa3   :  { %5588 = vmatprep.subr.bf16.mxu0 %v5964_v34 }
 0xfa6   :  { %5590 = vmatpush3.bf16.msra.mxu0 %v5589_v7 }
 0xfa7   :  { %5591 = vmatprep.subr.bf16.mxu0 %v5964_v34 }
 0xfaa   :  { %5593 = vmatpush3.bf16.msra.mxu0 %v5592_v1 }
0x1060   :  { %v3375_v54 = vpop.f32.mrb[30].mxu0  ;;  %v3446_v8 = vpop.f32.mrb[46].mxu1 }
0x1061   :  { %v5655_v4 = vadd.f32 %v6717_v17, %v3375_v54  ;;  %v3377_v5 = vpop.f32.mrb[31].mxu0  ;;  %v4574_v11 = vpop.f32.mrb[47].mxu1  ;;  %v3447_v34 = vadd.f32 %v3446_v8, %v6724_v44  ;;  %v3634_v44 = vld [vmem:[%s7037_s7] ss:$0 sm:$0xff] }
0x1062   :  { %v5657_v32 = vadd.f32 %v6719_v28, %v3377_v5 }
0x1063   :  { %v3632_v30 = vmul.f32 -1.442695, %v5655_v4 }
0x1064   :  { %v3633_v9 = vmul.f32 -1.442695, %v5657_v32 }
0x1065   :  { %5852 = vpow2.f32 %v3632_v30 }
0x1066   :  { %5854 = vpow2.f32 %v3633_v9 }
0x106f   :  { %v5853_v12 = vpop.eup %5852 }
0x1070   :  { %v3454_v56 = vadd.f32 1.0, %v5853_v12  ;;  %v5855_v33 = vpop.eup %5854 }
0x1071   :  { %v3461_v16 = vadd.f32 1.0, %v5855_v33 }
0x1072   :  { %5856 = vrcp.f32 %v3454_v56 }
0x1073   :  { %5858 = vrcp.f32 %v3461_v16 }
0x107c   :  { %v5857_v21 = vpop.eup %5856 }
0x107d   :  { %v3464_v17 = vmul.f32 %v5857_v21, %v3447_v34  ;;  %v5859_v39 = vpop.eup %5858 }
0x107e   :  { %v3467_v28 = vsub.f32 1.0, %v5859_v39  ;;  %v3469_v10 = vmul.f32 %v5859_v39, %v6996_v6 }
0x107f   :  { %v3465_v27 = vadd.f32 %v3464_v17, %v2057_v18 }
0x1081   :  { %5860 = vtanh.f32 %v3465_v27 }
0x108b   :  { %v5861_v50 = vpop.eup %5860 }
0x108c   :  { %v3468_v61 = vmul.f32 %v5861_v50, %v3467_v28 }
0x108e   :  { %v3470_v20 = vadd.f32 %v3469_v10, %v3468_v61 }
0x1090   :  { %4608 = vmatmul.mubr.f32.vlgmr.msra.gmra.mrb[32].mxu0 %v3470_v20 }
0x1163   :  { %v3560_v47 = vpop.f32.mrb[32].mxu0 }
0x1164   :  { %v3561_v49 = vadd.f32 %v3634_v44, %v3560_v47  ;;  %v4609_v60 = vpop.f32.mrb[33].mxu0 }
0x1166   :  { %3564 = vst [vmem:[#allocation10] sm:$0xff] %v3561_v49 }
0x1167   :  { %5939 = shalt.err (!%p5936_p0)
}
0x1168   :  { %s5940_s26 = scalar_lea.hbm %s7038_s8, 128 }
0x1169   :  { %p5941_p1 = scmp.ne.s32.totalorder %s7038_s8, %s5940_s26  ;;  %p5944_p2 = scmp.lt.u32.totalorder %s5940_s26, %s7038_s8 }
0x116b   :  { %p5946_p3 = pnand %p5944_p2, %p5941_p1 }
0x116d   :  { %5949 = shalt.err (!%p5946_p3)
}
0x116e   :  { %3574 = dma.vmem_to_hbm [thread:$0]  %s3572_s23, 128, %s7038_s8, [#allocation6]  }
0x116f   :  { %5954 = dma.done.wait [#allocation6], 128  }
0x1170   :  { %5955 = vsyncadd [#allocation6], 4294967168 }
0x1171   :  { %3578 = vsyncpa [#allocation5], 1 }
0x1172   :  { %3579 = vsyncpa [#allocation8], 1 }
0x1173   :  { %3580 = vsyncpa [#allocation6], 1 }

</bundles_post_ra>
